<compile_context>
chip_gen: v6e
topology: v6e:2x2x1
jax: 0.10.0
libtpu: 0.0.40
codegen_flags: <defaults>
</compile_context>

<pallas_src>
import functools

import jax
import jax.numpy as jnp
from jax.experimental import pallas as pl
from jax.experimental.pallas import tpu as pltpu


# ---------------- one-time parameter preprocessing (hoisted out of forward) ----------------

def _conv_dense(w_oihw, H, W, stride, pad, in_fmt="NHWC", out_fmt="NHWC"):
    """Dense GEMM operator D with  flatten_in(x) @ D == flatten_out(conv2d(x, w)).

    Built once at init by pushing an identity basis through lax.conv (bias excluded)."""
    Cout, Cin, KH, KW = w_oihw.shape
    n_in = H * W * Cin
    if in_fmt == "NHWC":
        basis = jnp.eye(n_in, dtype=jnp.float32).reshape(n_in, H, W, Cin)
    else:  # "NCHW"
        basis = jnp.eye(n_in, dtype=jnp.float32).reshape(n_in, Cin, H, W)
    out = jax.lax.conv_general_dilated(
        basis,
        jnp.transpose(w_oihw, (2, 3, 1, 0)),                    # OIHW -> HWIO
        window_strides=(stride, stride),
        padding=[(pad, pad), (pad, pad)],
        dimension_numbers=(in_fmt, "HWIO", out_fmt),
    )
    return out.reshape(n_in, -1)


def _convT_dense(w_iohw, H, W, stride, pad=1, in_fmt="NHWC", out_fmt="NHWC"):
    """Dense GEMM operator for nn.ConvTranspose2d(k=3, stride, padding=1,
    output_padding=stride-1): flatten_in(x) @ D == flatten_out(conv_transpose(x, w)).
    Lowered (at init only) to an input-dilated conv with the spatially flipped kernel."""
    Cin, Cout, KH, KW = w_iohw.shape
    out_pad = stride - 1
    p0 = KH - 1 - pad
    n_in = H * W * Cin
    if in_fmt == "NHWC":
        basis = jnp.eye(n_in, dtype=jnp.float32).reshape(n_in, H, W, Cin)
    else:
        basis = jnp.eye(n_in, dtype=jnp.float32).reshape(n_in, Cin, H, W)
    w_conv = jnp.transpose(jnp.flip(w_iohw, axis=(2, 3)), (2, 3, 0, 1))   # -> HWIO, flipped
    out = jax.lax.conv_general_dilated(
        basis, w_conv,
        window_strides=(1, 1),
        padding=[(p0, p0 + out_pad), (p0, p0 + out_pad)],
        lhs_dilation=(stride, stride),
        dimension_numbers=(in_fmt, "HWIO", out_fmt),
    )
    return out.reshape(n_in, -1)


def init_params(key, in_ch=4, out_ch=2, channels=(8, 16, 32)):
    """Raw parameters in the PyTorch layouts (OIHW conv, IOHW transposed conv)."""
    c0, c1, c2 = channels
    ks = jax.random.split(key, 10)

    def convw(k, cout, cin, ksz=3):
        return 0.1 * jax.random.normal(k, (cout, cin, ksz, ksz), jnp.float32)

    def convtw(k, cin, cout, ksz=3):
        return 0.1 * jax.random.normal(k, (cin, cout, ksz, ksz), jnp.float32)

    return {
        # top down: Conv(in_ch -> c0, s=2) + IN + PReLU
        "w0": convw(ks[0], c0, in_ch), "b0": 0.01 * jax.random.normal(ks[1], (c0,)),
        # inner down: Conv(c0 -> c1, s=2) + IN + PReLU
        "w1": convw(ks[2], c1, c0), "b1": 0.01 * jax.random.normal(ks[3], (c1,)),
        # bottom: Conv(c1 -> c2, s=1) + IN + PReLU
        "wb": convw(ks[4], c2, c1), "bb": 0.01 * jax.random.normal(ks[5], (c2,)),
        # inner up: ConvT(c1+c2 -> c0, s=2) + IN + PReLU
        "wu1": convtw(ks[6], c1 + c2, c0), "bu1": 0.01 * jax.random.normal(ks[7], (c0,)),
        # top up (conv_only since is_top & num_res_units==0): ConvT(2*c0 -> out_ch, s=2)
        "wu0": convtw(ks[8], 2 * c0, out_ch), "bu0": 0.01 * jax.random.normal(ks[9], (out_ch,)),
        # nn.PReLU() default single slope = 0.25 per Convolution block
        "a0": jnp.array(0.25, jnp.float32), "a1": jnp.array(0.25, jnp.float32),
        "ab": jnp.array(0.25, jnp.float32), "au1": jnp.array(0.25, jnp.float32),
    }


def preprocess(p, *, channels=(8, 16, 32), H=16, W=16, gemm_dtype=jnp.bfloat16):
    """Fold every conv / transposed conv into a GEMM operator, pre-broadcast the biases and
    stack the PReLU slopes.  Runs once; the forward pass contains zero weight-layout work.
    (InstanceNorm pool/broadcast operators are now generated inside the kernel — no HBM.)"""
    c0, c1, c2 = channels
    H0, W0 = H // 2, W // 2            # after down 0 (stride 2)
    H1, W1 = H0 // 2, W0 // 2          # after down 1 (stride 2)
    S, S0, S1 = H * W, H0 * W0, H1 * W1

    g = {}
    # Conv GEMM operators (bf16 MXU operands).  Input x is consumed in NCHW-flat order
    # (free reshape in the wrapper); the final operator writes NCHW-flat output directly.
    g["W0"] = _conv_dense(p["w0"], H, W, 2, 1, in_fmt="NCHW").astype(gemm_dtype)      # (CHW, S0*c0)
    g["W1"] = _conv_dense(p["w1"], H0, W0, 2, 1).astype(gemm_dtype)                    # (S0*c0, S1*c1)
    g["Wb"] = _conv_dense(p["wb"], H1, W1, 1, 1).astype(gemm_dtype)                    # (S1*c1, S1*c2)
    # SkipConnection(cat([d1, bt])) -> split the ConvT weight along input channels.
    g["Wu1a"] = _convT_dense(p["wu1"][:c1], H1, W1, 2).astype(gemm_dtype)              # d1 part
    g["Wu1b"] = _convT_dense(p["wu1"][c1:], H1, W1, 2).astype(gemm_dtype)              # bt part
    # SkipConnection(cat([d0, u1])) -> split; output emitted NCHW-flat.
    g["Wu0a"] = _convT_dense(p["wu0"][:c0], H0, W0, 2, out_fmt="NCHW").astype(gemm_dtype)
    g["Wu0b"] = _convT_dense(p["wu0"][c0:], H0, W0, 2, out_fmt="NCHW").astype(gemm_dtype)
    # Biases pre-broadcast to the flat activation layouts (f32).
    g["b0"] = jnp.tile(p["b0"], S0).reshape(1, -1)
    g["b1"] = jnp.tile(p["b1"], S1).reshape(1, -1)
    g["bb"] = jnp.tile(p["bb"], S1).reshape(1, -1)
    g["bu1"] = jnp.tile(p["bu1"], S0).reshape(1, -1)
    g["bu0"] = jnp.repeat(p["bu0"], S).reshape(1, -1)          # NCHW-flat
    # PReLU slopes (SMEM scalars).
    g["alpha"] = jnp.stack([p["a0"], p["a1"], p["ab"], p["au1"]]).astype(jnp.float32)
    return g


# ------------------------------ the single fused Pallas kernel ------------------------------

def _unet_fused_kernel(alpha_ref, x_ref,
                       w0_ref, b0_ref,
                       w1_ref, b1_ref,
                       wb_ref, bb_ref,
                       wu1a_ref, wu1b_ref, bu1_ref,
                       wu0a_ref, wu0b_ref, bu0_ref,
                       o_ref, *, eps, gemm_dtype, stat_dims):

    def dotg(a, b_ref):
        # bf16 operands (MXU-native on v6e/v7x), f32 accumulation.
        return jnp.dot(a.astype(gemm_dtype), b_ref[...],
                       preferred_element_type=jnp.float32)

    def lane_channel(idx, C):
        # channel index from a flat NHWC index; C is a power of two here -> bitwise and.
        return (idx & (C - 1)) if (C & (C - 1)) == 0 else (idx % C)

    # 0/1 InstanceNorm pool / broadcast operators, generated in-register from iota masks
    # (no HBM traffic; VPU compare/select in otherwise idle slots).  Memoized per (S, C)
    # so the two (S0, c0) IN blocks share one pair.
    mask_cache = {}

    def stat_masks(S, C):
        key = (S, C)
        if key not in mask_cache:
            n = S * C
            pool = jnp.where(
                lane_channel(jax.lax.broadcasted_iota(jnp.int32, (n, 128), 0), C)
                == jax.lax.broadcasted_iota(jnp.int32, (n, 128), 1),
                jnp.float32(1.0 / S), jnp.float32(0.0))
            bcast = jnp.where(
                jax.lax.broadcasted_iota(jnp.int32, (128, n), 0)
                == lane_channel(jax.lax.broadcasted_iota(jnp.int32, (128, n), 1), C),
                jnp.float32(1.0), jnp.float32(0.0))
            mask_cache[key] = (pool, bcast)
        return mask_cache[key]

    def in_prelu(y, dims, alpha):
        # InstanceNorm (biased variance, torch eps=1e-5) + PReLU (single shared slope),
        # all stats math in f32.  Two matmuls total per IN:
        #   [y ; y*y] @ pool -> E[y], E[y^2]   (M x 128 per-channel stats)
        #   [rstd ; -mean*rstd] @ bcast -> per-element scale/shift in the flat layout.
        S, C = dims
        m = y.shape[0]
        pool, bcast = stat_masks(S, C)
        st = jnp.dot(jnp.concatenate([y, y * y], axis=0), pool,
                     preferred_element_type=jnp.float32)                  # (2m, 128)
        mean, ey2 = st[:m], st[m:]
        var = jnp.maximum(ey2 - mean * mean, 0.0)                         # clamp cancellation
        rstd = jax.lax.rsqrt(var + eps)
        sb = jnp.dot(jnp.concatenate([rstd, -mean * rstd], axis=0), bcast,
                     preferred_element_type=jnp.float32)                  # (2m, S*C)
        z = y * sb[:m] + sb[m:]
        return jnp.where(z >= 0.0, z, alpha * z)                          # PReLU

    x = x_ref[...]                                                        # (rb, Cin*H*W)

    # top down layer: Conv s=2 -> InstanceNorm -> PReLU
    d0 = in_prelu(dotg(x, w0_ref) + b0_ref[...], stat_dims[0], alpha_ref[0])
    # inner down layer
    d1 = in_prelu(dotg(d0, w1_ref) + b1_ref[...], stat_dims[1], alpha_ref[1])
    # bottom layer (stride 1)
    bt = in_prelu(dotg(d1, wb_ref) + bb_ref[...], stat_dims[2], alpha_ref[2])
    # SkipConnection(cat([d1, bt])) + inner up ConvT s=2 -> IN -> PReLU
    # (concat folded into two K-split accumulated GEMMs).
    u1 = in_prelu(dotg(d1, wu1a_ref) + dotg(bt, wu1b_ref) + bu1_ref[...],
                  stat_dims[3], alpha_ref[3])
    # Top SkipConnection(cat([d0, u1])) + top up ConvT s=2 (conv_only) + final Sigmoid.
    out = dotg(d0, wu0a_ref) + dotg(u1, wu0b_ref) + bu0_ref[...]
    o_ref[...] = jax.nn.sigmoid(out)                                      # f32, lane-dense


def unet_double_forward(x_nchw, g, *, channels=(8, 16, 32), row_block=256):
    """forward(x) = sigmoid(model1(x)).  x_nchw: (N, Cin, H, W) -> (N, out_ch, H, W).

    Batch rows are tiled with a parallel row grid (weights fetched once, grid-invariant),
    so larger batches amortize the weight DMA and use both v7x TensorCores."""
    N, Cin, H, W = x_nchw.shape
    c0, c1, c2 = channels
    H0, W0 = H // 2, W // 2
    H1, W1 = H0 // 2, W0 // 2
    S0, S1 = H0 * W0, H1 * W1
    n_in = Cin * H * W
    n_out = g["bu0"].shape[1]
    out_ch = n_out // (H * W)

    M8 = max(8, ((N + 7) // 8) * 8)           # at least the 8-sublane native tile
    rb = min(row_block, M8)                    # rows per grid step (<= MXU-height-ish)
    M = ((M8 + rb - 1) // rb) * rb
    grid = (M // rb,)

    # NCHW-flat input (free reshape; the layer-0 operator was built for this order).
    x_flat = x_nchw.reshape(N, n_in).astype(jnp.float32)
    x_flat = jnp.pad(x_flat, ((0, M - N), (0, 0)))

    operands = [g["alpha"], x_flat,
                g["W0"], g["b0"],
                g["W1"], g["b1"],
                g["Wb"], g["bb"],
                g["Wu1a"], g["Wu1b"], g["bu1"],
                g["Wu0a"], g["Wu0b"], g["bu0"]]

    in_specs = [pl.BlockSpec(memory_space=pltpu.MemorySpace.SMEM),        # PReLU slopes
                pl.BlockSpec((rb, n_in), lambda i: (i, 0))]               # row-tiled input
    # Weights / biases: whole-array VMEM blocks with a grid-invariant index map
    # (DMA'd once, not re-fetched per grid step).
    # TODO(synk): add pipeline_mode=pl.Buffered(1) on these constant specs (and a K/N-tiled
    # grid) if H/W/channels are scaled up enough to pressure v7x's 64 MiB VMEM.
    in_specs += [pl.BlockSpec(a.shape, lambda i: (0, 0)) for a in operands[2:]]

    kern = functools.partial(
        _unet_fused_kernel, eps=1e-5, gemm_dtype=g["W0"].dtype,
        stat_dims=((S0, c0), (S1, c1), (S1, c2), (S0, c0)))

    out = pl.pallas_call(
        kern,
        out_shape=jax.ShapeDtypeStruct((M, n_out), jnp.float32),
        grid=grid,
        in_specs=in_specs,
        out_specs=pl.BlockSpec((rb, n_out), lambda i: (i, 0)),
        compiler_params=pltpu.CompilerParams(
            dimension_semantics=("parallel",),
            vmem_limit_bytes=32 * 1024 * 1024,
        ),
    )(*operands)

    # Output is already NCHW-flat; drop the padded batch rows and reshape (no transpose).
    return out[:N].reshape(N, out_ch, H, W)


if __name__ == "__main__":
    key = jax.random.PRNGKey(0)
    kx, kp = jax.random.split(key)
    x = jax.random.normal(kx, (2, 4, 16, 16), jnp.float32)         # NCHW, like PyTorch
    params = init_params(kp, in_ch=4, out_ch=2, channels=(8, 16, 32))
    gemm_params = preprocess(params, channels=(8, 16, 32), H=16, W=16)

    fwd = jax.jit(unet_double_forward)
    y = fwd(x, gemm_params)
    jax.block_until_ready(y)

    assert y.shape == (2, 2, 16, 16), y.shape
    assert bool(jnp.all(jnp.isfinite(y)))
    assert bool(jnp.all((y >= 0.0) & (y <= 1.0)))                  # sigmoid range
    print("KERNEL_OK")
</pallas_src>

<mosaic_0001>
module attributes {stable_mosaic.version = 11 : i64} {
  func.func @_unet_fused_kernel(%arg0: i32, %arg1: memref<4xf32, #tpu.memory_space<smem>>, %arg2: memref<8x1024xf32, #tpu.memory_space<vmem>>, %arg3: memref<1024x512xbf16, #tpu.memory_space<vmem>>, %arg4: memref<1x512xf32, #tpu.memory_space<vmem>>, %arg5: memref<512x256xbf16, #tpu.memory_space<vmem>>, %arg6: memref<1x256xf32, #tpu.memory_space<vmem>>, %arg7: memref<256x512xbf16, #tpu.memory_space<vmem>>, %arg8: memref<1x512xf32, #tpu.memory_space<vmem>>, %arg9: memref<256x512xbf16, #tpu.memory_space<vmem>>, %arg10: memref<512x512xbf16, #tpu.memory_space<vmem>>, %arg11: memref<1x512xf32, #tpu.memory_space<vmem>>, %arg12: memref<512x512xbf16, #tpu.memory_space<vmem>>, %arg13: memref<512x512xbf16, #tpu.memory_space<vmem>>, %arg14: memref<1x512xf32, #tpu.memory_space<vmem>>, %arg15: memref<8x512xf32, #tpu.memory_space<vmem>>) attributes {dimension_semantics = [#tpu.dimension_semantics<parallel>], iteration_bounds = array<i64: 1>, scalar_prefetch = 0 : i64, scratch_operands = 0 : i64, tpu.core_type = #tpu.core_type<tc>, window_params = [{transform_indices = @transform_0, window_bounds = array<i64: 4>}, {transform_indices = @transform_1, window_bounds = array<i64: 8, 1024>}, {pipeline_mode = #tpu.pipeline_mode<synchronous>, transform_indices = @transform_2, window_bounds = array<i64: 1024, 512>}, {pipeline_mode = #tpu.pipeline_mode<synchronous>, transform_indices = @transform_3, window_bounds = array<i64: 1, 512>}, {pipeline_mode = #tpu.pipeline_mode<synchronous>, transform_indices = @transform_4, window_bounds = array<i64: 512, 256>}, {pipeline_mode = #tpu.pipeline_mode<synchronous>, transform_indices = @transform_5, window_bounds = array<i64: 1, 256>}, {pipeline_mode = #tpu.pipeline_mode<synchronous>, transform_indices = @transform_6, window_bounds = array<i64: 256, 512>}, {pipeline_mode = #tpu.pipeline_mode<synchronous>, transform_indices = @transform_7, window_bounds = array<i64: 1, 512>}, {pipeline_mode = #tpu.pipeline_mode<synchronous>, transform_indices = @transform_8, window_bounds = array<i64: 256, 512>}, {pipeline_mode = #tpu.pipeline_mode<synchronous>, transform_indices = @transform_9, window_bounds = array<i64: 512, 512>}, {pipeline_mode = #tpu.pipeline_mode<synchronous>, transform_indices = @transform_10, window_bounds = array<i64: 1, 512>}, {pipeline_mode = #tpu.pipeline_mode<synchronous>, transform_indices = @transform_11, window_bounds = array<i64: 512, 512>}, {pipeline_mode = #tpu.pipeline_mode<synchronous>, transform_indices = @transform_12, window_bounds = array<i64: 512, 512>}, {pipeline_mode = #tpu.pipeline_mode<synchronous>, transform_indices = @transform_13, window_bounds = array<i64: 1, 512>}, {transform_indices = @transform_14, window_bounds = array<i64: 8, 512>}]} {
    %c0 = arith.constant 0 : index
    %c0_0 = arith.constant 0 : index
    %0 = vector.load %arg2[%c0, %c0_0] : memref<8x1024xf32, #tpu.memory_space<vmem>>, vector<8x1024xf32>
    %1 = arith.truncf %0 : vector<8x1024xf32> to vector<8x1024xbf16>
    %c0_1 = arith.constant 0 : index
    %c0_2 = arith.constant 0 : index
    %2 = vector.load %arg3[%c0_1, %c0_2] : memref<1024x512xbf16, #tpu.memory_space<vmem>>, vector<1024x512xbf16>
    %cst = arith.constant dense<0.000000e+00> : vector<8x512xf32>
    %3 = tpu.matmul %1, %2, %cst {dimension_numbers = #tpu.dot_dimension_numbers<[1], [0], [0], [1], [0, 0, 1, 1], [], []>} : vector<8x1024xbf16>, vector<1024x512xbf16>, vector<8x512xf32> -> vector<8x512xf32>
    %c0_3 = arith.constant 0 : index
    %c0_4 = arith.constant 0 : index
    %4 = vector.load %arg4[%c0_3, %c0_4] : memref<1x512xf32, #tpu.memory_space<vmem>>, vector<1x512xf32>
    %5 = vector.broadcast %4 : vector<1x512xf32> to vector<8x512xf32>
    %6 = arith.addf %3, %5 : vector<8x512xf32>
    %c0_5 = arith.constant 0 : index
    %7 = memref.load %arg1[%c0_5] : memref<4xf32, #tpu.memory_space<smem>>
    %8 = tpu.iota {dimensions = array<i32: 0>} : vector<512x128xi32>
    %c7_i32 = arith.constant 7 : i32
    %9 = vector.broadcast %c7_i32 : i32 to vector<512x128xi32>
    %10 = arith.andi %8, %9 : vector<512x128xi32>
    %11 = tpu.iota {dimensions = array<i32: 1>} : vector<512x128xi32>
    %12 = arith.cmpi eq, %10, %11 : vector<512x128xi32>
    %cst_6 = arith.constant 1.562500e-02 : f32
    %cst_7 = arith.constant 0.000000e+00 : f32
    %13 = vector.broadcast %cst_6 : f32 to vector<512x128xf32>
    %14 = vector.broadcast %cst_7 : f32 to vector<512x128xf32>
    %15 = arith.select %12, %13, %14 : vector<512x128xi1>, vector<512x128xf32>
    %16 = tpu.iota {dimensions = array<i32: 0>} : vector<128x512xi32>
    %17 = tpu.iota {dimensions = array<i32: 1>} : vector<128x512xi32>
    %c7_i32_8 = arith.constant 7 : i32
    %18 = vector.broadcast %c7_i32_8 : i32 to vector<128x512xi32>
    %19 = arith.andi %17, %18 : vector<128x512xi32>
    %20 = arith.cmpi eq, %16, %19 : vector<128x512xi32>
    %cst_9 = arith.constant 1.000000e+00 : f32
    %cst_10 = arith.constant 0.000000e+00 : f32
    %21 = vector.broadcast %cst_9 : f32 to vector<128x512xf32>
    %22 = vector.broadcast %cst_10 : f32 to vector<128x512xf32>
    %23 = arith.select %20, %21, %22 : vector<128x512xi1>, vector<128x512xf32>
    %24 = arith.mulf %6, %6 : vector<8x512xf32>
    %25 = tpu.concatenate %6, %24 in 0 : vector<8x512xf32>, vector<8x512xf32> -> vector<16x512xf32>
    %cst_11 = arith.constant dense<0.000000e+00> : vector<16x128xf32>
    %26 = tpu.matmul %25, %15, %cst_11 {dimension_numbers = #tpu.dot_dimension_numbers<[1], [0], [0], [1], [0, 0, 1, 1], [], []>} : vector<16x512xf32>, vector<512x128xf32>, vector<16x128xf32> -> vector<16x128xf32>
    %27 = vector.extract_strided_slice %26 {offsets = [0, 0], sizes = [8, 128], strides = [1, 1]} : vector<16x128xf32> to vector<8x128xf32>
    %28 = vector.extract_strided_slice %26 {offsets = [8, 0], sizes = [8, 128], strides = [1, 1]} : vector<16x128xf32> to vector<8x128xf32>
    %29 = arith.mulf %27, %27 : vector<8x128xf32>
    %30 = arith.subf %28, %29 : vector<8x128xf32>
    %cst_12 = arith.constant 0.000000e+00 : f32
    %31 = vector.broadcast %cst_12 : f32 to vector<8x128xf32>
    %32 = arith.maximumf %30, %31 : vector<8x128xf32>
    %cst_13 = arith.constant 9.99999974E-6 : f32
    %33 = vector.broadcast %cst_13 : f32 to vector<8x128xf32>
    %34 = arith.addf %32, %33 : vector<8x128xf32>
    %35 = math.rsqrt %34 : vector<8x128xf32>
    %cst_14 = arith.constant 0.000000e+00 : f32
    %36 = vector.broadcast %cst_14 : f32 to vector<8x128xf32>
    %37 = arith.subf %36, %27 : vector<8x128xf32>
    %38 = arith.mulf %37, %35 : vector<8x128xf32>
    %39 = tpu.concatenate %35, %38 in 0 : vector<8x128xf32>, vector<8x128xf32> -> vector<16x128xf32>
    %cst_15 = arith.constant dense<0.000000e+00> : vector<16x512xf32>
    %40 = tpu.matmul %39, %23, %cst_15 {dimension_numbers = #tpu.dot_dimension_numbers<[1], [0], [0], [1], [0, 0, 1, 1], [], []>} : vector<16x128xf32>, vector<128x512xf32>, vector<16x512xf32> -> vector<16x512xf32>
    %41 = vector.extract_strided_slice %40 {offsets = [0, 0], sizes = [8, 512], strides = [1, 1]} : vector<16x512xf32> to vector<8x512xf32>
    %42 = arith.mulf %6, %41 : vector<8x512xf32>
    %43 = vector.extract_strided_slice %40 {offsets = [8, 0], sizes = [8, 512], strides = [1, 1]} : vector<16x512xf32> to vector<8x512xf32>
    %44 = arith.addf %42, %43 : vector<8x512xf32>
    %cst_16 = arith.constant 0.000000e+00 : f32
    %45 = vector.broadcast %cst_16 : f32 to vector<8x512xf32>
    %46 = arith.cmpf oge, %44, %45 : vector<8x512xf32>
    %47 = vector.broadcast %7 : f32 to vector<8x512xf32>
    %48 = arith.mulf %47, %44 : vector<8x512xf32>
    %49 = arith.select %46, %44, %48 : vector<8x512xi1>, vector<8x512xf32>
    %50 = arith.truncf %49 : vector<8x512xf32> to vector<8x512xbf16>
    %c0_17 = arith.constant 0 : index
    %c0_18 = arith.constant 0 : index
    %51 = vector.load %arg5[%c0_17, %c0_18] : memref<512x256xbf16, #tpu.memory_space<vmem>>, vector<512x256xbf16>
    %cst_19 = arith.constant dense<0.000000e+00> : vector<8x256xf32>
    %52 = tpu.matmul %50, %51, %cst_19 {dimension_numbers = #tpu.dot_dimension_numbers<[1], [0], [0], [1], [0, 0, 1, 1], [], []>} : vector<8x512xbf16>, vector<512x256xbf16>, vector<8x256xf32> -> vector<8x256xf32>
    %c0_20 = arith.constant 0 : index
    %c0_21 = arith.constant 0 : index
    %53 = vector.load %arg6[%c0_20, %c0_21] : memref<1x256xf32, #tpu.memory_space<vmem>>, vector<1x256xf32>
    %54 = vector.broadcast %53 : vector<1x256xf32> to vector<8x256xf32>
    %55 = arith.addf %52, %54 : vector<8x256xf32>
    %c1 = arith.constant 1 : index
    %56 = memref.load %arg1[%c1] : memref<4xf32, #tpu.memory_space<smem>>
    %57 = tpu.iota {dimensions = array<i32: 0>} : vector<256x128xi32>
    %c15_i32 = arith.constant 15 : i32
    %58 = vector.broadcast %c15_i32 : i32 to vector<256x128xi32>
    %59 = arith.andi %57, %58 : vector<256x128xi32>
    %60 = tpu.iota {dimensions = array<i32: 1>} : vector<256x128xi32>
    %61 = arith.cmpi eq, %59, %60 : vector<256x128xi32>
    %cst_22 = arith.constant 6.250000e-02 : f32
    %cst_23 = arith.constant 0.000000e+00 : f32
    %62 = vector.broadcast %cst_22 : f32 to vector<256x128xf32>
    %63 = vector.broadcast %cst_23 : f32 to vector<256x128xf32>
    %64 = arith.select %61, %62, %63 : vector<256x128xi1>, vector<256x128xf32>
    %65 = tpu.iota {dimensions = array<i32: 0>} : vector<128x256xi32>
    %66 = tpu.iota {dimensions = array<i32: 1>} : vector<128x256xi32>
    %c15_i32_24 = arith.constant 15 : i32
    %67 = vector.broadcast %c15_i32_24 : i32 to vector<128x256xi32>
    %68 = arith.andi %66, %67 : vector<128x256xi32>
    %69 = arith.cmpi eq, %65, %68 : vector<128x256xi32>
    %cst_25 = arith.constant 1.000000e+00 : f32
    %cst_26 = arith.constant 0.000000e+00 : f32
    %70 = vector.broadcast %cst_25 : f32 to vector<128x256xf32>
    %71 = vector.broadcast %cst_26 : f32 to vector<128x256xf32>
    %72 = arith.select %69, %70, %71 : vector<128x256xi1>, vector<128x256xf32>
    %73 = arith.mulf %55, %55 : vector<8x256xf32>
    %74 = tpu.concatenate %55, %73 in 0 : vector<8x256xf32>, vector<8x256xf32> -> vector<16x256xf32>
    %cst_27 = arith.constant dense<0.000000e+00> : vector<16x128xf32>
    %75 = tpu.matmul %74, %64, %cst_27 {dimension_numbers = #tpu.dot_dimension_numbers<[1], [0], [0], [1], [0, 0, 1, 1], [], []>} : vector<16x256xf32>, vector<256x128xf32>, vector<16x128xf32> -> vector<16x128xf32>
    %76 = vector.extract_strided_slice %75 {offsets = [0, 0], sizes = [8, 128], strides = [1, 1]} : vector<16x128xf32> to vector<8x128xf32>
    %77 = vector.extract_strided_slice %75 {offsets = [8, 0], sizes = [8, 128], strides = [1, 1]} : vector<16x128xf32> to vector<8x128xf32>
    %78 = arith.mulf %76, %76 : vector<8x128xf32>
    %79 = arith.subf %77, %78 : vector<8x128xf32>
    %cst_28 = arith.constant 0.000000e+00 : f32
    %80 = vector.broadcast %cst_28 : f32 to vector<8x128xf32>
    %81 = arith.maximumf %79, %80 : vector<8x128xf32>
    %cst_29 = arith.constant 9.99999974E-6 : f32
    %82 = vector.broadcast %cst_29 : f32 to vector<8x128xf32>
    %83 = arith.addf %81, %82 : vector<8x128xf32>
    %84 = math.rsqrt %83 : vector<8x128xf32>
    %cst_30 = arith.constant 0.000000e+00 : f32
    %85 = vector.broadcast %cst_30 : f32 to vector<8x128xf32>
    %86 = arith.subf %85, %76 : vector<8x128xf32>
    %87 = arith.mulf %86, %84 : vector<8x128xf32>
    %88 = tpu.concatenate %84, %87 in 0 : vector<8x128xf32>, vector<8x128xf32> -> vector<16x128xf32>
    %cst_31 = arith.constant dense<0.000000e+00> : vector<16x256xf32>
    %89 = tpu.matmul %88, %72, %cst_31 {dimension_numbers = #tpu.dot_dimension_numbers<[1], [0], [0], [1], [0, 0, 1, 1], [], []>} : vector<16x128xf32>, vector<128x256xf32>, vector<16x256xf32> -> vector<16x256xf32>
    %90 = vector.extract_strided_slice %89 {offsets = [0, 0], sizes = [8, 256], strides = [1, 1]} : vector<16x256xf32> to vector<8x256xf32>
    %91 = arith.mulf %55, %90 : vector<8x256xf32>
    %92 = vector.extract_strided_slice %89 {offsets = [8, 0], sizes = [8, 256], strides = [1, 1]} : vector<16x256xf32> to vector<8x256xf32>
    %93 = arith.addf %91, %92 : vector<8x256xf32>
    %cst_32 = arith.constant 0.000000e+00 : f32
    %94 = vector.broadcast %cst_32 : f32 to vector<8x256xf32>
    %95 = arith.cmpf oge, %93, %94 : vector<8x256xf32>
    %96 = vector.broadcast %56 : f32 to vector<8x256xf32>
    %97 = arith.mulf %96, %93 : vector<8x256xf32>
    %98 = arith.select %95, %93, %97 : vector<8x256xi1>, vector<8x256xf32>
    %99 = arith.truncf %98 : vector<8x256xf32> to vector<8x256xbf16>
    %c0_33 = arith.constant 0 : index
    %c0_34 = arith.constant 0 : index
    %100 = vector.load %arg7[%c0_33, %c0_34] : memref<256x512xbf16, #tpu.memory_space<vmem>>, vector<256x512xbf16>
    %cst_35 = arith.constant dense<0.000000e+00> : vector<8x512xf32>
    %101 = tpu.matmul %99, %100, %cst_35 {dimension_numbers = #tpu.dot_dimension_numbers<[1], [0], [0], [1], [0, 0, 1, 1], [], []>} : vector<8x256xbf16>, vector<256x512xbf16>, vector<8x512xf32> -> vector<8x512xf32>
    %c0_36 = arith.constant 0 : index
    %c0_37 = arith.constant 0 : index
    %102 = vector.load %arg8[%c0_36, %c0_37] : memref<1x512xf32, #tpu.memory_space<vmem>>, vector<1x512xf32>
    %103 = vector.broadcast %102 : vector<1x512xf32> to vector<8x512xf32>
    %104 = arith.addf %101, %103 : vector<8x512xf32>
    %c2 = arith.constant 2 : index
    %105 = memref.load %arg1[%c2] : memref<4xf32, #tpu.memory_space<smem>>
    %106 = tpu.iota {dimensions = array<i32: 0>} : vector<512x128xi32>
    %c31_i32 = arith.constant 31 : i32
    %107 = vector.broadcast %c31_i32 : i32 to vector<512x128xi32>
    %108 = arith.andi %106, %107 : vector<512x128xi32>
    %109 = tpu.iota {dimensions = array<i32: 1>} : vector<512x128xi32>
    %110 = arith.cmpi eq, %108, %109 : vector<512x128xi32>
    %cst_38 = arith.constant 6.250000e-02 : f32
    %cst_39 = arith.constant 0.000000e+00 : f32
    %111 = vector.broadcast %cst_38 : f32 to vector<512x128xf32>
    %112 = vector.broadcast %cst_39 : f32 to vector<512x128xf32>
    %113 = arith.select %110, %111, %112 : vector<512x128xi1>, vector<512x128xf32>
    %114 = tpu.iota {dimensions = array<i32: 0>} : vector<128x512xi32>
    %115 = tpu.iota {dimensions = array<i32: 1>} : vector<128x512xi32>
    %c31_i32_40 = arith.constant 31 : i32
    %116 = vector.broadcast %c31_i32_40 : i32 to vector<128x512xi32>
    %117 = arith.andi %115, %116 : vector<128x512xi32>
    %118 = arith.cmpi eq, %114, %117 : vector<128x512xi32>
    %cst_41 = arith.constant 1.000000e+00 : f32
    %cst_42 = arith.constant 0.000000e+00 : f32
    %119 = vector.broadcast %cst_41 : f32 to vector<128x512xf32>
    %120 = vector.broadcast %cst_42 : f32 to vector<128x512xf32>
    %121 = arith.select %118, %119, %120 : vector<128x512xi1>, vector<128x512xf32>
    %122 = arith.mulf %104, %104 : vector<8x512xf32>
    %123 = tpu.concatenate %104, %122 in 0 : vector<8x512xf32>, vector<8x512xf32> -> vector<16x512xf32>
    %cst_43 = arith.constant dense<0.000000e+00> : vector<16x128xf32>
    %124 = tpu.matmul %123, %113, %cst_43 {dimension_numbers = #tpu.dot_dimension_numbers<[1], [0], [0], [1], [0, 0, 1, 1], [], []>} : vector<16x512xf32>, vector<512x128xf32>, vector<16x128xf32> -> vector<16x128xf32>
    %125 = vector.extract_strided_slice %124 {offsets = [0, 0], sizes = [8, 128], strides = [1, 1]} : vector<16x128xf32> to vector<8x128xf32>
    %126 = vector.extract_strided_slice %124 {offsets = [8, 0], sizes = [8, 128], strides = [1, 1]} : vector<16x128xf32> to vector<8x128xf32>
    %127 = arith.mulf %125, %125 : vector<8x128xf32>
    %128 = arith.subf %126, %127 : vector<8x128xf32>
    %cst_44 = arith.constant 0.000000e+00 : f32
    %129 = vector.broadcast %cst_44 : f32 to vector<8x128xf32>
    %130 = arith.maximumf %128, %129 : vector<8x128xf32>
    %cst_45 = arith.constant 9.99999974E-6 : f32
    %131 = vector.broadcast %cst_45 : f32 to vector<8x128xf32>
    %132 = arith.addf %130, %131 : vector<8x128xf32>
    %133 = math.rsqrt %132 : vector<8x128xf32>
    %cst_46 = arith.constant 0.000000e+00 : f32
    %134 = vector.broadcast %cst_46 : f32 to vector<8x128xf32>
    %135 = arith.subf %134, %125 : vector<8x128xf32>
    %136 = arith.mulf %135, %133 : vector<8x128xf32>
    %137 = tpu.concatenate %133, %136 in 0 : vector<8x128xf32>, vector<8x128xf32> -> vector<16x128xf32>
    %cst_47 = arith.constant dense<0.000000e+00> : vector<16x512xf32>
    %138 = tpu.matmul %137, %121, %cst_47 {dimension_numbers = #tpu.dot_dimension_numbers<[1], [0], [0], [1], [0, 0, 1, 1], [], []>} : vector<16x128xf32>, vector<128x512xf32>, vector<16x512xf32> -> vector<16x512xf32>
    %139 = vector.extract_strided_slice %138 {offsets = [0, 0], sizes = [8, 512], strides = [1, 1]} : vector<16x512xf32> to vector<8x512xf32>
    %140 = arith.mulf %104, %139 : vector<8x512xf32>
    %141 = vector.extract_strided_slice %138 {offsets = [8, 0], sizes = [8, 512], strides = [1, 1]} : vector<16x512xf32> to vector<8x512xf32>
    %142 = arith.addf %140, %141 : vector<8x512xf32>
    %cst_48 = arith.constant 0.000000e+00 : f32
    %143 = vector.broadcast %cst_48 : f32 to vector<8x512xf32>
    %144 = arith.cmpf oge, %142, %143 : vector<8x512xf32>
    %145 = vector.broadcast %105 : f32 to vector<8x512xf32>
    %146 = arith.mulf %145, %142 : vector<8x512xf32>
    %147 = arith.select %144, %142, %146 : vector<8x512xi1>, vector<8x512xf32>
    %148 = arith.truncf %98 : vector<8x256xf32> to vector<8x256xbf16>
    %c0_49 = arith.constant 0 : index
    %c0_50 = arith.constant 0 : index
    %149 = vector.load %arg9[%c0_49, %c0_50] : memref<256x512xbf16, #tpu.memory_space<vmem>>, vector<256x512xbf16>
    %cst_51 = arith.constant dense<0.000000e+00> : vector<8x512xf32>
    %150 = tpu.matmul %148, %149, %cst_51 {dimension_numbers = #tpu.dot_dimension_numbers<[1], [0], [0], [1], [0, 0, 1, 1], [], []>} : vector<8x256xbf16>, vector<256x512xbf16>, vector<8x512xf32> -> vector<8x512xf32>
    %151 = arith.truncf %147 : vector<8x512xf32> to vector<8x512xbf16>
    %c0_52 = arith.constant 0 : index
    %c0_53 = arith.constant 0 : index
    %152 = vector.load %arg10[%c0_52, %c0_53] : memref<512x512xbf16, #tpu.memory_space<vmem>>, vector<512x512xbf16>
    %cst_54 = arith.constant dense<0.000000e+00> : vector<8x512xf32>
    %153 = tpu.matmul %151, %152, %cst_54 {dimension_numbers = #tpu.dot_dimension_numbers<[1], [0], [0], [1], [0, 0, 1, 1], [], []>} : vector<8x512xbf16>, vector<512x512xbf16>, vector<8x512xf32> -> vector<8x512xf32>
    %154 = arith.addf %150, %153 : vector<8x512xf32>
    %c0_55 = arith.constant 0 : index
    %c0_56 = arith.constant 0 : index
    %155 = vector.load %arg11[%c0_55, %c0_56] : memref<1x512xf32, #tpu.memory_space<vmem>>, vector<1x512xf32>
    %156 = vector.broadcast %155 : vector<1x512xf32> to vector<8x512xf32>
    %157 = arith.addf %154, %156 : vector<8x512xf32>
    %c3 = arith.constant 3 : index
    %158 = memref.load %arg1[%c3] : memref<4xf32, #tpu.memory_space<smem>>
    %159 = arith.mulf %157, %157 : vector<8x512xf32>
    %160 = tpu.concatenate %157, %159 in 0 : vector<8x512xf32>, vector<8x512xf32> -> vector<16x512xf32>
    %cst_57 = arith.constant dense<0.000000e+00> : vector<16x128xf32>
    %161 = tpu.matmul %160, %15, %cst_57 {dimension_numbers = #tpu.dot_dimension_numbers<[1], [0], [0], [1], [0, 0, 1, 1], [], []>} : vector<16x512xf32>, vector<512x128xf32>, vector<16x128xf32> -> vector<16x128xf32>
    %162 = vector.extract_strided_slice %161 {offsets = [0, 0], sizes = [8, 128], strides = [1, 1]} : vector<16x128xf32> to vector<8x128xf32>
    %163 = vector.extract_strided_slice %161 {offsets = [8, 0], sizes = [8, 128], strides = [1, 1]} : vector<16x128xf32> to vector<8x128xf32>
    %164 = arith.mulf %162, %162 : vector<8x128xf32>
    %165 = arith.subf %163, %164 : vector<8x128xf32>
    %cst_58 = arith.constant 0.000000e+00 : f32
    %166 = vector.broadcast %cst_58 : f32 to vector<8x128xf32>
    %167 = arith.maximumf %165, %166 : vector<8x128xf32>
    %cst_59 = arith.constant 9.99999974E-6 : f32
    %168 = vector.broadcast %cst_59 : f32 to vector<8x128xf32>
    %169 = arith.addf %167, %168 : vector<8x128xf32>
    %170 = math.rsqrt %169 : vector<8x128xf32>
    %cst_60 = arith.constant 0.000000e+00 : f32
    %171 = vector.broadcast %cst_60 : f32 to vector<8x128xf32>
    %172 = arith.subf %171, %162 : vector<8x128xf32>
    %173 = arith.mulf %172, %170 : vector<8x128xf32>
    %174 = tpu.concatenate %170, %173 in 0 : vector<8x128xf32>, vector<8x128xf32> -> vector<16x128xf32>
    %cst_61 = arith.constant dense<0.000000e+00> : vector<16x512xf32>
    %175 = tpu.matmul %174, %23, %cst_61 {dimension_numbers = #tpu.dot_dimension_numbers<[1], [0], [0], [1], [0, 0, 1, 1], [], []>} : vector<16x128xf32>, vector<128x512xf32>, vector<16x512xf32> -> vector<16x512xf32>
    %176 = vector.extract_strided_slice %175 {offsets = [0, 0], sizes = [8, 512], strides = [1, 1]} : vector<16x512xf32> to vector<8x512xf32>
    %177 = arith.mulf %157, %176 : vector<8x512xf32>
    %178 = vector.extract_strided_slice %175 {offsets = [8, 0], sizes = [8, 512], strides = [1, 1]} : vector<16x512xf32> to vector<8x512xf32>
    %179 = arith.addf %177, %178 : vector<8x512xf32>
    %cst_62 = arith.constant 0.000000e+00 : f32
    %180 = vector.broadcast %cst_62 : f32 to vector<8x512xf32>
    %181 = arith.cmpf oge, %179, %180 : vector<8x512xf32>
    %182 = vector.broadcast %158 : f32 to vector<8x512xf32>
    %183 = arith.mulf %182, %179 : vector<8x512xf32>
    %184 = arith.select %181, %179, %183 : vector<8x512xi1>, vector<8x512xf32>
    %185 = arith.truncf %49 : vector<8x512xf32> to vector<8x512xbf16>
    %c0_63 = arith.constant 0 : index
    %c0_64 = arith.constant 0 : index
    %186 = vector.load %arg12[%c0_63, %c0_64] : memref<512x512xbf16, #tpu.memory_space<vmem>>, vector<512x512xbf16>
    %cst_65 = arith.constant dense<0.000000e+00> : vector<8x512xf32>
    %187 = tpu.matmul %185, %186, %cst_65 {dimension_numbers = #tpu.dot_dimension_numbers<[1], [0], [0], [1], [0, 0, 1, 1], [], []>} : vector<8x512xbf16>, vector<512x512xbf16>, vector<8x512xf32> -> vector<8x512xf32>
    %188 = arith.truncf %184 : vector<8x512xf32> to vector<8x512xbf16>
    %c0_66 = arith.constant 0 : index
    %c0_67 = arith.constant 0 : index
    %189 = vector.load %arg13[%c0_66, %c0_67] : memref<512x512xbf16, #tpu.memory_space<vmem>>, vector<512x512xbf16>
    %cst_68 = arith.constant dense<0.000000e+00> : vector<8x512xf32>
    %190 = tpu.matmul %188, %189, %cst_68 {dimension_numbers = #tpu.dot_dimension_numbers<[1], [0], [0], [1], [0, 0, 1, 1], [], []>} : vector<8x512xbf16>, vector<512x512xbf16>, vector<8x512xf32> -> vector<8x512xf32>
    %191 = arith.addf %187, %190 : vector<8x512xf32>
    %c0_69 = arith.constant 0 : index
    %c0_70 = arith.constant 0 : index
    %192 = vector.load %arg14[%c0_69, %c0_70] : memref<1x512xf32, #tpu.memory_space<vmem>>, vector<1x512xf32>
    %193 = vector.broadcast %192 : vector<1x512xf32> to vector<8x512xf32>
    %194 = arith.addf %191, %193 : vector<8x512xf32>
    %195 = arith.negf %194 : vector<8x512xf32>
    %196 = math.exp %195 : vector<8x512xf32>
    %cst_71 = arith.constant 1.000000e+00 : f32
    %197 = vector.broadcast %cst_71 : f32 to vector<8x512xf32>
    %198 = arith.addf %197, %196 : vector<8x512xf32>
    %199 = arith.divf %197, %198 : vector<8x512xf32>
    %c0_72 = arith.constant 0 : index
    %c0_73 = arith.constant 0 : index
    %200 = vector.load %arg15[%c0_72, %c0_73] : memref<8x512xf32, #tpu.memory_space<vmem>>, vector<8x512xf32>
    tpu.vector_store %arg15[%c0_72, %c0_73], %199 {strides = array<i32>} : memref<8x512xf32, #tpu.memory_space<vmem>>, vector<8x512xf32>,
    return
  }
  func.func @transform_0(%arg0: i32) -> i32 {
    %c0_i32 = arith.constant 0 : i32
    %c0_i32_0 = arith.constant 0 : i32
    return %c0_i32 : i32
  }
  func.func @transform_1(%arg0: i32) -> (i32, i32) {
    %c0_i32 = arith.constant 0 : i32
    %c0_i32_0 = arith.constant 0 : i32
    return %arg0, %c0_i32 : i32, i32
  }
  func.func @transform_2(%arg0: i32) -> (i32, i32) {
    %c0_i32 = arith.constant 0 : i32
    %c0_i32_0 = arith.constant 0 : i32
    %c0_i32_1 = arith.constant 0 : i32
    return %c0_i32, %c0_i32_0 : i32, i32
  }
  func.func @transform_3(%arg0: i32) -> (i32, i32) {
    %c0_i32 = arith.constant 0 : i32
    %c0_i32_0 = arith.constant 0 : i32
    %c0_i32_1 = arith.constant 0 : i32
    return %c0_i32, %c0_i32_0 : i32, i32
  }
  func.func @transform_4(%arg0: i32) -> (i32, i32) {
    %c0_i32 = arith.constant 0 : i32
    %c0_i32_0 = arith.constant 0 : i32
    %c0_i32_1 = arith.constant 0 : i32
    return %c0_i32, %c0_i32_0 : i32, i32
  }
  func.func @transform_5(%arg0: i32) -> (i32, i32) {
    %c0_i32 = arith.constant 0 : i32
    %c0_i32_0 = arith.constant 0 : i32
    %c0_i32_1 = arith.constant 0 : i32
    return %c0_i32, %c0_i32_0 : i32, i32
  }
  func.func @transform_6(%arg0: i32) -> (i32, i32) {
    %c0_i32 = arith.constant 0 : i32
    %c0_i32_0 = arith.constant 0 : i32
    %c0_i32_1 = arith.constant 0 : i32
    return %c0_i32, %c0_i32_0 : i32, i32
  }
  func.func @transform_7(%arg0: i32) -> (i32, i32) {
    %c0_i32 = arith.constant 0 : i32
    %c0_i32_0 = arith.constant 0 : i32
    %c0_i32_1 = arith.constant 0 : i32
    return %c0_i32, %c0_i32_0 : i32, i32
  }
  func.func @transform_8(%arg0: i32) -> (i32, i32) {
    %c0_i32 = arith.constant 0 : i32
    %c0_i32_0 = arith.constant 0 : i32
    %c0_i32_1 = arith.constant 0 : i32
    return %c0_i32, %c0_i32_0 : i32, i32
  }
  func.func @transform_9(%arg0: i32) -> (i32, i32) {
    %c0_i32 = arith.constant 0 : i32
    %c0_i32_0 = arith.constant 0 : i32
    %c0_i32_1 = arith.constant 0 : i32
    return %c0_i32, %c0_i32_0 : i32, i32
  }
  func.func @transform_10(%arg0: i32) -> (i32, i32) {
    %c0_i32 = arith.constant 0 : i32
    %c0_i32_0 = arith.constant 0 : i32
    %c0_i32_1 = arith.constant 0 : i32
    return %c0_i32, %c0_i32_0 : i32, i32
  }
  func.func @transform_11(%arg0: i32) -> (i32, i32) {
    %c0_i32 = arith.constant 0 : i32
    %c0_i32_0 = arith.constant 0 : i32
    %c0_i32_1 = arith.constant 0 : i32
    return %c0_i32, %c0_i32_0 : i32, i32
  }
  func.func @transform_12(%arg0: i32) -> (i32, i32) {
    %c0_i32 = arith.constant 0 : i32
    %c0_i32_0 = arith.constant 0 : i32
    %c0_i32_1 = arith.constant 0 : i32
    return %c0_i32, %c0_i32_0 : i32, i32
  }
  func.func @transform_13(%arg0: i32) -> (i32, i32) {
    %c0_i32 = arith.constant 0 : i32
    %c0_i32_0 = arith.constant 0 : i32
    %c0_i32_1 = arith.constant 0 : i32
    return %c0_i32, %c0_i32_0 : i32, i32
  }
  func.func @transform_14(%arg0: i32) -> (i32, i32) {
    %c0_i32 = arith.constant 0 : i32
    %c0_i32_0 = arith.constant 0 : i32
    return %arg0, %c0_i32 : i32, i32
  }
}

</mosaic_0001>

<bundles_post_ra>
// kernel: unet_double_forward.1
= control target key start
LH: loop header
LB: loop body
LE: loop exit
PB: predicated region body
PF: predicated region fallthrough
CT: control target
= control target key end

     0   :  { %19 = vsyncpa [#allocation4], 0  ;;  %s13255_s0 = inlined_call_operand.vmem [shape: f32[4], index: 0, kind: input, shape index: {}]   ;;  %s13256_s1 = inlined_call_operand.vmem [shape: f32[8,1024], index: 1, kind: input, shape index: {}]   ;;  %s13257_s2 = inlined_call_operand.hbm [shape: bf16[1024,512], index: 2, kind: input, shape index: {}]   ;;  %s13258_s3 = inlined_call_operand.vmem [shape: f32[1,512], index: 3, kind: input, shape index: {}]   ;;  %s13259_s4 = inlined_call_operand.hbm [shape: bf16[512,256], index: 4, kind: input, shape index: {}]   ;;  %s13260_s5 = inlined_call_operand.vmem [shape: f32[1,256], index: 5, kind: input, shape index: {}]   ;;  %s13261_s6 = inlined_call_operand.hbm [shape: bf16[256,512], index: 6, kind: input, shape index: {}]   ;;  %s13262_s7 = inlined_call_operand.vmem [shape: f32[1,512], index: 7, kind: input, shape index: {}]   ;;  %s13263_s8 = inlined_call_operand.hbm [shape: bf16[256,512], index: 8, kind: input, shape index: {}]   ;;  %s13264_s9 = inlined_call_operand.hbm [shape: bf16[512,512], index: 9, kind: input, shape index: {}]   ;;  %s13265_s10 = inlined_call_operand.vmem [shape: f32[1,512], index: 10, kind: input, shape index: {}]   ;;  %s13266_s11 = inlined_call_operand.hbm [shape: bf16[512,512], index: 11, kind: input, shape index: {}]   ;;  %s13267_s12 = inlined_call_operand.hbm [shape: bf16[512,512], index: 12, kind: input, shape index: {}]   ;;  %s13268_s13 = inlined_call_operand.vmem [shape: f32[1,512], index: 13, kind: input, shape index: {}]   ;;  %s13269_s14 = inlined_call_operand.vmem [shape: f32[8,512], index: 14, kind: output, shape index: {}]  }
   0x1   :  { %20 = vsyncpa [#allocation3], 0 }
   0x2   :  { %21 = vsyncpa [#allocation7], 0 }
   0x3   :  { %22 = vsyncpa [#allocation10], 0 }
   0x4   :  { %23 = vsyncpa [#allocation13], 0  ;;  %s11259_s29 = smov [#allocation6]  }
   0x5   :  { %s55_s30 = sshll.u32 %s11259_s29, 4  ;;  %s56_s30 = int_to_ptr.vmem [resolvable:$true] %s55_s30 }
   0x6   :  { %s11105_s15 = scalar_lea.vmem %s56_s30, 8192  ;;  %p11110_p1 = scmp.lt.s32.totalorder %s56_s30, %s56_s30 }
   0x7   :  { %p11106_p0 = scmp.ne.s32.totalorder %s56_s30, %s11105_s15  ;;  %p11111_p2 = scmp.lt.s32.totalorder %s11105_s15, %s11105_s15 }
   0x9   :  { %p11112_p3 = por %p11111_p2, %p11110_p1 }
   0xb   :  { %p11113_p4 = pnand %p11112_p3, %p11106_p0 }
   0xd   :  { %11116 = shalt.err (!%p11113_p4)
}
   0xe   :  { %s11260_s16 = smov 128   ;;  %s11261_s17 = smov 8  }
   0xf   :  { %61 = dma.hbm_to_vmem [thread:$0]  %s13259_s4, 8192, %s56_s30, [#allocation7], %s11260_s16, %s11260_s16, %s11261_s17  }
  0x10   :  { %s11262_s20 = smov [#allocation9]   ;;  %s11263_s22 = smov [#allocation12]  }
  0x11   :  { %s83_s21 = sshll.u32 %s11262_s20, 4  ;;  %s109_s23 = sshll.u32 %s11263_s22, 4  ;;  %s84_s21 = int_to_ptr.vmem [resolvable:$true] %s83_s21  ;;  %s110_s23 = int_to_ptr.vmem [resolvable:$true] %s109_s23 }
  0x12   :  { %s11125_s24 = scalar_lea.vmem %s84_s21, 8192  ;;  %p11130_p6 = scmp.lt.s32.totalorder %s84_s21, %s84_s21 }
  0x13   :  { %p11126_p5 = scmp.ne.s32.totalorder %s84_s21, %s11125_s24  ;;  %p11131_p7 = scmp.lt.s32.totalorder %s11125_s24, %s11125_s24 }
  0x15   :  { %p11132_p8 = por %p11131_p7, %p11130_p6 }
  0x17   :  { %p11133_p9 = pnand %p11132_p8, %p11126_p5 }
  0x19   :  { %11136 = shalt.err (!%p11133_p9)
}
  0x1a   :  { %s11264_s25 = smov 256   ;;  %s11265_s26 = smov 16  }
  0x1b   :  { %89 = dma.hbm_to_vmem [thread:$0]  %s13263_s8, 8192, %s84_s21, [#allocation10], %s11264_s25, %s11264_s25, %s11265_s26  }
  0x1c   :  { %s30_s30 = sshll.u32 %s13255_s0, 4  ;;  %s11145_s15 = scalar_lea.vmem %s110_s23, 16384  ;;  %s31_s30 = int_to_ptr.vmem [resolvable:$true] %s30_s30 }
  0x1d   :  { %p11146_p10 = scmp.ne.s32.totalorder %s110_s23, %s11145_s15  ;;  %p11150_p11 = scmp.lt.s32.totalorder %s110_s23, %s110_s23 }
  0x1e   :  { %p11151_p12 = scmp.lt.s32.totalorder %s11145_s15, %s11145_s15 }
  0x20   :  { %p11152_p13 = por %p11151_p12, %p11150_p11 }
  0x22   :  { %p11153_p0 = pnand %p11152_p13, %p11146_p10 }
  0x24   :  { %11156 = shalt.err (!%p11153_p0)
}
  0x25   :  { %115 = dma.hbm_to_vmem [thread:$0]  %s13266_s11, 16384, %s110_s23, [#allocation13], %s11264_s25, %s11264_s25, %s11265_s26  }
  0x26   :  { %s11157_s8 = scalar_lea.vmem %s31_s30, 16  ;;  %p11162_p2 = scmp.lt.s32.totalorder %s31_s30, %s31_s30 }
  0x27   :  { %p11158_p1 = scmp.ne.s32.totalorder %s31_s30, %s11157_s8  ;;  %p11163_p3 = scmp.lt.s32.totalorder %s11157_s8, %s11157_s8 }
  0x29   :  { %p11164_p4 = por %p11163_p3, %p11162_p2 }
  0x2b   :  { %p11165_p5 = pnand %p11164_p4, %p11158_p1 }
  0x2d   :  { %11168 = shalt.err (!%p11165_p5)
}
  0x2e   :  { %s11266_s0 = smov [#allocation2]   ;;  %s11267_s18 = smov [#allocation5]  }
  0x2f   :  { %33 = dma.vmem_to_smem %s31_s30, 16, %s11266_s0, [#allocation4]  }
  0x30   :  { %s41_s19 = sshll.u32 %s11267_s18, 4  ;;  %s11268_s20 = smov [#allocation8]   ;;  %s42_s19 = int_to_ptr.vmem [resolvable:$true] %s41_s19 }
  0x31   :  { %s69_s21 = sshll.u32 %s11268_s20, 4  ;;  %s11177_s22 = scalar_lea.vmem %s42_s19, 32768  ;;  %s70_s21 = int_to_ptr.vmem [resolvable:$true] %s69_s21 }
  0x32   :  { %p11178_p6 = scmp.ne.s32.totalorder %s42_s19, %s11177_s22  ;;  %p11182_p7 = scmp.lt.s32.totalorder %s42_s19, %s42_s19 }
  0x33   :  { %p11183_p8 = scmp.lt.s32.totalorder %s11177_s22, %s11177_s22 }
  0x35   :  { %p11184_p9 = por %p11183_p8, %p11182_p7 }
  0x37   :  { %p11185_p10 = pnand %p11184_p9, %p11178_p6 }
  0x39   :  { %11188 = shalt.err (!%p11185_p10)
}
  0x3a   :  { %47 = dma.hbm_to_vmem [thread:$0]  %s13257_s2, 32768, %s42_s19, [#allocation3], %s11264_s25, %s11264_s25, %s11265_s26  }
  0x3b   :  { %s11197_s24 = scalar_lea.vmem %s70_s21, 8192  ;;  %p11202_p12 = scmp.lt.s32.totalorder %s70_s21, %s70_s21 }
  0x3c   :  { %p11198_p11 = scmp.ne.s32.totalorder %s70_s21, %s11197_s24  ;;  %p11203_p13 = scmp.lt.s32.totalorder %s11197_s24, %s11197_s24 }
  0x3e   :  { %p11204_p0 = por %p11203_p13, %p11202_p12 }
  0x40   :  { %p11205_p1 = pnand %p11204_p0, %p11198_p11 }
  0x42   :  { %11208 = shalt.err (!%p11205_p1)
}
  0x43   :  { %75 = dma.hbm_to_vmem [thread:$0]  %s13261_s6, 8192, %s70_s21, [#allocation7], %s11264_s25, %s11264_s25, %s11265_s26  }
  0x44   :  { %s11269_s4 = smov [#allocation11]   ;;  %s11270_s30 = smov [#allocation14]  }
  0x45   :  { %s95_s29 = sshll.u32 %s11269_s4, 4  ;;  %s121_s15 = sshll.u32 %s11270_s30, 4  ;;  %s96_s29 = int_to_ptr.vmem [resolvable:$true] %s95_s29  ;;  %s122_s15 = int_to_ptr.vmem [resolvable:$true] %s121_s15 }
  0x46   :  { %s11217_s2 = scalar_lea.vmem %s96_s29, 16384  ;;  %p11222_p3 = scmp.lt.s32.totalorder %s96_s29, %s96_s29 }
  0x47   :  { %p11218_p2 = scmp.ne.s32.totalorder %s96_s29, %s11217_s2  ;;  %p11223_p4 = scmp.lt.s32.totalorder %s11217_s2, %s11217_s2 }
  0x49   :  { %p11224_p5 = por %p11223_p4, %p11222_p3 }
  0x4b   :  { %p11225_p6 = pnand %p11224_p5, %p11218_p2 }
  0x4d   :  { %11228 = shalt.err (!%p11225_p6)
}
  0x4e   :  { %101 = dma.hbm_to_vmem [thread:$0]  %s13264_s9, 16384, %s96_s29, [#allocation10], %s11264_s25, %s11264_s25, %s11265_s26  }
  0x4f   :  { %s11237_s6 = scalar_lea.vmem %s122_s15, 16384  ;;  %p11242_p8 = scmp.lt.s32.totalorder %s122_s15, %s122_s15 }
  0x50   :  { %p11238_p7 = scmp.ne.s32.totalorder %s122_s15, %s11237_s6  ;;  %p11243_p9 = scmp.lt.s32.totalorder %s11237_s6, %s11237_s6 }
  0x52   :  { %p11244_p10 = por %p11243_p9, %p11242_p8 }
  0x54   :  { %p11245_p11 = pnand %p11244_p10, %p11238_p7 }
  0x56   :  { %11248 = shalt.err (!%p11245_p11)
}
  0x57   :  { %127 = dma.hbm_to_vmem [thread:$0]  %s13267_s12, 16384, %s122_s15, [#allocation13], %s11264_s25, %s11264_s25, %s11265_s26  }
  0x58   :  { %11249 = dma.done.wait [#allocation4], 16  }
  0x59   :  { %11250 = vsyncadd [#allocation4], 4294967280 }
  0x5a   :  { %11251 = dma.done.wait [#allocation3], 32768  }
  0x5b   :  { %11252 = vsyncadd [#allocation3], 4294934528 }
  0x5c   :  { %11253 = dma.done.wait [#allocation7], 16384  }
  0x5d   :  { %11254 = vsyncadd [#allocation7], 4294950912 }
  0x5e   :  { %11255 = dma.done.wait [#allocation10], 24576  }
  0x5f   :  { %11256 = vsyncadd [#allocation10], 4294942720 }
  0x60   :  { %11257 = dma.done.wait [#allocation13], 32768  }
  0x61   :  { %11258 = vsyncadd [#allocation13], 4294934528 }
  0x62   :  { %154 = sfence }
  0x63   :  { %v9825_v0 = vld [vmem:[#allocation5 + $0xe4] ss:$16 sps:$4 sm:$0xff]   ;;  %v9829_v2 = vld [vmem:[#allocation5 + $0xe0] ss:$16 sps:$4 sm:$0xff]   ;;  %v156_v46 = vld [vmem:[%s13256_s1 + $0x8] sm:$0xff] }
  0x64   :  { %v9827_v1 = vld [vmem:[#allocation5 + $0x2e4] ss:$16 sps:$4 sm:$0xff]   ;;  %1729 = vmatprep.subr.bf16.mxu0 %v9825_v0  ;;  %v9830_v3 = vld [vmem:[#allocation5 + $0x2e0] ss:$16 sps:$4 sm:$0xff]   ;;  %v11395_v49 = vpack.c.bf16 %v156_v46, %v156_v46  ;;  %v158_v50 = vld [vmem:[%s13256_s1 + $0x18] sm:$0xff] }
  0x65   :  { %1770 = vmatprep.subr.bf16.mxu1 %v9827_v1  ;;  %v9831_v4 = vld [vmem:[#allocation5 + $0xc4] ss:$16 sps:$4 sm:$0xff]   ;;  %1730 = vmatpush1.bf16.msra.mxu0 %v9829_v2  ;;  %v9835_v6 = vld [vmem:[#allocation5 + $0xc0] ss:$16 sps:$4 sm:$0xff]   ;;  %v11400_v52 = vpack.c.bf16 %v158_v50, %v158_v50 }
  0x66   :  { %1771 = vmatpush1.bf16.msra.mxu1 %v9830_v3  ;;  %v9833_v5 = vld [vmem:[#allocation5 + $0x2c4] ss:$16 sps:$4 sm:$0xff]   ;;  %1731 = vmatprep.subr.bf16.mxu0 %v9831_v4  ;;  %v9836_v7 = vld [vmem:[#allocation5 + $0x2c0] ss:$16 sps:$4 sm:$0xff]  }
  0x67   :  { %1772 = vmatprep.subr.bf16.mxu1 %v9833_v5  ;;  %v9837_v8 = vld [vmem:[#allocation5 + $0xa4] ss:$16 sps:$4 sm:$0xff]   ;;  %v9841_v10 = vld [vmem:[#allocation5 + $0xa0] ss:$16 sps:$4 sm:$0xff]   ;;  %1761 = vmatprep.mubr.bf16.mxu0 %v11395_v49 }
  0x68   :  { %v9839_v9 = vld [vmem:[#allocation5 + $0x2a4] ss:$16 sps:$4 sm:$0xff]   ;;  %v9842_v11 = vld [vmem:[#allocation5 + $0x2a0] ss:$16 sps:$4 sm:$0xff]   ;;  %1802 = vmatprep.mubr.bf16.mxu1 %v11400_v52 }
  0x69   :  { %1732 = vmatpush1.bf16.msra.mxu0 %v9835_v6  ;;  %v9843_v12 = vld [vmem:[#allocation5 + $0x84] ss:$16 sps:$4 sm:$0xff]   ;;  %v9847_v14 = vld [vmem:[#allocation5 + $0x80] ss:$16 sps:$4 sm:$0xff]  }
  0x6a   :  { %1773 = vmatpush1.bf16.msra.mxu1 %v9836_v7  ;;  %1733 = vmatprep.subr.bf16.mxu0 %v9837_v8  ;;  %v9845_v13 = vld [vmem:[#allocation5 + $0x284] ss:$16 sps:$4 sm:$0xff]   ;;  %v9848_v15 = vld [vmem:[#allocation5 + $0x280] ss:$16 sps:$4 sm:$0xff]  }
  0x6b   :  { %1774 = vmatprep.subr.bf16.mxu1 %v9839_v9  ;;  %v9849_v16 = vld [vmem:[#allocation5 + $0x64] ss:$16 sps:$4 sm:$0xff]   ;;  %v9853_v18 = vld [vmem:[#allocation5 + $0x60] ss:$16 sps:$4 sm:$0xff]  }
  0x6c   :  { %v9851_v17 = vld [vmem:[#allocation5 + $0x264] ss:$16 sps:$4 sm:$0xff]   ;;  %v9854_v19 = vld [vmem:[#allocation5 + $0x260] ss:$16 sps:$4 sm:$0xff]  }
  0x6d   :  { %1734 = vmatpush1.bf16.msra.mxu0 %v9841_v10  ;;  %v9855_v20 = vld [vmem:[#allocation5 + $0x44] ss:$16 sps:$4 sm:$0xff]   ;;  %v9859_v22 = vld [vmem:[#allocation5 + $0x40] ss:$16 sps:$4 sm:$0xff]  }
  0x6e   :  { %1775 = vmatpush1.bf16.msra.mxu1 %v9842_v11  ;;  %1735 = vmatprep.subr.bf16.mxu0 %v9843_v12  ;;  %v9857_v21 = vld [vmem:[#allocation5 + $0x244] ss:$16 sps:$4 sm:$0xff]   ;;  %v9860_v23 = vld [vmem:[#allocation5 + $0x240] ss:$16 sps:$4 sm:$0xff]  }
  0x6f   :  { %1776 = vmatprep.subr.bf16.mxu1 %v9845_v13  ;;  %v9861_v24 = vld [vmem:[#allocation5 + $0x24] ss:$16 sps:$4 sm:$0xff]   ;;  %v9865_v26 = vld [vmem:[#allocation5 + $0x20] ss:$16 sps:$4 sm:$0xff]  }
  0x70   :  { %v9863_v25 = vld [vmem:[#allocation5 + $0x224] ss:$16 sps:$4 sm:$0xff]   ;;  %v9866_v27 = vld [vmem:[#allocation5 + $0x220] ss:$16 sps:$4 sm:$0xff]  }
  0x71   :  { %1736 = vmatpush1.bf16.msra.mxu0 %v9847_v14  ;;  %v9867_v28 = vld [vmem:[#allocation5 + $0x4] ss:$16 sps:$4 sm:$0xff]   ;;  %v9871_v30 = vld [vmem:[#allocation5] ss:$16 sps:$4 sm:$0xff]  }
  0x72   :  { %1777 = vmatpush1.bf16.msra.mxu1 %v9848_v15  ;;  %1737 = vmatprep.subr.bf16.mxu0 %v9849_v16  ;;  %v9869_v29 = vld [vmem:[#allocation5 + $0x204] ss:$16 sps:$4 sm:$0xff]   ;;  %v9872_v31 = vld [vmem:[#allocation5 + $0x200] ss:$16 sps:$4 sm:$0xff]  }
  0x73   :  { %1778 = vmatprep.subr.bf16.mxu1 %v9851_v17  ;;  %v9873_v32 = vld [vmem:[#allocation5 + $0x1e4] ss:$16 sps:$4 sm:$0xff]   ;;  %v9877_v34 = vld [vmem:[#allocation5 + $0x1e0] ss:$16 sps:$4 sm:$0xff]  }
  0x74   :  { %v9875_v33 = vld [vmem:[#allocation5 + $0x3e4] ss:$16 sps:$4 sm:$0xff]   ;;  %v9878_v35 = vld [vmem:[#allocation5 + $0x3e0] ss:$16 sps:$4 sm:$0xff]  }
  0x75   :  { %1738 = vmatpush1.bf16.msra.mxu0 %v9853_v18  ;;  %v9879_v36 = vld [vmem:[#allocation5 + $0x1c4] ss:$16 sps:$4 sm:$0xff]   ;;  %v9883_v38 = vld [vmem:[#allocation5 + $0x1c0] ss:$16 sps:$4 sm:$0xff]  }
  0x76   :  { %1779 = vmatpush1.bf16.msra.mxu1 %v9854_v19  ;;  %1739 = vmatprep.subr.bf16.mxu0 %v9855_v20  ;;  %v9881_v37 = vld [vmem:[#allocation5 + $0x3c4] ss:$16 sps:$4 sm:$0xff]   ;;  %v9884_v39 = vld [vmem:[#allocation5 + $0x3c0] ss:$16 sps:$4 sm:$0xff]  }
  0x77   :  { %1780 = vmatprep.subr.bf16.mxu1 %v9857_v21  ;;  %v9885_v40 = vld [vmem:[#allocation5 + $0x1a4] ss:$16 sps:$4 sm:$0xff]   ;;  %v9889_v42 = vld [vmem:[#allocation5 + $0x1a0] ss:$16 sps:$4 sm:$0xff]  }
  0x78   :  { %v9887_v41 = vld [vmem:[#allocation5 + $0x3a4] ss:$16 sps:$4 sm:$0xff]   ;;  %v9890_v43 = vld [vmem:[#allocation5 + $0x3a0] ss:$16 sps:$4 sm:$0xff]  }
  0x79   :  { %1740 = vmatpush1.bf16.msra.mxu0 %v9859_v22  ;;  %v9891_v44 = vld [vmem:[#allocation5 + $0x184] ss:$16 sps:$4 sm:$0xff]   ;;  %v9895_v47 = vld [vmem:[#allocation5 + $0x180] ss:$16 sps:$4 sm:$0xff]  }
  0x7a   :  { %1781 = vmatpush1.bf16.msra.mxu1 %v9860_v23  ;;  %1741 = vmatprep.subr.bf16.mxu0 %v9861_v24  ;;  %v9893_v45 = vld [vmem:[#allocation5 + $0x384] ss:$16 sps:$4 sm:$0xff]   ;;  %v9896_v48 = vld [vmem:[#allocation5 + $0x380] ss:$16 sps:$4 sm:$0xff]  }
  0x7b   :  { %1782 = vmatprep.subr.bf16.mxu1 %v9863_v25  ;;  %v9897_v51 = vld [vmem:[#allocation5 + $0x164] ss:$16 sps:$4 sm:$0xff]   ;;  %v9901_v54 = vld [vmem:[#allocation5 + $0x160] ss:$16 sps:$4 sm:$0xff]  }
  0x7c   :  { %v9899_v53 = vld [vmem:[#allocation5 + $0x364] ss:$16 sps:$4 sm:$0xff]   ;;  %v9902_v55 = vld [vmem:[#allocation5 + $0x360] ss:$16 sps:$4 sm:$0xff]  }
  0x7d   :  { %1742 = vmatpush1.bf16.msra.mxu0 %v9865_v26  ;;  %v9903_v56 = vld [vmem:[#allocation5 + $0x144] ss:$16 sps:$4 sm:$0xff]   ;;  %v9907_v58 = vld [vmem:[#allocation5 + $0x140] ss:$16 sps:$4 sm:$0xff]  }
  0x7e   :  { %1783 = vmatpush1.bf16.msra.mxu1 %v9866_v27  ;;  %1743 = vmatprep.subr.bf16.mxu0 %v9867_v28  ;;  %v9905_v57 = vld [vmem:[#allocation5 + $0x344] ss:$16 sps:$4 sm:$0xff]   ;;  %v9908_v59 = vld [vmem:[#allocation5 + $0x340] ss:$16 sps:$4 sm:$0xff]  }
  0x7f   :  { %1784 = vmatprep.subr.bf16.mxu1 %v9869_v29  ;;  %v9909_v60 = vld [vmem:[#allocation5 + $0x124] ss:$16 sps:$4 sm:$0xff]   ;;  %v9913_v62 = vld [vmem:[#allocation5 + $0x120] ss:$16 sps:$4 sm:$0xff]  }
  0x80   :  { %v9911_v61 = vld [vmem:[#allocation5 + $0x324] ss:$16 sps:$4 sm:$0xff]   ;;  %v9914_v63 = vld [vmem:[#allocation5 + $0x320] ss:$16 sps:$4 sm:$0xff]  }
  0x81   :  { %1744 = vmatpush1.bf16.msra.mxu0 %v9871_v30  ;;  %v9915_v0 = vld [vmem:[#allocation5 + $0x104] ss:$16 sps:$4 sm:$0xff]   ;;  %v9919_v2 = vld [vmem:[#allocation5 + $0x100] ss:$16 sps:$4 sm:$0xff]  }
  0x82   :  { %1785 = vmatpush1.bf16.msra.mxu1 %v9872_v31  ;;  %1745 = vmatprep.subr.bf16.mxu0 %v9873_v32  ;;  %v9917_v1 = vld [vmem:[#allocation5 + $0x304] ss:$16 sps:$4 sm:$0xff]   ;;  %v9920_v3 = vld [vmem:[#allocation5 + $0x300] ss:$16 sps:$4 sm:$0xff]  }
  0x83   :  { %1786 = vmatprep.subr.bf16.mxu1 %v9875_v33  ;;  %v155_v4 = vld [vmem:[%s13256_s1] sm:$0xff]  ;;  %v157_v5 = vld [vmem:[%s13256_s1 + $0x10] sm:$0xff] }
  0x84   :  { %v9923_v6 = vld [vmem:[#allocation5 + $0x4e4] ss:$16 sps:$4 sm:$0xff]   ;;  %v11410_v8 = vpack.c.bf16 %v155_v4, %v155_v4  ;;  %v11412_v9 = vpack.c.bf16 %v157_v5, %v157_v5  ;;  %v9921_v10 = vld [vmem:[#allocation5 + $0x4e0] ss:$16 sps:$4 sm:$0xff]  }
  0x85   :  { %1746 = vmatpush2.bf16.msra.mxu0 %v9877_v34  ;;  %v9926_v7 = vld [vmem:[#allocation5 + $0x6e4] ss:$16 sps:$4 sm:$0xff]   ;;  %v9924_v11 = vld [vmem:[#allocation5 + $0x6e0] ss:$16 sps:$4 sm:$0xff]   ;;  %v160_v34 = vld [vmem:[%s13256_s1 + $0x28] sm:$0xff] }
  0x86   :  { %1787 = vmatpush2.bf16.msra.mxu1 %v9878_v35  ;;  %1747 = vmatprep.subr.bf16.mxu0 %v9879_v36  ;;  %v9929_v12 = vld [vmem:[#allocation5 + $0x4c4] ss:$16 sps:$4 sm:$0xff]   ;;  %v9927_v14 = vld [vmem:[#allocation5 + $0x4c0] ss:$16 sps:$4 sm:$0xff]  }
  0x87   :  { %1788 = vmatprep.subr.bf16.mxu1 %v9881_v37  ;;  %v9932_v13 = vld [vmem:[#allocation5 + $0x6c4] ss:$16 sps:$4 sm:$0xff]   ;;  %v9930_v15 = vld [vmem:[#allocation5 + $0x6c0] ss:$16 sps:$4 sm:$0xff]   ;;  %v11419_v37 = vpack.c.bf16 %v160_v34, %v160_v34  ;;  %v10035_v34 = vld [vmem:[#allocation5 + $0x88] ss:$16 sps:$4 sm:$0xff]  }
  0x88   :  { %v9935_v16 = vld [vmem:[#allocation5 + $0x4a4] ss:$16 sps:$4 sm:$0xff]   ;;  %v9933_v18 = vld [vmem:[#allocation5 + $0x4a0] ss:$16 sps:$4 sm:$0xff]  }
  0x89   :  { %1748 = vmatpush2.bf16.msra.mxu0 %v9883_v38  ;;  %v9938_v17 = vld [vmem:[#allocation5 + $0x6a4] ss:$16 sps:$4 sm:$0xff]   ;;  %v9936_v19 = vld [vmem:[#allocation5 + $0x6a0] ss:$16 sps:$4 sm:$0xff]   ;;  %v162_v38 = vld [vmem:[%s13256_s1 + $0x38] sm:$0xff] }
  0x8a   :  { %1789 = vmatpush2.bf16.msra.mxu1 %v9884_v39  ;;  %1749 = vmatprep.subr.bf16.mxu0 %v9885_v40  ;;  %v9941_v20 = vld [vmem:[#allocation5 + $0x484] ss:$16 sps:$4 sm:$0xff]   ;;  %v9939_v22 = vld [vmem:[#allocation5 + $0x480] ss:$16 sps:$4 sm:$0xff]   ;;  %v11424_v40 = vpack.c.bf16 %v162_v38, %v162_v38  ;;  %v10046_v38 = vld [vmem:[#allocation5 + $0x26c] ss:$16 sps:$4 sm:$0xff]  }
  0x8b   :  { %1790 = vmatprep.subr.bf16.mxu1 %v9887_v41  ;;  %v9944_v21 = vld [vmem:[#allocation5 + $0x684] ss:$16 sps:$4 sm:$0xff]   ;;  %v9942_v23 = vld [vmem:[#allocation5 + $0x680] ss:$16 sps:$4 sm:$0xff]  }
  0x8c   :  { %v9947_v24 = vld [vmem:[#allocation5 + $0x464] ss:$16 sps:$4 sm:$0xff]   ;;  %v9945_v26 = vld [vmem:[#allocation5 + $0x460] ss:$16 sps:$4 sm:$0xff]  }
  0x8d   :  { %1750 = vmatpush2.bf16.msra.mxu0 %v9889_v42  ;;  %v9950_v25 = vld [vmem:[#allocation5 + $0x664] ss:$16 sps:$4 sm:$0xff]   ;;  %v9948_v27 = vld [vmem:[#allocation5 + $0x660] ss:$16 sps:$4 sm:$0xff]  }
  0x8e   :  { %1791 = vmatpush2.bf16.msra.mxu1 %v9890_v43  ;;  %1751 = vmatprep.subr.bf16.mxu0 %v9891_v44  ;;  %v9953_v28 = vld [vmem:[#allocation5 + $0x444] ss:$16 sps:$4 sm:$0xff]   ;;  %v9951_v30 = vld [vmem:[#allocation5 + $0x440] ss:$16 sps:$4 sm:$0xff]  }
  0x8f   :  { %1792 = vmatprep.subr.bf16.mxu1 %v9893_v45  ;;  %v9956_v29 = vld [vmem:[#allocation5 + $0x644] ss:$16 sps:$4 sm:$0xff]   ;;  %v9954_v31 = vld [vmem:[#allocation5 + $0x640] ss:$16 sps:$4 sm:$0xff]  }
  0x90   :  { %v9959_v32 = vld [vmem:[#allocation5 + $0x424] ss:$16 sps:$4 sm:$0xff]   ;;  %v9957_v35 = vld [vmem:[#allocation5 + $0x420] ss:$16 sps:$4 sm:$0xff]  }
  0x91   :  { %1752 = vmatpush2.bf16.msra.mxu0 %v9895_v47  ;;  %v9962_v33 = vld [vmem:[#allocation5 + $0x624] ss:$16 sps:$4 sm:$0xff]   ;;  %v9960_v36 = vld [vmem:[#allocation5 + $0x620] ss:$16 sps:$4 sm:$0xff]  }
  0x92   :  { %1793 = vmatpush2.bf16.msra.mxu1 %v9896_v48  ;;  %1753 = vmatprep.subr.bf16.mxu0 %v9897_v51  ;;  %v9965_v39 = vld [vmem:[#allocation5 + $0x404] ss:$16 sps:$4 sm:$0xff]   ;;  %v9963_v42 = vld [vmem:[#allocation5 + $0x400] ss:$16 sps:$4 sm:$0xff]  }
  0x93   :  { %1794 = vmatprep.subr.bf16.mxu1 %v9899_v53  ;;  %v9968_v41 = vld [vmem:[#allocation5 + $0x604] ss:$16 sps:$4 sm:$0xff]   ;;  %v9966_v43 = vld [vmem:[#allocation5 + $0x600] ss:$16 sps:$4 sm:$0xff]  }
  0x94   :  { %v9971_v44 = vld [vmem:[#allocation5 + $0x5e4] ss:$16 sps:$4 sm:$0xff]   ;;  %v9969_v46 = vld [vmem:[#allocation5 + $0x5e0] ss:$16 sps:$4 sm:$0xff]  }
  0x95   :  { %1754 = vmatpush2.bf16.msra.mxu0 %v9901_v54  ;;  %v9974_v45 = vld [vmem:[#allocation5 + $0x7e4] ss:$16 sps:$4 sm:$0xff]   ;;  %v9972_v47 = vld [vmem:[#allocation5 + $0x7e0] ss:$16 sps:$4 sm:$0xff]  }
  0x96   :  { %1795 = vmatpush2.bf16.msra.mxu1 %v9902_v55  ;;  %1755 = vmatprep.subr.bf16.mxu0 %v9903_v56  ;;  %v9977_v48 = vld [vmem:[#allocation5 + $0x5c4] ss:$16 sps:$4 sm:$0xff]   ;;  %v9975_v51 = vld [vmem:[#allocation5 + $0x5c0] ss:$16 sps:$4 sm:$0xff]  }
  0x97   :  { %1796 = vmatprep.subr.bf16.mxu1 %v9905_v57  ;;  %v9980_v50 = vld [vmem:[#allocation5 + $0x7c4] ss:$16 sps:$4 sm:$0xff]   ;;  %v9978_v53 = vld [vmem:[#allocation5 + $0x7c0] ss:$16 sps:$4 sm:$0xff]  }
  0x98   :  { %v9983_v54 = vld [vmem:[#allocation5 + $0x5a4] ss:$16 sps:$4 sm:$0xff]   ;;  %v9981_v56 = vld [vmem:[#allocation5 + $0x5a0] ss:$16 sps:$4 sm:$0xff]  }
  0x99   :  { %1756 = vmatpush2.bf16.msra.mxu0 %v9907_v58  ;;  %v9986_v55 = vld [vmem:[#allocation5 + $0x7a4] ss:$16 sps:$4 sm:$0xff]   ;;  %v9984_v57 = vld [vmem:[#allocation5 + $0x7a0] ss:$16 sps:$4 sm:$0xff]  }
  0x9a   :  { %1797 = vmatpush2.bf16.msra.mxu1 %v9908_v59  ;;  %1757 = vmatprep.subr.bf16.mxu0 %v9909_v60  ;;  %v9989_v58 = vld [vmem:[#allocation5 + $0x584] ss:$16 sps:$4 sm:$0xff]   ;;  %v9987_v60 = vld [vmem:[#allocation5 + $0x580] ss:$16 sps:$4 sm:$0xff]  }
  0x9b   :  { %1798 = vmatprep.subr.bf16.mxu1 %v9911_v61  ;;  %v9992_v59 = vld [vmem:[#allocation5 + $0x784] ss:$16 sps:$4 sm:$0xff]   ;;  %v9990_v61 = vld [vmem:[#allocation5 + $0x780] ss:$16 sps:$4 sm:$0xff]  }
  0x9c   :  { %v9999_v4 = vld [vmem:[#allocation5 + $0x540] ss:$16 sps:$4 sm:$0xff]  }
  0x9d   :  { %1758 = vmatpush2.bf16.msra.mxu0 %v9913_v62  ;;  %v9995_v62 = vld [vmem:[#allocation5 + $0x564] ss:$16 sps:$4 sm:$0xff]   ;;  %v10002_v5 = vld [vmem:[#allocation5 + $0x740] ss:$16 sps:$4 sm:$0xff]  }
  0x9e   :  { %1799 = vmatpush2.bf16.msra.mxu1 %v9914_v63  ;;  %1759 = vmatprep.subr.bf16.mxu0 %v9915_v0  ;;  %v9998_v63 = vld [vmem:[#allocation5 + $0x764] ss:$16 sps:$4 sm:$0xff]   ;;  %v9993_v0 = vld [vmem:[#allocation5 + $0x560] ss:$16 sps:$4 sm:$0xff]  }
  0x9f   :  { %1800 = vmatprep.subr.bf16.mxu1 %v9917_v1  ;;  %v9996_v1 = vld [vmem:[#allocation5 + $0x760] ss:$16 sps:$4 sm:$0xff]  }
  0xa1   :  { %1760 = vmatpush2.bf16.msra.mxu0 %v9919_v2  ;;  %v10001_v2 = vld [vmem:[#allocation5 + $0x544] ss:$16 sps:$4 sm:$0xff]  }
  0xa2   :  { %1801 = vmatpush2.bf16.msra.mxu1 %v9920_v3  ;;  %1811 = vmatprep.subr.bf16.mxu0 %v9923_v6  ;;  %v10004_v3 = vld [vmem:[#allocation5 + $0x744] ss:$16 sps:$4 sm:$0xff]  }
  0xa3   :  { %1852 = vmatprep.subr.bf16.mxu1 %v9926_v7  ;;  %v10007_v6 = vld [vmem:[#allocation5 + $0x524] ss:$16 sps:$4 sm:$0xff]  }
  0xa4   :  { %1762 = vmatmul.mubr.bf16.vlgmr.msra.gmra.mxu0 %v11410_v8  ;;  %v10010_v7 = vld [vmem:[#allocation5 + $0x724] ss:$16 sps:$4 sm:$0xff]  }
  0xa5   :  { %1803 = vmatmul.mubr.bf16.vlgmr.msra.gmra.mxu1 %v11412_v9  ;;  %1812 = vmatpush1.bf16.msra.mxu0 %v9921_v10  ;;  %v10005_v10 = vld [vmem:[#allocation5 + $0x520] ss:$16 sps:$4 sm:$0xff]  }
  0xa6   :  { %1853 = vmatpush1.bf16.msra.mxu1 %v9924_v11  ;;  %1813 = vmatprep.subr.bf16.mxu0 %v9929_v12  ;;  %v10008_v11 = vld [vmem:[#allocation5 + $0x720] ss:$16 sps:$4 sm:$0xff]   ;;  %v10013_v12 = vld [vmem:[#allocation5 + $0x504] ss:$16 sps:$4 sm:$0xff]  }
  0xa7   :  { %1854 = vmatprep.subr.bf16.mxu1 %v9932_v13  ;;  %1843 = vmatprep.mubr.bf16.mxu0 %v11419_v37  ;;  %v10016_v13 = vld [vmem:[#allocation5 + $0x704] ss:$16 sps:$4 sm:$0xff]  }
  0xa8   :  { %1884 = vmatprep.mubr.bf16.mxu1 %v11424_v40 }
  0xa9   :  { %1814 = vmatpush1.bf16.msra.mxu0 %v9927_v14  ;;  %v10011_v14 = vld [vmem:[#allocation5 + $0x500] ss:$16 sps:$4 sm:$0xff]  }
  0xaa   :  { %1855 = vmatpush1.bf16.msra.mxu1 %v9930_v15  ;;  %1815 = vmatprep.subr.bf16.mxu0 %v9935_v16  ;;  %v10014_v15 = vld [vmem:[#allocation5 + $0x700] ss:$16 sps:$4 sm:$0xff]  }
  0xab   :  { %1856 = vmatprep.subr.bf16.mxu1 %v9938_v17  ;;  %v159_v16 = vld [vmem:[%s13256_s1 + $0x20] sm:$0xff]  ;;  %v161_v17 = vld [vmem:[%s13256_s1 + $0x30] sm:$0xff] }
  0xad   :  { %1816 = vmatpush1.bf16.msra.mxu0 %v9933_v18  ;;  %v10019_v18 = vld [vmem:[#allocation5 + $0xec] ss:$16 sps:$4 sm:$0xff]  }
  0xae   :  { %1857 = vmatpush1.bf16.msra.mxu1 %v9936_v19  ;;  %1817 = vmatprep.subr.bf16.mxu0 %v9941_v20  ;;  %v10022_v19 = vld [vmem:[#allocation5 + $0x2ec] ss:$16 sps:$4 sm:$0xff]   ;;  %v11434_v20 = vpack.c.bf16 %v159_v16, %v159_v16 }
  0xaf   :  { %1858 = vmatprep.subr.bf16.mxu1 %v9944_v21  ;;  %v11436_v21 = vpack.c.bf16 %v161_v17, %v161_v17  ;;  %v10103_v16 = vld [vmem:[#allocation5 + $0x12c] ss:$16 sps:$4 sm:$0xff]  }
  0xb0   :  { %v10106_v17 = vld [vmem:[#allocation5 + $0x32c] ss:$16 sps:$4 sm:$0xff]  }
  0xb1   :  { %1818 = vmatpush1.bf16.msra.mxu0 %v9939_v22  ;;  %v10017_v22 = vld [vmem:[#allocation5 + $0xe8] ss:$16 sps:$4 sm:$0xff]  }
  0xb2   :  { %1859 = vmatpush1.bf16.msra.mxu1 %v9942_v23  ;;  %1819 = vmatprep.subr.bf16.mxu0 %v9947_v24  ;;  %v10020_v23 = vld [vmem:[#allocation5 + $0x2e8] ss:$16 sps:$4 sm:$0xff]   ;;  %v10025_v24 = vld [vmem:[#allocation5 + $0xcc] ss:$16 sps:$4 sm:$0xff]  }
  0xb3   :  { %1860 = vmatprep.subr.bf16.mxu1 %v9950_v25  ;;  %v10028_v25 = vld [vmem:[#allocation5 + $0x2cc] ss:$16 sps:$4 sm:$0xff]  }
  0xb5   :  { %1820 = vmatpush1.bf16.msra.mxu0 %v9945_v26  ;;  %v10023_v26 = vld [vmem:[#allocation5 + $0xc8] ss:$16 sps:$4 sm:$0xff]  }
  0xb6   :  { %1861 = vmatpush1.bf16.msra.mxu1 %v9948_v27  ;;  %1821 = vmatprep.subr.bf16.mxu0 %v9953_v28  ;;  %v10026_v27 = vld [vmem:[#allocation5 + $0x2c8] ss:$16 sps:$4 sm:$0xff]   ;;  %v10031_v28 = vld [vmem:[#allocation5 + $0xac] ss:$16 sps:$4 sm:$0xff]  }
  0xb7   :  { %1862 = vmatprep.subr.bf16.mxu1 %v9956_v29  ;;  %v10034_v29 = vld [vmem:[#allocation5 + $0x2ac] ss:$16 sps:$4 sm:$0xff]  }
  0xb9   :  { %1822 = vmatpush1.bf16.msra.mxu0 %v9951_v30  ;;  %v10029_v30 = vld [vmem:[#allocation5 + $0xa8] ss:$16 sps:$4 sm:$0xff]  }
  0xba   :  { %1863 = vmatpush1.bf16.msra.mxu1 %v9954_v31  ;;  %1823 = vmatprep.subr.bf16.mxu0 %v9959_v32  ;;  %v10032_v31 = vld [vmem:[#allocation5 + $0x2a8] ss:$16 sps:$4 sm:$0xff]   ;;  %v10037_v32 = vld [vmem:[#allocation5 + $0x8c] ss:$16 sps:$4 sm:$0xff]  }
  0xbb   :  { %1864 = vmatprep.subr.bf16.mxu1 %v9962_v33  ;;  %v10040_v33 = vld [vmem:[#allocation5 + $0x28c] ss:$16 sps:$4 sm:$0xff]  }
  0xbd   :  { %1824 = vmatpush1.bf16.msra.mxu0 %v9957_v35  ;;  %v10038_v35 = vld [vmem:[#allocation5 + $0x288] ss:$16 sps:$4 sm:$0xff]  }
  0xbe   :  { %1865 = vmatpush1.bf16.msra.mxu1 %v9960_v36  ;;  %1825 = vmatprep.subr.bf16.mxu0 %v9965_v39  ;;  %v10043_v36 = vld [vmem:[#allocation5 + $0x6c] ss:$16 sps:$4 sm:$0xff]   ;;  %v10041_v39 = vld [vmem:[#allocation5 + $0x68] ss:$16 sps:$4 sm:$0xff]  }
  0xbf   :  { %1866 = vmatprep.subr.bf16.mxu1 %v9968_v41  ;;  %v10052_v41 = vld [vmem:[#allocation5 + $0x24c] ss:$16 sps:$4 sm:$0xff]  }
  0xc1   :  { %1826 = vmatpush1.bf16.msra.mxu0 %v9963_v42  ;;  %v10047_v42 = vld [vmem:[#allocation5 + $0x48] ss:$16 sps:$4 sm:$0xff]  }
  0xc2   :  { %1867 = vmatpush1.bf16.msra.mxu1 %v9966_v43  ;;  %1827 = vmatprep.subr.bf16.mxu0 %v9971_v44  ;;  %v10050_v43 = vld [vmem:[#allocation5 + $0x248] ss:$16 sps:$4 sm:$0xff]   ;;  %v10055_v44 = vld [vmem:[#allocation5 + $0x2c] ss:$16 sps:$4 sm:$0xff]  }
  0xc3   :  { %1868 = vmatprep.subr.bf16.mxu1 %v9974_v45  ;;  %v10058_v45 = vld [vmem:[#allocation5 + $0x22c] ss:$16 sps:$4 sm:$0xff]  }
  0xc5   :  { %1828 = vmatpush2.bf16.msra.mxu0 %v9969_v46  ;;  %v10053_v46 = vld [vmem:[#allocation5 + $0x28] ss:$16 sps:$4 sm:$0xff]  }
  0xc6   :  { %1869 = vmatpush2.bf16.msra.mxu1 %v9972_v47  ;;  %1829 = vmatprep.subr.bf16.mxu0 %v9977_v48  ;;  %v10056_v47 = vld [vmem:[#allocation5 + $0x228] ss:$16 sps:$4 sm:$0xff]   ;;  %v10061_v48 = vld [vmem:[#allocation5 + $0xc] ss:$16 sps:$4 sm:$0xff]  }
  0xc7   :  { %1870 = vmatprep.subr.bf16.mxu1 %v9980_v50  ;;  %v10064_v50 = vld [vmem:[#allocation5 + $0x20c] ss:$16 sps:$4 sm:$0xff]  }
  0xc9   :  { %1830 = vmatpush2.bf16.msra.mxu0 %v9975_v51  ;;  %v10059_v51 = vld [vmem:[#allocation5 + $0x8] ss:$16 sps:$4 sm:$0xff]  }
  0xca   :  { %1871 = vmatpush2.bf16.msra.mxu1 %v9978_v53  ;;  %1831 = vmatprep.subr.bf16.mxu0 %v9983_v54  ;;  %v10062_v53 = vld [vmem:[#allocation5 + $0x208] ss:$16 sps:$4 sm:$0xff]   ;;  %v10067_v54 = vld [vmem:[#allocation5 + $0x1ec] ss:$16 sps:$4 sm:$0xff]  }
  0xcb   :  { %1872 = vmatprep.subr.bf16.mxu1 %v9986_v55  ;;  %v10070_v55 = vld [vmem:[#allocation5 + $0x3ec] ss:$16 sps:$4 sm:$0xff]  }
  0xcd   :  { %1832 = vmatpush2.bf16.msra.mxu0 %v9981_v56  ;;  %v10065_v56 = vld [vmem:[#allocation5 + $0x1e8] ss:$16 sps:$4 sm:$0xff]  }
  0xce   :  { %1873 = vmatpush2.bf16.msra.mxu1 %v9984_v57  ;;  %1833 = vmatprep.subr.bf16.mxu0 %v9989_v58  ;;  %v10068_v57 = vld [vmem:[#allocation5 + $0x3e8] ss:$16 sps:$4 sm:$0xff]   ;;  %v10073_v58 = vld [vmem:[#allocation5 + $0x1cc] ss:$16 sps:$4 sm:$0xff]  }
  0xcf   :  { %1874 = vmatprep.subr.bf16.mxu1 %v9992_v59  ;;  %v10076_v59 = vld [vmem:[#allocation5 + $0x3cc] ss:$16 sps:$4 sm:$0xff]  }
  0xd1   :  { %1834 = vmatpush2.bf16.msra.mxu0 %v9987_v60  ;;  %v10071_v60 = vld [vmem:[#allocation5 + $0x1c8] ss:$16 sps:$4 sm:$0xff]  }
  0xd2   :  { %1875 = vmatpush2.bf16.msra.mxu1 %v9990_v61  ;;  %1835 = vmatprep.subr.bf16.mxu0 %v9995_v62  ;;  %v10074_v61 = vld [vmem:[#allocation5 + $0x3c8] ss:$16 sps:$4 sm:$0xff]   ;;  %v10079_v62 = vld [vmem:[#allocation5 + $0x1ac] ss:$16 sps:$4 sm:$0xff]  }
  0xd3   :  { %1876 = vmatprep.subr.bf16.mxu1 %v9998_v63  ;;  %v10082_v63 = vld [vmem:[#allocation5 + $0x3ac] ss:$16 sps:$4 sm:$0xff]  }
  0xd5   :  { %1836 = vmatpush2.bf16.msra.mxu0 %v9993_v0  ;;  %v10077_v0 = vld [vmem:[#allocation5 + $0x1a8] ss:$16 sps:$4 sm:$0xff]  }
  0xd6   :  { %1877 = vmatpush2.bf16.msra.mxu1 %v9996_v1  ;;  %1837 = vmatprep.subr.bf16.mxu0 %v10001_v2  ;;  %v10080_v1 = vld [vmem:[#allocation5 + $0x3a8] ss:$16 sps:$4 sm:$0xff]   ;;  %v10085_v2 = vld [vmem:[#allocation5 + $0x18c] ss:$16 sps:$4 sm:$0xff]  }
  0xd7   :  { %1878 = vmatprep.subr.bf16.mxu1 %v10004_v3  ;;  %v10088_v3 = vld [vmem:[#allocation5 + $0x38c] ss:$16 sps:$4 sm:$0xff]  }
  0xd9   :  { %1838 = vmatpush2.bf16.msra.mxu0 %v9999_v4  ;;  %v10083_v4 = vld [vmem:[#allocation5 + $0x188] ss:$16 sps:$4 sm:$0xff]  }
  0xda   :  { %1879 = vmatpush2.bf16.msra.mxu1 %v10002_v5  ;;  %1839 = vmatprep.subr.bf16.mxu0 %v10007_v6  ;;  %v10086_v5 = vld [vmem:[#allocation5 + $0x388] ss:$16 sps:$4 sm:$0xff]   ;;  %v10091_v6 = vld [vmem:[#allocation5 + $0x16c] ss:$16 sps:$4 sm:$0xff]  }
  0xdb   :  { %1880 = vmatprep.subr.bf16.mxu1 %v10010_v7  ;;  %v10094_v7 = vld [vmem:[#allocation5 + $0x36c] ss:$16 sps:$4 sm:$0xff]  }
  0xdd   :  { %1840 = vmatpush2.bf16.msra.mxu0 %v10005_v10  ;;  %v10089_v10 = vld [vmem:[#allocation5 + $0x168] ss:$16 sps:$4 sm:$0xff]  }
  0xde   :  { %1881 = vmatpush2.bf16.msra.mxu1 %v10008_v11  ;;  %1841 = vmatprep.subr.bf16.mxu0 %v10013_v12  ;;  %v10092_v11 = vld [vmem:[#allocation5 + $0x368] ss:$16 sps:$4 sm:$0xff]   ;;  %v10097_v12 = vld [vmem:[#allocation5 + $0x14c] ss:$16 sps:$4 sm:$0xff]  }
  0xdf   :  { %1882 = vmatprep.subr.bf16.mxu1 %v10016_v13  ;;  %v10100_v13 = vld [vmem:[#allocation5 + $0x34c] ss:$16 sps:$4 sm:$0xff]  }
  0xe1   :  { %1842 = vmatpush2.bf16.msra.mxu0 %v10011_v14  ;;  %v10095_v14 = vld [vmem:[#allocation5 + $0x148] ss:$16 sps:$4 sm:$0xff]  }
  0xe2   :  { %1883 = vmatpush2.bf16.msra.mxu1 %v10014_v15  ;;  %1893 = vmatprep.subr.bf16.mxu0 %v10019_v18  ;;  %v10098_v15 = vld [vmem:[#allocation5 + $0x348] ss:$16 sps:$4 sm:$0xff]  }
  0xe3   :  { %1934 = vmatprep.subr.bf16.mxu1 %v10022_v19  ;;  %v10101_v18 = vld [vmem:[#allocation5 + $0x128] ss:$16 sps:$4 sm:$0xff]  }
  0xe4   :  { %1844 = vmatmul.mubr.bf16.vlgmr.msra.gmra.mxu0 %v11434_v20  ;;  %v10104_v19 = vld [vmem:[#allocation5 + $0x328] ss:$16 sps:$4 sm:$0xff]  }
  0xe5   :  { %1885 = vmatmul.mubr.bf16.vlgmr.msra.gmra.mxu1 %v11436_v21  ;;  %1894 = vmatpush1.bf16.msra.mxu0 %v10017_v22  ;;  %v10109_v22 = vld [vmem:[#allocation5 + $0x10c] ss:$16 sps:$4 sm:$0xff]  }
  0xe6   :  { %1935 = vmatpush1.bf16.msra.mxu1 %v10020_v23  ;;  %1895 = vmatprep.subr.bf16.mxu0 %v10025_v24  ;;  %v10112_v23 = vld [vmem:[#allocation5 + $0x30c] ss:$16 sps:$4 sm:$0xff]   ;;  %v10107_v24 = vld [vmem:[#allocation5 + $0x108] ss:$16 sps:$4 sm:$0xff]  }
  0xe7   :  { %1936 = vmatprep.subr.bf16.mxu1 %v10028_v25  ;;  %1925 = vmatprep.mubr.bf16.mxu0 %v11395_v49  ;;  %v10044_v49 = vld [vmem:[#allocation5 + $0x268] ss:$16 sps:$4 sm:$0xff]  }
  0xe8   :  { %1966 = vmatprep.mubr.bf16.mxu1 %v11400_v52  ;;  %v10049_v52 = vld [vmem:[#allocation5 + $0x4c] ss:$16 sps:$4 sm:$0xff]   ;;  %v10110_v25 = vld [vmem:[#allocation5 + $0x308] ss:$16 sps:$4 sm:$0xff]  }
  0xe9   :  { %1896 = vmatpush1.bf16.msra.mxu0 %v10023_v26  ;;  %v10115_v26 = vld [vmem:[#allocation5 + $0x4ec] ss:$16 sps:$4 sm:$0xff]  }
  0xea   :  { %1937 = vmatpush1.bf16.msra.mxu1 %v10026_v27  ;;  %1897 = vmatprep.subr.bf16.mxu0 %v10031_v28  ;;  %v10118_v27 = vld [vmem:[#allocation5 + $0x6ec] ss:$16 sps:$4 sm:$0xff]   ;;  %v10113_v28 = vld [vmem:[#allocation5 + $0x4e8] ss:$16 sps:$4 sm:$0xff]  }
  0xeb   :  { %1938 = vmatprep.subr.bf16.mxu1 %v10034_v29  ;;  %v10116_v29 = vld [vmem:[#allocation5 + $0x6e8] ss:$16 sps:$4 sm:$0xff]  }
  0xed   :  { %1898 = vmatpush1.bf16.msra.mxu0 %v10029_v30  ;;  %v10121_v30 = vld [vmem:[#allocation5 + $0x4cc] ss:$16 sps:$4 sm:$0xff]  }
  0xee   :  { %1939 = vmatpush1.bf16.msra.mxu1 %v10032_v31  ;;  %1899 = vmatprep.subr.bf16.mxu0 %v10037_v32  ;;  %v10124_v31 = vld [vmem:[#allocation5 + $0x6cc] ss:$16 sps:$4 sm:$0xff]   ;;  %v10119_v32 = vld [vmem:[#allocation5 + $0x4c8] ss:$16 sps:$4 sm:$0xff]  }
  0xef   :  { %1940 = vmatprep.subr.bf16.mxu1 %v10040_v33  ;;  %v10122_v33 = vld [vmem:[#allocation5 + $0x6c8] ss:$16 sps:$4 sm:$0xff]  }
  0xf1   :  { %1900 = vmatpush1.bf16.msra.mxu0 %v10035_v34  ;;  %v10127_v34 = vld [vmem:[#allocation5 + $0x4ac] ss:$16 sps:$4 sm:$0xff]  }
  0xf2   :  { %1941 = vmatpush1.bf16.msra.mxu1 %v10038_v35  ;;  %1901 = vmatprep.subr.bf16.mxu0 %v10043_v36  ;;  %v10130_v35 = vld [vmem:[#allocation5 + $0x6ac] ss:$16 sps:$4 sm:$0xff]   ;;  %v10125_v36 = vld [vmem:[#allocation5 + $0x4a8] ss:$16 sps:$4 sm:$0xff]  }
  0xf3   :  { %1942 = vmatprep.subr.bf16.mxu1 %v10046_v38  ;;  %v10128_v38 = vld [vmem:[#allocation5 + $0x6a8] ss:$16 sps:$4 sm:$0xff]  }
  0xf5   :  { %1902 = vmatpush1.bf16.msra.mxu0 %v10041_v39  ;;  %v10133_v39 = vld [vmem:[#allocation5 + $0x48c] ss:$16 sps:$4 sm:$0xff]  }
  0xf6   :  { %1943 = vmatpush1.bf16.msra.mxu1 %v10044_v49  ;;  %1903 = vmatprep.subr.bf16.mxu0 %v10049_v52  ;;  %v10136_v49 = vld [vmem:[#allocation5 + $0x68c] ss:$16 sps:$4 sm:$0xff]  }
  0xf7   :  { %1944 = vmatprep.subr.bf16.mxu1 %v10052_v41  ;;  %v10139_v52 = vld [vmem:[#allocation5 + $0x46c] ss:$16 sps:$4 sm:$0xff]  }
  0xf8   :  { %v10142_v41 = vld [vmem:[#allocation5 + $0x66c] ss:$16 sps:$4 sm:$0xff]  }
  0xf9   :  { %1904 = vmatpush1.bf16.msra.mxu0 %v10047_v42  ;;  %v10137_v42 = vld [vmem:[#allocation5 + $0x468] ss:$16 sps:$4 sm:$0xff]  }
  0xfa   :  { %1945 = vmatpush1.bf16.msra.mxu1 %v10050_v43  ;;  %1905 = vmatprep.subr.bf16.mxu0 %v10055_v44  ;;  %v10140_v43 = vld [vmem:[#allocation5 + $0x668] ss:$16 sps:$4 sm:$0xff]   ;;  %v10145_v44 = vld [vmem:[#allocation5 + $0x44c] ss:$16 sps:$4 sm:$0xff]  }
  0xfb   :  { %1946 = vmatprep.subr.bf16.mxu1 %v10058_v45  ;;  %v10146_v45 = vld [vmem:[#allocation5 + $0x648] ss:$16 sps:$4 sm:$0xff]  }
  0xfd   :  { %1906 = vmatpush1.bf16.msra.mxu0 %v10053_v46  ;;  %v10151_v46 = vld [vmem:[#allocation5 + $0x42c] ss:$16 sps:$4 sm:$0xff]  }
  0xfe   :  { %1947 = vmatpush1.bf16.msra.mxu1 %v10056_v47  ;;  %1907 = vmatprep.subr.bf16.mxu0 %v10061_v48  ;;  %v10154_v47 = vld [vmem:[#allocation5 + $0x62c] ss:$16 sps:$4 sm:$0xff]   ;;  %v10149_v48 = vld [vmem:[#allocation5 + $0x428] ss:$16 sps:$4 sm:$0xff]  }
  0xff   :  { %1948 = vmatprep.subr.bf16.mxu1 %v10064_v50  ;;  %v10152_v50 = vld [vmem:[#allocation5 + $0x628] ss:$16 sps:$4 sm:$0xff]  }
 0x101   :  { %1908 = vmatpush1.bf16.msra.mxu0 %v10059_v51  ;;  %v10157_v51 = vld [vmem:[#allocation5 + $0x40c] ss:$16 sps:$4 sm:$0xff]  }
 0x102   :  { %1949 = vmatpush1.bf16.msra.mxu1 %v10062_v53  ;;  %1909 = vmatprep.subr.bf16.mxu0 %v10067_v54  ;;  %v10160_v53 = vld [vmem:[#allocation5 + $0x60c] ss:$16 sps:$4 sm:$0xff]   ;;  %v10155_v54 = vld [vmem:[#allocation5 + $0x408] ss:$16 sps:$4 sm:$0xff]  }
 0x103   :  { %1950 = vmatprep.subr.bf16.mxu1 %v10070_v55  ;;  %v10158_v55 = vld [vmem:[#allocation5 + $0x608] ss:$16 sps:$4 sm:$0xff]  }
 0x105   :  { %1910 = vmatpush2.bf16.msra.mxu0 %v10065_v56  ;;  %v10163_v56 = vld [vmem:[#allocation5 + $0x5ec] ss:$16 sps:$4 sm:$0xff]  }
 0x106   :  { %1951 = vmatpush2.bf16.msra.mxu1 %v10068_v57  ;;  %1911 = vmatprep.subr.bf16.mxu0 %v10073_v58  ;;  %v10166_v57 = vld [vmem:[#allocation5 + $0x7ec] ss:$16 sps:$4 sm:$0xff]   ;;  %v10161_v58 = vld [vmem:[#allocation5 + $0x5e8] ss:$16 sps:$4 sm:$0xff]  }
 0x107   :  { %1952 = vmatprep.subr.bf16.mxu1 %v10076_v59  ;;  %v10164_v59 = vld [vmem:[#allocation5 + $0x7e8] ss:$16 sps:$4 sm:$0xff]  }
 0x109   :  { %1912 = vmatpush2.bf16.msra.mxu0 %v10071_v60  ;;  %v10169_v60 = vld [vmem:[#allocation5 + $0x5cc] ss:$16 sps:$4 sm:$0xff]  }
 0x10a   :  { %1953 = vmatpush2.bf16.msra.mxu1 %v10074_v61  ;;  %1913 = vmatprep.subr.bf16.mxu0 %v10079_v62  ;;  %v10172_v61 = vld [vmem:[#allocation5 + $0x7cc] ss:$16 sps:$4 sm:$0xff]   ;;  %v10167_v62 = vld [vmem:[#allocation5 + $0x5c8] ss:$16 sps:$4 sm:$0xff]  }
 0x10b   :  { %1954 = vmatprep.subr.bf16.mxu1 %v10082_v63  ;;  %v10170_v63 = vld [vmem:[#allocation5 + $0x7c8] ss:$16 sps:$4 sm:$0xff]  }
 0x10d   :  { %1914 = vmatpush2.bf16.msra.mxu0 %v10077_v0  ;;  %v10175_v0 = vld [vmem:[#allocation5 + $0x5ac] ss:$16 sps:$4 sm:$0xff]  }
 0x10e   :  { %1955 = vmatpush2.bf16.msra.mxu1 %v10080_v1  ;;  %1915 = vmatprep.subr.bf16.mxu0 %v10085_v2  ;;  %v10178_v1 = vld [vmem:[#allocation5 + $0x7ac] ss:$16 sps:$4 sm:$0xff]   ;;  %v10173_v2 = vld [vmem:[#allocation5 + $0x5a8] ss:$16 sps:$4 sm:$0xff]  }
 0x10f   :  { %1956 = vmatprep.subr.bf16.mxu1 %v10088_v3  ;;  %v10176_v3 = vld [vmem:[#allocation5 + $0x7a8] ss:$16 sps:$4 sm:$0xff]  }
 0x111   :  { %1916 = vmatpush2.bf16.msra.mxu0 %v10083_v4  ;;  %v10181_v4 = vld [vmem:[#allocation5 + $0x58c] ss:$16 sps:$4 sm:$0xff]  }
 0x112   :  { %1957 = vmatpush2.bf16.msra.mxu1 %v10086_v5  ;;  %1917 = vmatprep.subr.bf16.mxu0 %v10091_v6  ;;  %v10184_v5 = vld [vmem:[#allocation5 + $0x78c] ss:$16 sps:$4 sm:$0xff]   ;;  %v10179_v6 = vld [vmem:[#allocation5 + $0x588] ss:$16 sps:$4 sm:$0xff]  }
 0x113   :  { %1958 = vmatprep.subr.bf16.mxu1 %v10094_v7  ;;  %v10182_v7 = vld [vmem:[#allocation5 + $0x788] ss:$16 sps:$4 sm:$0xff]  }
 0x115   :  { %1918 = vmatpush2.bf16.msra.mxu0 %v10089_v10  ;;  %v10187_v10 = vld [vmem:[#allocation5 + $0x56c] ss:$16 sps:$4 sm:$0xff]  }
 0x116   :  { %1959 = vmatpush2.bf16.msra.mxu1 %v10092_v11  ;;  %1919 = vmatprep.subr.bf16.mxu0 %v10097_v12  ;;  %v10190_v11 = vld [vmem:[#allocation5 + $0x76c] ss:$16 sps:$4 sm:$0xff]   ;;  %v10185_v12 = vld [vmem:[#allocation5 + $0x568] ss:$16 sps:$4 sm:$0xff]  }
 0x117   :  { %1960 = vmatprep.subr.bf16.mxu1 %v10100_v13  ;;  %v10188_v13 = vld [vmem:[#allocation5 + $0x768] ss:$16 sps:$4 sm:$0xff]  }
 0x119   :  { %1920 = vmatpush2.bf16.msra.mxu0 %v10095_v14  ;;  %v429_v14 = vlaneseq }
 0x11a   :  { %1961 = vmatpush2.bf16.msra.mxu1 %v10098_v15  ;;  %1921 = vmatprep.subr.bf16.mxu0 %v10103_v16  ;;  %v10193_v15 = vld [vmem:[#allocation5 + $0x54c] ss:$16 sps:$4 sm:$0xff]  }
 0x11b   :  { %1962 = vmatprep.subr.bf16.mxu1 %v10106_v17  ;;  %v10196_v16 = vld [vmem:[#allocation5 + $0x74c] ss:$16 sps:$4 sm:$0xff]   ;;  %v10191_v17 = vld [vmem:[#allocation5 + $0x548] ss:$16 sps:$4 sm:$0xff]  }
 0x11d   :  { %1922 = vmatpush2.bf16.msra.mxu0 %v10101_v18  ;;  %v10194_v18 = vld [vmem:[#allocation5 + $0x748] ss:$16 sps:$4 sm:$0xff]  }
 0x11e   :  { %1963 = vmatpush2.bf16.msra.mxu1 %v10104_v19  ;;  %1923 = vmatprep.subr.bf16.mxu0 %v10109_v22  ;;  %v11446_v19 = vshrl.u32 %v429_v14, 7  ;;  %v10199_v22 = vld [vmem:[#allocation5 + $0x52c] ss:$16 sps:$4 sm:$0xff]  }
 0x11f   :  { %1964 = vmatprep.subr.bf16.mxu1 %v10112_v23  ;;  %v10202_v23 = vld [vmem:[#allocation5 + $0x72c] ss:$16 sps:$4 sm:$0xff]  }
 0x121   :  { %1924 = vmatpush2.bf16.msra.mxu0 %v10107_v24  ;;  %v11449_v24 = vadd.s32 248, %v11446_v19 }
 0x122   :  { %1965 = vmatpush2.bf16.msra.mxu1 %v10110_v25  ;;  %1975 = vmatprep.subr.bf16.mxu0 %v10115_v26  ;;  %v11452_v25 = vadd.s32 120, %v11446_v19  ;;  %v11455_v26 = vadd.s32 240, %v11446_v19 }
 0x123   :  { %2016 = vmatprep.subr.bf16.mxu1 %v10118_v27  ;;  %v11458_v27 = vadd.s32 112, %v11446_v19 }
 0x124   :  { %1926 = vmatmul.mubr.bf16.vlgmr.msra.gmra.mxu0 %v11410_v8  ;;  %v10131_v8 = vld [vmem:[#allocation5 + $0x488] ss:$16 sps:$4 sm:$0xff]  }
 0x125   :  { %1967 = vmatmul.mubr.bf16.vlgmr.msra.gmra.mxu1 %v11412_v9  ;;  %1976 = vmatpush1.bf16.msra.mxu0 %v10113_v28  ;;  %v10134_v9 = vld [vmem:[#allocation5 + $0x688] ss:$16 sps:$4 sm:$0xff]  }
 0x126   :  { %2017 = vmatpush1.bf16.msra.mxu1 %v10116_v29  ;;  %1977 = vmatprep.subr.bf16.mxu0 %v10121_v30  ;;  %v10197_v28 = vld [vmem:[#allocation5 + $0x528] ss:$16 sps:$4 sm:$0xff]   ;;  %v11461_v30 = vadd.s32 232, %v11446_v19 }
 0x127   :  { %2018 = vmatprep.subr.bf16.mxu1 %v10124_v31  ;;  %2007 = vmatprep.mubr.bf16.mxu0 %v11419_v37  ;;  %v10148_v37 = vld [vmem:[#allocation5 + $0x64c] ss:$16 sps:$4 sm:$0xff]   ;;  %v10200_v29 = vld [vmem:[#allocation5 + $0x728] ss:$16 sps:$4 sm:$0xff]  }
 0x128   :  { %2048 = vmatprep.mubr.bf16.mxu1 %v11424_v40  ;;  %v10143_v40 = vld [vmem:[#allocation5 + $0x448] ss:$16 sps:$4 sm:$0xff]   ;;  %v10205_v31 = vld [vmem:[#allocation5 + $0x50c] ss:$16 sps:$4 sm:$0xff]  }
 0x129   :  { %1978 = vmatpush1.bf16.msra.mxu0 %v10119_v32  ;;  %v10208_v32 = vld [vmem:[#allocation5 + $0x70c] ss:$16 sps:$4 sm:$0xff]  }
 0x12a   :  { %2019 = vmatpush1.bf16.msra.mxu1 %v10122_v33  ;;  %1979 = vmatprep.subr.bf16.mxu0 %v10127_v34  ;;  %v11463_v33 = vand.u32 127, %v429_v14  ;;  %v2154_v34 = vand.u32 7, %v11449_v24 }
 0x12b   :  { %2020 = vmatprep.subr.bf16.mxu1 %v10130_v35  ;;  %v2138_v35 = vand.u32 7, %v11452_v25 }
 0x12c   :  { %vm11492_vm0 = vcmp.eq.s32.totalorder %v2154_v34, %v11463_v33  ;;  %v13486_v34 = vmov 0 }
 0x12d   :  { %1980 = vmatpush1.bf16.msra.mxu0 %v10125_v36  ;;  %v11468_v36 = vadd.s32 104, %v11446_v19  ;;  %vm11504_vm1 = vcmp.eq.s32.totalorder %v2138_v35, %v11463_v33 }
 0x12e   :  { %2021 = vmatpush1.bf16.msra.mxu1 %v10128_v38  ;;  %1981 = vmatprep.subr.bf16.mxu0 %v10133_v39  ;;  %v2153_v38 = vand.u32 7, %v11455_v26  ;;  %v2137_v39 = vand.u32 7, %v11458_v27 }
 0x12f   :  { %2022 = vmatprep.subr.bf16.mxu1 %v10136_v49  ;;  %v11473_v49 = vadd.s32 224, %v11446_v19 }
 0x130   :  { %vm11516_vm2 = vcmp.eq.s32.totalorder %v2153_v38, %v11463_v33  ;;  %vm11521_vm3 = vcmp.eq.s32.totalorder %v2137_v39, %v11463_v33  ;;  %v13489_v38 = vmov 0 }
 0x131   :  { %1982 = vmatpush1.bf16.msra.mxu0 %v10131_v8  ;;  %v10203_v8 = vld [vmem:[#allocation5 + $0x508] ss:$16 sps:$4 sm:$0xff]  }
 0x132   :  { %2023 = vmatpush1.bf16.msra.mxu1 %v10134_v9  ;;  %1983 = vmatprep.subr.bf16.mxu0 %v10139_v52  ;;  %v10206_v9 = vld [vmem:[#allocation5 + $0x708] ss:$16 sps:$4 sm:$0xff]   ;;  %v2152_v52 = vand.u32 7, %v11461_v30 }
 0x133   :  { %2024 = vmatprep.subr.bf16.mxu1 %v10142_v41  ;;  %v11477_v41 = vadd.s32 96, %v11446_v19 }
 0x134   :  { %vm11528_vm4 = vcmp.eq.s32.totalorder %v2152_v52, %v11463_v33 }
 0x135   :  { %1984 = vmatpush1.bf16.msra.mxu0 %v10137_v42  ;;  %v11480_v42 = vadd.s32 216, %v11446_v19 }
 0x136   :  { %2025 = vmatpush1.bf16.msra.mxu1 %v10140_v43  ;;  %1985 = vmatprep.subr.bf16.mxu0 %v10145_v44  ;;  %v11483_v43 = vadd.s32 88, %v11446_v19  ;;  %v11486_v44 = vadd.s32 208, %v11446_v19 }
 0x137   :  { %2026 = vmatprep.subr.bf16.mxu1 %v10148_v37  ;;  %v11489_v37 = vadd.s32 80, %v11446_v19 }
 0x139   :  { %1986 = vmatpush1.bf16.msra.mxu0 %v10143_v40  ;;  %v13446_v40 = vmov 0 }
 0x13a   :  { %2027 = vmatpush1.bf16.msra.mxu1 %v10146_v45  ;;  %1987 = vmatprep.subr.bf16.mxu0 %v10151_v46  ;;  %v13447_v40 = vsel %vm11492_vm0, 4294967295, %v13446_v40  ;;  %v2136_v45 = vand.u32 7, %v11468_v36  ;;  %v11498_v46 = vadd.s32 200, %v11446_v19 }
 0x13b   :  { %2028 = vmatprep.subr.bf16.mxu1 %v10154_v47  ;;  %13448 = vst [vmem:[#allocation20_spill] sm:$0xff] %v13447_v40  ;;  %v11501_v47 = vadd.s32 72, %v11446_v19 }
 0x13c   :  { %vm11536_vm5 = vcmp.eq.s32.totalorder %v2136_v45, %v11463_v33 }
 0x13d   :  { %1988 = vmatpush1.bf16.msra.mxu0 %v10149_v48  ;;  %v13449_v48 = vmov 0 }
 0x13e   :  { %2029 = vmatpush1.bf16.msra.mxu1 %v10152_v50  ;;  %1989 = vmatprep.subr.bf16.mxu0 %v10157_v51  ;;  %v13450_v48 = vsel %vm11504_vm1, 4294967295, %v13449_v48  ;;  %v2151_v50 = vand.u32 7, %v11473_v49  ;;  %v11510_v51 = vadd.s32 192, %v11446_v19 }
 0x13f   :  { %2030 = vmatprep.subr.bf16.mxu1 %v10160_v53  ;;  %13451 = vst [vmem:[#allocation21_spill] sm:$0xff] %v13450_v48  ;;  %v11513_v53 = vadd.s32 64, %v11446_v19 }
 0x140   :  { %vm11549_vm6 = vcmp.eq.s32.totalorder %v2151_v50, %v11463_v33  ;;  %v13492_v50 = vmov 0 }
 0x141   :  { %1990 = vmatpush1.bf16.msra.mxu0 %v10155_v54  ;;  %v13452_v54 = vmov 0 }
 0x142   :  { %2031 = vmatpush1.bf16.msra.mxu1 %v10158_v55  ;;  %1991 = vmatprep.subr.bf16.mxu0 %v10163_v56  ;;  %v13453_v54 = vsel %vm11516_vm2, 4294967295, %v13452_v54  ;;  %v13455_v55 = vmov 0  ;;  %v2135_v56 = vand.u32 7, %v11477_v41 }
 0x143   :  { %2032 = vmatprep.subr.bf16.mxu1 %v10166_v57  ;;  %13454 = vst [vmem:[#allocation22_spill] sm:$0xff] %v13453_v54  ;;  %v13456_v55 = vsel %vm11521_vm3, 4294967295, %v13455_v55  ;;  %v2150_v57 = vand.u32 7, %v11480_v42 }
 0x144   :  { %13457 = vst [vmem:[#allocation23_spill] sm:$0xff] %v13456_v55  ;;  %vm11559_vm7 = vcmp.eq.s32.totalorder %v2135_v56, %v11463_v33  ;;  %v11707_v55 = vadd.s32 352, %v11446_v19 }
 0x145   :  { %1992 = vmatpush2.bf16.msra.mxu0 %v10161_v58  ;;  %v13458_v58 = vmov 0  ;;  %vm11579_vm8 = vcmp.eq.s32.totalorder %v2150_v57, %v11463_v33 }
 0x146   :  { %2033 = vmatpush2.bf16.msra.mxu1 %v10164_v59  ;;  %1993 = vmatprep.subr.bf16.mxu0 %v10169_v60  ;;  %v13459_v58 = vsel %vm11528_vm4, 4294967295, %v13458_v58  ;;  %v2134_v59 = vand.u32 7, %v11483_v43  ;;  %v2149_v60 = vand.u32 7, %v11486_v44  ;;  %13510 = vst [vmem:[#allocation46_spill] sm:$0xff] %v11707_v55 }
 0x147   :  { %2034 = vmatprep.subr.bf16.mxu1 %v10172_v61  ;;  %13460 = vst [vmem:[#allocation24_spill] sm:$0xff] %v13459_v58  ;;  %v2133_v61 = vand.u32 7, %v11489_v37  ;;  %v11704_v58 = vadd.s32 480, %v11446_v19 }
 0x148   :  { %vm11596_vm9 = vcmp.eq.s32.totalorder %v2134_v59, %v11463_v33  ;;  %vm11601_vm10 = vcmp.eq.s32.totalorder %v2149_v60, %v11463_v33  ;;  %v13495_v60 = vmov 0 }
 0x149   :  { %1994 = vmatpush2.bf16.msra.mxu0 %v10167_v62  ;;  %v13461_v62 = vmov 0  ;;  %vm11617_vm11 = vcmp.eq.s32.totalorder %v2133_v61, %v11463_v33  ;;  %13509 = vst [vmem:[#allocation45_spill] sm:$0xff] %v11704_v58 }
 0x14a   :  { %2035 = vmatpush2.bf16.msra.mxu1 %v10170_v63  ;;  %1995 = vmatprep.subr.bf16.mxu0 %v10175_v0  ;;  %v13462_v62 = vsel %vm11536_vm5, 4294967295, %v13461_v62  ;;  %v2148_v63 = vand.u32 7, %v11498_v46  ;;  %v2132_v0 = vand.u32 7, %v11501_v47 }
 0x14b   :  { %2036 = vmatprep.subr.bf16.mxu1 %v10178_v1  ;;  %13463 = vst [vmem:[#allocation25_spill] sm:$0xff] %v13462_v62  ;;  %v11543_v1 = vadd.s32 184, %v11446_v19  ;;  %v11684_v62 = vadd.s32 496, %v11446_v19 }
 0x14c   :  { %vm11622_vm12 = vcmp.eq.s32.totalorder %v2148_v63, %v11463_v33  ;;  %vm11627_vm13 = vcmp.eq.s32.totalorder %v2132_v0, %v11463_v33  ;;  %v11664_v63 = vadd.s32 24, %v11446_v19  ;;  %v11667_v0 = vadd.s32 144, %v11446_v19 }
 0x14d   :  { %1996 = vmatpush2.bf16.msra.mxu0 %v10173_v2  ;;  %v13371_v2 = vmov 0.015625   ;;  %v13487_v34 = vsel %vm11627_vm13, 4294967295, %v13486_v34  ;;  %13502 = vst [vmem:[#allocation40_spill] sm:$0xff] %v11684_v62  ;;  %v2185_v48 = vand.u32 7, %v11684_v62 }
 0x14e   :  { %2037 = vmatpush2.bf16.msra.mxu1 %v10176_v3  ;;  %1997 = vmatprep.subr.bf16.mxu0 %v10181_v4  ;;  %v13464_v3 = vmov 0  ;;  %v2147_v4 = vand.u32 7, %v11510_v51  ;;  %13488 = vst [vmem:[#allocation34_spill] sm:$0xff] %v13487_v34  ;;  %v11826_v34 = vadd.s32 328, %v11446_v19 }
 0x14f   :  { %2038 = vmatprep.subr.bf16.mxu1 %v10184_v5  ;;  %v13465_v3 = vsel %vm11549_vm6, 4294967295, %v13464_v3  ;;  %v2131_v5 = vand.u32 7, %v11513_v53 }
 0x150   :  { %13466 = vst [vmem:[#allocation26_spill] sm:$0xff] %v13465_v3  ;;  %vm11636_vm14 = vcmp.eq.s32.totalorder %v2147_v4, %v11463_v33  ;;  %v11701_v3 = vadd.s32 360, %v11446_v19  ;;  %13552 = vst [vmem:[#allocation64_spill] sm:$0xff] %v11826_v34 }
 0x151   :  { %1998 = vmatpush2.bf16.msra.mxu0 %v10179_v6  ;;  %v11556_v6 = vadd.s32 56, %v11446_v19  ;;  %v13490_v38 = vsel %vm11636_vm14, 4294967295, %v13489_v38  ;;  %vm11647_vm15 = vcmp.eq.s32.totalorder %v2131_v5, %v11463_v33 }
 0x152   :  { %2039 = vmatpush2.bf16.msra.mxu1 %v10182_v7  ;;  %1999 = vmatprep.subr.bf16.mxu0 %v10187_v10  ;;  %v13467_v7 = vmov 0  ;;  %v11564_v10 = vadd.s32 176, %v11446_v19  ;;  %13491 = vst [vmem:[#allocation35_spill] sm:$0xff] %v13490_v38  ;;  %v13493_v50 = vsel %vm11647_vm15, 4294967295, %v13492_v50  ;;  %13508 = vst [vmem:[#allocation44_spill] sm:$0xff] %v11701_v3  ;;  %v2168_v62 = vand.u32 7, %v11701_v3 }
 0x153   :  { %2040 = vmatprep.subr.bf16.mxu1 %v10190_v11  ;;  %v13468_v7 = vsel %vm11559_vm7, 4294967295, %v13467_v7  ;;  %v11567_v11 = vadd.s32 48, %v11446_v19  ;;  %v2130_v35 = vand.u32 7, %v11556_v6  ;;  %13494 = vst [vmem:[#allocation36_spill] sm:$0xff] %v13493_v50  ;;  %v13526_v3 = vmov 0 }
 0x154   :  { %13469 = vst [vmem:[#allocation27_spill] sm:$0xff] %v13468_v7  ;;  %v2145_v39 = vand.u32 7, %v11564_v10  ;;  %v11848_v38 = vadd.s32 136, %v11446_v19  ;;  %v13561_v50 = vmov 0 }
 0x155   :  { %2000 = vmatpush2.bf16.msra.mxu0 %v10185_v12  ;;  %v11570_v12 = vadd.s32 168, %v11446_v19 }
 0x156   :  { %2041 = vmatpush2.bf16.msra.mxu1 %v10188_v13  ;;  %2001 = vmatprep.subr.bf16.mxu0 %v10193_v15  ;;  %v13470_v15 = vmov 0 }
 0x157   :  { %2042 = vmatprep.subr.bf16.mxu1 %v10196_v16  ;;  %v13471_v15 = vsel %vm11579_vm8, 4294967295, %v13470_v15  ;;  %v11584_v16 = vadd.s32 40, %v11446_v19 }
 0x158   :  { %13472 = vst [vmem:[#allocation28_spill] sm:$0xff] %v13471_v15  ;;  %v13514_v15 = vmov 0 }
 0x159   :  { %2002 = vmatpush2.bf16.msra.mxu0 %v10191_v17  ;;  %v11587_v17 = vadd.s32 160, %v11446_v19  ;;  %v2128_v56 = vand.u32 7, %v11584_v16 }
 0x15a   :  { %2043 = vmatpush2.bf16.msra.mxu1 %v10194_v18  ;;  %2003 = vmatprep.subr.bf16.mxu0 %v10199_v22  ;;  %v11590_v18 = vadd.s32 32, %v11446_v19  ;;  %v2146_v22 = vand.u32 7, %v11543_v1 }
 0x15b   :  { %2044 = vmatprep.subr.bf16.mxu1 %v10202_v23  ;;  %v11607_v23 = vadd.s32 152, %v11446_v19  ;;  %v2143_v57 = vand.u32 7, %v11587_v17 }
 0x15c   :  { %v2127_v59 = vand.u32 7, %v11590_v18 }
 0x15d   :  { %2004 = vmatpush2.bf16.msra.mxu0 %v10197_v28  ;;  %13479 = vst [vmem:[#allocation31_spill] sm:$0xff] %v11607_v23  ;;  %v2142_v61 = vand.u32 7, %v11607_v23  ;;  %v11731_v23 = vadd.s32 16, %v11446_v19 }
 0x15e   :  { %2045 = vmatpush2.bf16.msra.mxu1 %v10200_v29  ;;  %2005 = vmatprep.subr.bf16.mxu0 %v10205_v31  ;;  %v13480_v31 = vmov 0 }
 0x15f   :  { %2046 = vmatprep.subr.bf16.mxu1 %v10208_v32  ;;  %v13481_v31 = vsel %vm11617_vm11, 4294967295, %v13480_v31  ;;  %v13483_v32 = vmov 0 }
 0x160   :  { %13482 = vst [vmem:[#allocation32_spill] sm:$0xff] %v13481_v31  ;;  %v13484_v32 = vsel %vm11622_vm12, 4294967295, %v13483_v32  ;;  %v11778_v31 = vadd.s32 472, %v11446_v19 }
 0x161   :  { %2006 = vmatpush2.bf16.msra.mxu0 %v10203_v8  ;;  %13485 = vst [vmem:[#allocation33_spill] sm:$0xff] %v13484_v32  ;;  %v2129_v8 = vand.u32 7, %v11567_v11  ;;  %v11800_v32 = vadd.s32 464, %v11446_v19 }
 0x162   :  { %2047 = vmatpush2.bf16.msra.mxu1 %v10206_v9  ;;  %9543 = vmatprep.subr.msk.mxu0 %vm11492_vm0, %v13371_v2  ;;  %v2144_v9 = vand.u32 7, %v11570_v12  ;;  %13535 = vst [vmem:[#allocation55_spill] sm:$0xff] %v11778_v31 }
 0x163   :  { %13543 = vst [vmem:[#allocation59_spill] sm:$0xff] %v11800_v32 }
 0x164   :  { %v11572_v13 = vpop.f32.mrf.mxu0  ;;  %2008 = vmatmul.mubr.bf16.vlgmr.msra.gmra.mxu0 %v11434_v20  ;;  %v13473_v20 = vmov 0 }
 0x165   :  { %v11574_v14 = vpop.f32.mrf.mxu1  ;;  %2049 = vmatmul.mubr.bf16.vlgmr.msra.gmra.mxu1 %v11436_v21  ;;  %9544 = vmatpush3.msk.msra.mxu0 %vm11504_vm1, %v13371_v2  ;;  %v13474_v20 = vsel %vm11596_vm9, 4294967295, %v13473_v20  ;;  %v13476_v21 = vmov 0  ;;  %vm11754_vm1 = vcmp.eq.s32.totalorder %v2185_v48, %v11463_v33  ;;  %v13532_v48 = vmov 0 }
 0x166   :  { %13475 = vst [vmem:[#allocation29_spill] sm:$0xff] %v13474_v20  ;;  %v13477_v21 = vsel %vm11601_vm10, 4294967295, %v13476_v21  ;;  %v11609_v28 = vpop.f32.mrf.mxu0  ;;  %9545 = vmatprep.subr.msk.mxu0 %vm11516_vm2, %v13371_v2  ;;  %v13517_v20 = vmov 0  ;;  %v13527_v3 = vsel %vm11754_vm1, 4294967295, %v13526_v3 }
 0x167   :  { %13478 = vst [vmem:[#allocation30_spill] sm:$0xff] %v13477_v21  ;;  %v11611_v29 = vpop.f32.mrf.mxu1  ;;  %9546 = vmatpush3.msk.msra.mxu0 %vm11521_vm3, %v13371_v2  ;;  %vm11658_vm3 = vcmp.eq.s32.totalorder %v2146_v22, %v11463_v33  ;;  %v13498_v22 = vmov 0  ;;  %13528 = vst [vmem:[#allocation52_spill] sm:$0xff] %v13527_v3  ;;  %v2167_v21 = vand.u32 7, %v11707_v55  ;;  %v2182_v55 = vand.u32 7, %v11778_v31 }
 0x168   :  { %v1767_v52 = vpop.f32.mrf.mxu0  ;;  %9547 = vmatprep.subr.msk.mxu0 %vm11528_vm4, %v13371_v2  ;;  %v13496_v60 = vsel %vm11658_vm3, 4294967295, %v13495_v60  ;;  %vm11725_vm4 = vcmp.eq.s32.totalorder %v2144_v9, %v11463_v33  ;;  %v13520_v9 = vmov 0  ;;  %v2181_v3 = vand.u32 7, %v11800_v32 }
 0x169   :  { %v1808_v45 = vpop.f32.mrf.mxu1  ;;  %9548 = vmatpush3.msk.msra.mxu0 %vm11536_vm5, %v13371_v2  ;;  %13497 = vst [vmem:[#allocation37_spill] sm:$0xff] %v13496_v60  ;;  %vm11673_vm5 = vcmp.eq.s32.totalorder %v2130_v35, %v11463_v33  ;;  %v11678_v52 = vadd.s32 504, %v11446_v19  ;;  %v13504_v35 = vmov 0  ;;  %v13515_v15 = vsel %vm11725_vm4, 4294967295, %v13514_v15 }
 0x16a   :  { %v1768_v4 = vpop.f32.mrf.mxu0  ;;  %9549 = vmatprep.subr.msk.mxu0 %vm11549_vm6, %v13371_v2  ;;  %v13499_v22 = vsel %vm11673_vm5, 4294967295, %v13498_v22  ;;  %v11681_v45 = vadd.s32 376, %v11446_v19  ;;  %vm11693_vm6 = vcmp.eq.s32.totalorder %v2145_v39, %v11463_v33  ;;  %v13511_v39 = vmov 0  ;;  %13516 = vst [vmem:[#allocation48_spill] sm:$0xff] %v13515_v15 }
 0x16b   :  { %v1809_v5 = vpop.f32.mrf.mxu1  ;;  %13500 = vst [vmem:[#allocation38_spill] sm:$0xff] %v13499_v22  ;;  %v11687_v4 = vadd.s32 368, %v11446_v19  ;;  %9550 = vmatpush3.msk.msra.mxu0 %vm11559_vm7, %v13371_v2  ;;  %v13505_v35 = vsel %vm11693_vm6, 4294967295, %v13504_v35  ;;  %vm11713_vm7 = vcmp.eq.s32.totalorder %v2129_v8, %v11463_v33  ;;  %v2186_v7 = vand.u32 7, %v11678_v52 }
 0x16c   :  { %13501 = vst [vmem:[#allocation39_spill] sm:$0xff] %v11681_v45  ;;  %13506 = vst [vmem:[#allocation42_spill] sm:$0xff] %v13505_v35  ;;  %v11698_v5 = vadd.s32 488, %v11446_v19  ;;  %9551 = vmatprep.subr.msk.mxu0 %vm11579_vm8, %v13371_v2  ;;  %v13512_v39 = vsel %vm11713_vm7, 4294967295, %v13511_v39  ;;  %v2170_v54 = vand.u32 7, %v11681_v45  ;;  %v2126_v8 = vand.u32 7, %v11664_v63 }
 0x16d   :  { %13503 = vst [vmem:[#allocation41_spill] sm:$0xff] %v11687_v4  ;;  %13513 = vst [vmem:[#allocation47_spill] sm:$0xff] %v13512_v39  ;;  %v2169_v40 = vand.u32 7, %v11687_v4  ;;  %9552 = vmatpush3.msk.msra.mxu0 %vm11596_vm9, %v13371_v2  ;;  %vm11739_vm9 = vcmp.eq.s32.totalorder %v2128_v56, %v11463_v33  ;;  %vm11744_vm8 = vcmp.eq.s32.totalorder %v2186_v7, %v11463_v33  ;;  %v13523_v4 = vmov 0 }
 0x16e   :  { %13507 = vst [vmem:[#allocation43_spill] sm:$0xff] %v11698_v5  ;;  %v2184_v45 = vand.u32 7, %v11698_v5  ;;  %9553 = vmatprep.subr.msk.mxu0 %vm11601_vm10, %v13371_v2  ;;  %v13518_v20 = vsel %vm11739_vm9, 4294967295, %v13517_v20  ;;  %v13521_v9 = vsel %vm11744_vm8, 4294967295, %v13520_v9  ;;  %vm11749_vm2 = vcmp.eq.s32.totalorder %v2170_v54, %v11463_v33  ;;  %9581 = vmatprep.subr.msk.mxu1 %vm11744_vm8, %v13371_v2 }
 0x16f   :  { %13519 = vst [vmem:[#allocation49_spill] sm:$0xff] %v13518_v20  ;;  %13522 = vst [vmem:[#allocation50_spill] sm:$0xff] %v13521_v9  ;;  %v13524_v4 = vsel %vm11749_vm2, 4294967295, %v13523_v4  ;;  %v2183_v56 = vand.u32 7, %v11704_v58  ;;  %9554 = vmatpush3.msk.msra.mxu0 %vm11617_vm11, %v13371_v2  ;;  %vm11763_vm10 = vcmp.eq.s32.totalorder %v2143_v57, %v11463_v33  ;;  %v13529_v7 = vmov 0  ;;  %9582 = vmatpush3.msk.msra.mxu1 %vm11749_vm2, %v13371_v2 }
 0x170   :  { %13525 = vst [vmem:[#allocation51_spill] sm:$0xff] %v13524_v4  ;;  %v13530_v7 = vsel %vm11763_vm10, 4294967295, %v13529_v7  ;;  %v2141_v54 = vand.u32 7, %v11667_v0  ;;  %vm11772_vm0 = vcmp.eq.s32.totalorder %v2169_v40, %v11463_v33  ;;  %9555 = vmatprep.subr.msk.mxu0 %vm11622_vm12, %v13371_v2  ;;  %vm11784_vm11 = vcmp.eq.s32.totalorder %v2127_v59, %v11463_v33  ;;  %9583 = vmatprep.subr.msk.mxu1 %vm11754_vm1, %v13371_v2 }
 0x171   :  { %13531 = vst [vmem:[#allocation53_spill] sm:$0xff] %v13530_v7  ;;  %v13533_v48 = vsel %vm11772_vm0, 4294967295, %v13532_v48  ;;  %v13536_v57 = vmov 0  ;;  %vm11792_vm8 = vcmp.eq.s32.totalorder %v2184_v45, %v11463_v33  ;;  %v13539_v40 = vmov 0  ;;  %9556 = vmatpush3.msk.msra.mxu0 %vm11627_vm13, %v13371_v2  ;;  %9584 = vmatpush3.msk.msra.mxu1 %vm11772_vm0, %v13371_v2 }
 0x172   :  { %13534 = vst [vmem:[#allocation54_spill] sm:$0xff] %v13533_v48  ;;  %v13537_v57 = vsel %vm11784_vm11, 4294967295, %v13536_v57  ;;  %v13540_v40 = vsel %vm11792_vm8, 4294967295, %v13539_v40  ;;  %v11797_v9 = vadd.s32 344, %v11446_v19  ;;  %v11803_v59 = vadd.s32 336, %v11446_v19  ;;  %9557 = vmatprep.subr.msk.mxu0 %vm11636_vm14, %v13371_v2  ;;  %9585 = vmatprep.subr.msk.mxu1 %vm11792_vm8, %v13371_v2 }
 0x173   :  { %13538 = vst [vmem:[#allocation56_spill] sm:$0xff] %v13537_v57  ;;  %13541 = vst [vmem:[#allocation57_spill] sm:$0xff] %v13540_v40  ;;  %vm11809_vm12 = vcmp.eq.s32.totalorder %v2142_v61, %v11463_v33  ;;  %v13545_v4 = vmov 0  ;;  %vm11817_vm2 = vcmp.eq.s32.totalorder %v2168_v62, %v11463_v33  ;;  %v13548_v45 = vmov 0  ;;  %9558 = vmatpush3.msk.msra.mxu0 %vm11647_vm15, %v13371_v2 }
 0x174   :  { %13542 = vst [vmem:[#allocation58_spill] sm:$0xff] %v11797_v9  ;;  %13544 = vst [vmem:[#allocation60_spill] sm:$0xff] %v11803_v59  ;;  %v13546_v4 = vsel %vm11809_vm12, 4294967295, %v13545_v4  ;;  %v13549_v45 = vsel %vm11817_vm2, 4294967295, %v13548_v45  ;;  %v11823_v58 = vadd.s32 456, %v11446_v19  ;;  %vm11835_vm13 = vcmp.eq.s32.totalorder %v2183_v56, %v11463_v33  ;;  %9559 = vmatprep.subr.msk.mxu0 %vm11658_vm3, %v13371_v2  ;;  %9586 = vmatpush3.msk.msra.mxu1 %vm11817_vm2, %v13371_v2 }
 0x175   :  { %13547 = vst [vmem:[#allocation61_spill] sm:$0xff] %v13546_v4  ;;  %13550 = vst [vmem:[#allocation62_spill] sm:$0xff] %v13549_v45  ;;  %v13553_v62 = vmov 0  ;;  %v2166_v61 = vand.u32 7, %v11797_v9  ;;  %v11842_v31 = vadd.s32 448, %v11446_v19  ;;  %vm11854_vm14 = vcmp.eq.s32.totalorder %v2167_v21, %v11463_v33  ;;  %9560 = vmatpush3.msk.msra.mxu0 %vm11673_vm5, %v13371_v2  ;;  %9587 = vmatprep.subr.msk.mxu1 %vm11835_vm13, %v13371_v2 }
 0x176   :  { %13551 = vst [vmem:[#allocation63_spill] sm:$0xff] %v11823_v58  ;;  %v13554_v62 = vsel %vm11835_vm13, 4294967295, %v13553_v62  ;;  %v13557_v56 = vmov 0  ;;  %v2165_v48 = vand.u32 7, %v11803_v59  ;;  %v11860_v32 = vadd.s32 320, %v11446_v19  ;;  %9561 = vmatprep.subr.msk.mxu0 %vm11693_vm6, %v13371_v2  ;;  %9588 = vmatpush3.msk.msra.mxu1 %vm11854_vm14, %v13371_v2 }
 0x177   :  { %13555 = vst [vmem:[#allocation65_spill] sm:$0xff] %v13554_v62  ;;  %13556 = vst [vmem:[#allocation66_spill] sm:$0xff] %v11842_v31  ;;  %v13558_v56 = vsel %vm11854_vm14, 4294967295, %v13557_v56  ;;  %vm11866_vm15 = vcmp.eq.s32.totalorder %v2126_v8, %v11463_v33  ;;  %v2125_v40 = vand.u32 7, %v11731_v23  ;;  %vm11875_vm8 = vcmp.eq.s32.totalorder %v2182_v55, %v11463_v33  ;;  %9562 = vmatpush3.msk.msra.mxu0 %vm11713_vm7, %v13371_v2  ;;  %v10220_v9 = vld [vmem:[#allocation6 + $0x164] ss:$8 sps:$4 sm:$0xff]  }
 0x178   :  { %13559 = vst [vmem:[#allocation67_spill] sm:$0xff] %v13558_v56  ;;  %13560 = vst [vmem:[#allocation68_spill] sm:$0xff] %v11860_v32  ;;  %v13562_v50 = vsel %vm11866_vm15, 4294967295, %v13561_v50  ;;  %v13564_v21 = vmov 0  ;;  %v2180_v59 = vand.u32 7, %v11823_v58  ;;  %v11884_v8 = vadd.s32 8, %v11446_v19  ;;  %9589 = vmatprep.subr.msk.mxu1 %vm11875_vm8, %v13371_v2  ;;  %9563 = vmatprep.subr.msk.mxu0 %vm11725_vm4, %v13371_v2 }
 0x179   :  { %13563 = vst [vmem:[#allocation69_spill] sm:$0xff] %v13562_v50  ;;  %v13565_v21 = vsel %vm11875_vm8, 4294967295, %v13564_v21  ;;  %vm11890_vm3 = vcmp.eq.s32.totalorder %v2166_v61, %v11463_v33  ;;  %v13567_v60 = vmov 0  ;;  %v2164_v55 = vand.u32 7, %v11826_v34  ;;  %9564 = vmatpush3.msk.msra.mxu0 %vm11739_vm9, %v13371_v2  ;;  %v10217_v58 = vld [vmem:[#allocation6 + $0x64] ss:$8 sps:$4 sm:$0xff]  }
 0x17a   :  { %13566 = vst [vmem:[#allocation70_spill] sm:$0xff] %v13565_v21  ;;  %v13568_v60 = vsel %vm11890_vm3, 4294967295, %v13567_v60  ;;  %v11896_v45 = vadd.s32 440, %v11446_v19  ;;  %vm11905_vm5 = vcmp.eq.s32.totalorder %v2181_v3, %v11463_v33  ;;  %v13571_v22 = vmov 0  ;;  %9590 = vmatpush3.msk.msra.mxu1 %vm11890_vm3, %v13371_v2  ;;  %9565 = vmatprep.subr.msk.mxu0 %vm11763_vm10, %v13371_v2 }
 0x17b   :  { %13569 = vst [vmem:[#allocation71_spill] sm:$0xff] %v13568_v60  ;;  %v13572_v22 = vsel %vm11905_vm5, 4294967295, %v13571_v22  ;;  %v2179_v61 = vand.u32 7, %v11842_v31  ;;  %v11911_v62 = vadd.s32 312, %v11446_v19  ;;  %v11914_v34 = vadd.s32 432, %v11446_v19  ;;  %9591 = vmatprep.subr.msk.mxu1 %vm11905_vm5, %v13371_v2  ;;  %9566 = vmatpush3.msk.msra.mxu0 %vm11784_vm11, %v13371_v2 }
 0x17c   :  { %13570 = vst [vmem:[#allocation72_spill] sm:$0xff] %v11896_v45  ;;  %13573 = vst [vmem:[#allocation73_spill] sm:$0xff] %v13572_v22  ;;  %v11920_v35 = vadd.s32 128, %v11446_v19  ;;  %vm11926_vm6 = vcmp.eq.s32.totalorder %v2165_v48, %v11463_v33  ;;  %v13576_v3 = vmov 0  ;;  %v2163_v56 = vand.u32 7, %v11860_v32  ;;  %9567 = vmatprep.subr.msk.mxu0 %vm11809_vm12, %v13371_v2 }
 0x17d   :  { %13574 = vst [vmem:[#allocation74_spill] sm:$0xff] %v11911_v62  ;;  %13575 = vst [vmem:[#allocation75_spill] sm:$0xff] %v11914_v34  ;;  %v13577_v3 = vsel %vm11926_vm6, 4294967295, %v13576_v3  ;;  %v11932_v31 = vadd.s32 304, %v11446_v19  ;;  %vm11938_vm7 = vcmp.eq.s32.totalorder %v2141_v54, %v11463_v33  ;;  %v13580_v39 = vmov 0  ;;  %9592 = vmatpush3.msk.msra.mxu1 %vm11926_vm6, %v13371_v2  ;;  %9568 = vmatpush3.msk.msra.mxu0 %vm11866_vm15, %v13371_v2 }
 0x17e   :  { %13578 = vst [vmem:[#allocation76_spill] sm:$0xff] %v13577_v3  ;;  %v13581_v39 = vsel %vm11938_vm7, 4294967295, %v13580_v39  ;;  %vm11946_vm8 = vcmp.eq.s32.totalorder %v2180_v59, %v11463_v33  ;;  %v13583_v48 = vmov 0  ;;  %v2178_v21 = vand.u32 7, %v11896_v45  ;;  %9569 = vmatprep.subr.msk.mxu0 %vm11938_vm7, %v13371_v2 }
 0x17f   :  { %13579 = vst [vmem:[#allocation77_spill] sm:$0xff] %v11932_v31  ;;  %13582 = vst [vmem:[#allocation78_spill] sm:$0xff] %v13581_v39  ;;  %v13584_v48 = vsel %vm11946_vm8, 4294967295, %v13583_v48  ;;  %v11952_v32 = vadd.s32 424, %v11446_v19  ;;  %v2140_v54 = vand.u32 7, %v11848_v38  ;;  %vm11962_vm4 = vcmp.eq.s32.totalorder %v2164_v55, %v11463_v33  ;;  %9593 = vmatprep.subr.msk.mxu1 %vm11946_vm8, %v13371_v2 }
 0x180   :  { %13585 = vst [vmem:[#allocation79_spill] sm:$0xff] %v13584_v48  ;;  %v13587_v59 = vmov 0  ;;  %v2162_v15 = vand.u32 7, %v11911_v62  ;;  %v11968_v60 = vadd.s32 296, %v11446_v19  ;;  %v2124_v20 = vand.u32 7, %v11884_v8  ;;  %9594 = vmatpush3.msk.msra.mxu1 %vm11962_vm4, %v13371_v2 }
 0x181   :  { %13586 = vst [vmem:[#allocation80_spill] sm:$0xff] %v11952_v32  ;;  %v13588_v59 = vsel %vm11962_vm4, 4294967295, %v13587_v59  ;;  %vm11978_vm9 = vcmp.eq.s32.totalorder %v2179_v61, %v11463_v33  ;;  %v13591_v55 = vmov 0  ;;  %v2177_v22 = vand.u32 7, %v11914_v34 }
 0x182   :  { %13589 = vst [vmem:[#allocation81_spill] sm:$0xff] %v13588_v59  ;;  %13590 = vst [vmem:[#allocation82_spill] sm:$0xff] %v11968_v60  ;;  %v13592_v55 = vsel %vm11978_vm9, 4294967295, %v13591_v55  ;;  %v11984_v62 = vadd.s32 416, %v11446_v19  ;;  %v2139_v7 = vand.u32 7, %v11920_v35  ;;  %vm11994_vm10 = vcmp.eq.s32.totalorder %v2163_v56, %v11463_v33  ;;  %9595 = vmatprep.subr.msk.mxu1 %vm11978_vm9, %v13371_v2 }
 0x183   :  { %13593 = vst [vmem:[#allocation83_spill] sm:$0xff] %v13592_v55  ;;  %v13595_v61 = vmov 0  ;;  %v2161_v3 = vand.u32 7, %v11932_v31  ;;  %v12000_v34 = vadd.s32 288, %v11446_v19  ;;  %vm12006_vm11 = vcmp.eq.s32.totalorder %v2125_v40, %v11463_v33  ;;  %9596 = vmatpush3.msk.msra.mxu1 %vm11994_vm10, %v13371_v2 }
 0x184   :  { %13594 = vst [vmem:[#allocation84_spill] sm:$0xff] %v11984_v62  ;;  %v13596_v61 = vsel %vm11994_vm10, 4294967295, %v13595_v61  ;;  %v13599_v57 = vmov 0  ;;  %v2123_v48 = vand.u32 7, %v11446_v19  ;;  %vm12015_vm8 = vcmp.eq.s32.totalorder %v2178_v21, %v11463_v33  ;;  %9570 = vmatpush3.msk.msra.mxu0 %vm12006_vm11, %v13371_v2 }
 0x185   :  { %13597 = vst [vmem:[#allocation85_spill] sm:$0xff] %v13596_v61  ;;  %13598 = vst [vmem:[#allocation86_spill] sm:$0xff] %v12000_v34  ;;  %v13600_v57 = vsel %vm12006_vm11, 4294967295, %v13599_v57  ;;  %v13602_v56 = vmov 0  ;;  %v2176_v31 = vand.u32 7, %v11952_v32  ;;  %vm12024_vm12 = vcmp.eq.s32.totalorder %v2140_v54, %v11463_v33  ;;  %9597 = vmatprep.subr.msk.mxu1 %vm12015_vm8, %v13371_v2 }
 0x186   :  { %13601 = vst [vmem:[#allocation87_spill] sm:$0xff] %v13600_v57  ;;  %v13603_v56 = vsel %vm12015_vm8, 4294967295, %v13602_v56  ;;  %v13605_v40 = vmov 0  ;;  %vm12032_vm4 = vcmp.eq.s32.totalorder %v2162_v15, %v11463_v33  ;;  %v13608_v21 = vmov 0  ;;  %9571 = vmatprep.subr.msk.mxu0 %vm12024_vm12, %v13371_v2 }
 0x187   :  { %13604 = vst [vmem:[#allocation88_spill] sm:$0xff] %v13603_v56  ;;  %v13606_v40 = vsel %vm12024_vm12, 4294967295, %v13605_v40  ;;  %v13609_v21 = vsel %vm12032_vm4, 4294967295, %v13608_v21  ;;  %v2160_v4 = vand.u32 7, %v11968_v60  ;;  %vm12041_vm15 = vcmp.eq.s32.totalorder %v2124_v20, %v11463_v33  ;;  %9598 = vmatpush3.msk.msra.mxu1 %vm12032_vm4, %v13371_v2 }
 0x188   :  { %13607 = vst [vmem:[#allocation89_spill] sm:$0xff] %v13606_v40  ;;  %13610 = vst [vmem:[#allocation90_spill] sm:$0xff] %v13609_v21  ;;  %v13611_v54 = vmov 0  ;;  %vm12049_vm9 = vcmp.eq.s32.totalorder %v2177_v22, %v11463_v33  ;;  %v13614_v15 = vmov 0  ;;  %v2175_v50 = vand.u32 7, %v11984_v62  ;;  %9572 = vmatpush3.msk.msra.mxu0 %vm12041_vm15, %v13371_v2 }
 0x189   :  { %v13612_v54 = vsel %vm12041_vm15, 4294967295, %v13611_v54  ;;  %v13615_v15 = vsel %vm12049_vm9, 4294967295, %v13614_v15  ;;  %vm12058_vm7 = vcmp.eq.s32.totalorder %v2139_v7, %v11463_v33  ;;  %v13617_v20 = vmov 0  ;;  %9599 = vmatprep.subr.msk.mxu1 %vm12049_vm9, %v13371_v2 }
 0x18a   :  { %13613 = vst [vmem:[#allocation91_spill] sm:$0xff] %v13612_v54  ;;  %13616 = vst [vmem:[#allocation92_spill] sm:$0xff] %v13615_v15  ;;  %v13618_v20 = vsel %vm12058_vm7, 4294967295, %v13617_v20  ;;  %vm12066_vm10 = vcmp.eq.s32.totalorder %v2161_v3, %v11463_v33  ;;  %v13620_v22 = vmov 0  ;;  %v2159_v39 = vand.u32 7, %v12000_v34  ;;  %9573 = vmatprep.subr.msk.mxu0 %vm12058_vm7, %v13371_v2 }
 0x18b   :  { %13619 = vst [vmem:[#allocation93_spill] sm:$0xff] %v13618_v20  ;;  %v13621_v22 = vsel %vm12066_vm10, 4294967295, %v13620_v22  ;;  %vm12075_vm11 = vcmp.eq.s32.totalorder %v2123_v48, %v11463_v33  ;;  %v13623_v7 = vmov 0  ;;  %vm12083_vm8 = vcmp.eq.s32.totalorder %v2176_v31, %v11463_v33  ;;  %9600 = vmatpush3.msk.msra.mxu1 %vm12066_vm10, %v13371_v2 }
 0x18c   :  { %13622 = vst [vmem:[#allocation94_spill] sm:$0xff] %v13621_v22  ;;  %v13624_v7 = vsel %vm12075_vm11, 4294967295, %v13623_v7  ;;  %v13626_v3 = vmov 0  ;;  %vm12094_vm12 = vcmp.eq.s32.totalorder %v2160_v4, %v11463_v33  ;;  %v13629_v48 = vmov 0  ;;  %9574 = vmatpush3.msk.msra.mxu0 %vm12075_vm11, %v13371_v2  ;;  %9601 = vmatprep.subr.msk.mxu1 %vm12083_vm8, %v13371_v2 }
 0x18d   :  { %13625 = vst [vmem:[#allocation95_spill] sm:$0xff] %v13624_v7  ;;  %v13627_v3 = vsel %vm12083_vm8, 4294967295, %v13626_v3  ;;  %v13630_v48 = vsel %vm12094_vm12, 4294967295, %v13629_v48  ;;  %vm12105_vm4 = vcmp.eq.s32.totalorder %v2175_v50, %v11463_v33  ;;  %v13632_v31 = vmov 0  ;;  %9602 = vmatpush3.msk.msra.mxu1 %vm12094_vm12, %v13371_v2  ;;  %v12132_v50 = vld [vmem:[%s13258_s3] sm:$0xf] }
 0x18e   :  { %13628 = vst [vmem:[#allocation96_spill] sm:$0xff] %v13627_v3  ;;  %13631 = vst [vmem:[#allocation97_spill] sm:$0xff] %v13630_v48  ;;  %v13633_v31 = vsel %vm12105_vm4, 4294967295, %v13632_v31  ;;  %vm12116_vm15 = vcmp.eq.s32.totalorder %v2159_v39, %v11463_v33  ;;  %v13635_v4 = vmov 0  ;;  %9603 = vmatprep.subr.msk.mxu1 %vm12105_vm4, %v13371_v2  ;;  %v12135_v39 = vsub.s32 0, %v11446_v19  ;;  %s2057_s3 = sld [smem:[#allocation2]] }
 0x18f   :  { %13634 = vst [vmem:[#allocation98_spill] sm:$0xff] %v13633_v31  ;;  %v13636_v4 = vsel %vm12116_vm15, 4294967295, %v13635_v4  ;;  %9604 = vmatpush3.msk.msra.mxu1 %vm12116_vm15, %v13371_v2  ;;  %v12138_v7 = vsub.s32 1, %v11446_v19  ;;  %v12149_v48 = vadd.s32 280, %v11446_v19  ;;  %v12154_v40 = vadd.s32 400, %v11446_v19 }
 0x190   :  { %13637 = vst [vmem:[#allocation99_spill] sm:$0xff] %v13636_v4  ;;  %v432_v20 = vrot.slane %v12132_v50, %v12135_v39  ;;  %v12145_v4 = vadd.s32 408, %v11446_v19  ;;  %v12158_v57 = vadd.s32 272, %v11446_v19  ;;  %v13642_v15 = vmov 0 }
 0x191   :  { %v436_v31 = vrot.slane %v12132_v50, %v12138_v7  ;;  %13639 = vst [vmem:[#allocation101_spill] sm:$0xff] %v12149_v48  ;;  %13640 = vst [vmem:[#allocation102_spill] sm:$0xff] %v12154_v40  ;;  %v2158_v22 = vand.u32 7, %v12149_v48  ;;  %v13646_v56 = vmov 0.015625   ;;  %v13647_v61 = vmov 0 }
 0x192   :  { %13638 = vst [vmem:[#allocation100_spill] sm:$0xff] %v12145_v4  ;;  %v1764_v2 = vadd.f32 %v11572_v13, %v432_v20  ;;  %v2174_v3 = vand.u32 7, %v12145_v4  ;;  %13641 = vst [vmem:[#allocation103_spill] sm:$0xff] %v12158_v57  ;;  %v2173_v13 = vand.u32 7, %v12154_v40  ;;  %v12167_v20 = vadd.s32 392, %v11446_v19 }
 0x193   :  { %v1766_v54 = vadd.f32 %v11609_v28, %v436_v31  ;;  %vm12174_vm11 = vcmp.eq.s32.totalorder %v2158_v22, %v11463_v33  ;;  %v12180_v55 = vadd.s32 264, %v11446_v19  ;;  %v12193_v22 = vadd.s32 384, %v11446_v19 }
 0x194   :  { %vm12161_vm15 = vcmp.eq.s32.totalorder %v2174_v3, %v11463_v33  ;;  %13645 = vst [vmem:[#allocation105_spill] sm:$0xff] %v12167_v20  ;;  %v1805_v28 = vadd.f32 %v11574_v14, %v1764_v2  ;;  %v13648_v61 = vsel %vm12174_vm11, 4294967295, %v13647_v61  ;;  %v2157_v3 = vand.u32 7, %v12158_v57 }
 0x195   :  { %v13643_v15 = vsel %vm12161_vm15, 4294967295, %v13642_v15  ;;  %9605 = vmatprep.subr.msk.mxu1 %vm12161_vm15, %v13646_v56  ;;  %13649 = vst [vmem:[#allocation106_spill] sm:$0xff] %v13648_v61  ;;  %13650 = vst [vmem:[#allocation107_spill] sm:$0xff] %v12180_v55  ;;  %v1807_v59 = vadd.f32 %v11611_v29, %v1766_v54  ;;  %vm12187_vm4 = vcmp.eq.s32.totalorder %v2173_v13, %v11463_v33  ;;  %v13651_v2 = vmov 0 }
 0x196   :  { %13644 = vst [vmem:[#allocation104_spill] sm:$0xff] %v13643_v15  ;;  %9606 = vmatpush3.msk.msra.mxu1 %vm12174_vm11, %v13646_v56  ;;  %v13652_v2 = vsel %vm12187_vm4, 4294967295, %v13651_v2  ;;  %v2172_v14 = vand.u32 7, %v12167_v20  ;;  %13654 = vst [vmem:[#allocation109_spill] sm:$0xff] %v12193_v22  ;;  %vm12199_vm15 = vcmp.eq.s32.totalorder %v2157_v3, %v11463_v33  ;;  %v13655_v29 = vmov 0 }
 0x197   :  { %13653 = vst [vmem:[#allocation108_spill] sm:$0xff] %v13652_v2  ;;  %9607 = vmatprep.subr.msk.mxu1 %vm12187_vm4, %v13646_v56  ;;  %v13656_v29 = vsel %vm12199_vm15, 4294967295, %v13655_v29  ;;  %v2156_v54 = vand.u32 7, %v12180_v55  ;;  %v12205_v13 = vadd.s32 256, %v11446_v19 }
 0x198   :  { %13657 = vst [vmem:[#allocation110_spill] sm:$0xff] %v13656_v29  ;;  %9608 = vmatpush3.msk.msra.mxu1 %vm12199_vm15, %v13646_v56  ;;  %vm12211_vm11 = vcmp.eq.s32.totalorder %v2172_v14, %v11463_v33 }
 0x199   :  { %13658 = vst [vmem:[#allocation111_spill] sm:$0xff] %v12205_v13  ;;  %9609 = vmatprep.subr.msk.mxu1 %vm12211_vm11, %v13646_v56  ;;  %vm12220_vm4 = vcmp.eq.s32.totalorder %v2156_v54, %v11463_v33 }
 0x19a   :  { %9610 = vmatpush3.msk.msra.mxu1 %vm12220_vm4, %v13646_v56 }
 0x1a4   :  { %v1845_v31 = vpop.f32.mrf.mxu0 }
 0x1a5   :  { %v1886_v21 = vpop.f32.mrf.mxu1  ;;  %v1846_v15 = vadd.f32 %v1845_v31, %v1805_v28  ;;  %v13659_v28 = vmov 0  ;;  %v2171_v31 = vand.u32 7, %v12193_v22 }
 0x1a6   :  { %v1847_v57 = vpop.f32.mrf.mxu0  ;;  %v13660_v28 = vsel %vm12211_vm11, 4294967295, %v13659_v28 }
 0x1a7   :  { %v1888_v40 = vpop.f32.mrf.mxu1  ;;  %v1848_v61 = vadd.f32 %v1847_v57, %v1807_v59  ;;  %13661 = vst [vmem:[#allocation112_spill] sm:$0xff] %v13660_v28  ;;  %v13662_v57 = vmov 0  ;;  %v2155_v59 = vand.u32 7, %v12205_v13  ;;  %vm12231_vm15 = vcmp.eq.s32.totalorder %v2171_v31, %v11463_v33 }
 0x1a8   :  { %v1849_v3 = vpop.f32.mrf.mxu0  ;;  %v13663_v57 = vsel %vm12220_vm4, 4294967295, %v13662_v57  ;;  %v12235_v14 = vadd.f32 %v1886_v21, %v1846_v15  ;;  %9611 = vmatprep.subr.msk.mxu1 %vm12231_vm15, %v13646_v56  ;;  %v12255_v13 = vsub.s32 2, %v11446_v19 }
 0x1a9   :  { %v1890_v2 = vpop.f32.mrf.mxu1  ;;  %13664 = vst [vmem:[#allocation113_spill] sm:$0xff] %v13663_v57  ;;  %v12225_v29 = vadd.f32 %v1888_v40, %v1848_v61  ;;  %vm12241_vm11 = vcmp.eq.s32.totalorder %v2155_v59, %v11463_v33  ;;  %v13668_v61 = vmov 0 }
 0x1aa   :  { %v13665_v2 = vmov 0  ;;  %v1850_v3 = vpop.f32.mrf.mxu0  ;;  %v13669_v61 = vsel %vm12241_vm11, 4294967295, %v13668_v61  ;;  %9612 = vmatpush3.msk.msra.mxu1 %vm12241_vm11, %v13646_v56  ;;  %v2452_v21 = vmul.f32 %v12235_v14, %v12235_v14  ;;  %13671 = vst [vmem:[#allocation116_spill] sm:$0xff] %v12255_v13 }
 0x1ab   :  { %v13666_v2 = vsel %vm12231_vm15, 4294967295, %v13665_v2  ;;  %v1891_v54 = vpop.f32.mrf.mxu1  ;;  %13670 = vst [vmem:[#allocation115_spill] sm:$0xff] %v13669_v61  ;;  %2520 = vmatprep.mubr.f32.mxu0 %v12225_v29  ;;  %v2453_v40 = vmul.f32 %v12225_v29, %v12225_v29  ;;  %v12258_v61 = vsub.s32 3, %v11446_v19 }
 0x1ac   :  { %13667 = vst [vmem:[#allocation114_spill] sm:$0xff] %v13666_v2  ;;  %2521 = vmatmul.mubr.f32.vlgmr.msra.gmra.mxu0 %v12235_v14 }
 0x1ad   :  { %2525 = vmatprep.mubr.f32.mxu0 %v2453_v40  ;;  %13672 = vst [vmem:[#allocation117_spill] sm:$0xff] %v12258_v61  ;;  %v440_v40 = vrot.slane %v12132_v50, %v12255_v13 }
 0x1b0   :  { %2526 = vmatmul.mubr.f32.gmra.mxu0 %v2452_v21  ;;  %v444_v21 = vrot.slane %v12132_v50, %v12258_v61 }
 0x1e4   :  { %v1927_v15 = vpop.f32.mrf.mxu0 }
 0x1e5   :  { %v1968_v31 = vpop.f32.mrf.mxu1  ;;  %v1928_v56 = vadd.f32 %v1927_v15, %v440_v40  ;;  %v13678_v15 = vmov 0  ;;  %v10211_v40 = vld [vmem:[#allocation6 + $0x74] ss:$8 sps:$4 sm:$0xff]  }
 0x1e6   :  { %v1929_v59 = vpop.f32.mrf.mxu0 }
 0x1e7   :  { %v1970_v3 = vpop.f32.mrf.mxu1  ;;  %v1930_v22 = vadd.f32 %v1929_v59, %v444_v21  ;;  %v1969_v55 = vadd.f32 %v1968_v31, %v1928_v56  ;;  %v13681_v31 = vmov 0  ;;  %v13427_v59 = vmov 1.0   ;;  %v10214_v21 = vld [vmem:[#allocation6 + $0x174] ss:$8 sps:$4 sm:$0xff]  }
 0x1e8   :  { %v1931_v54 = vpop.f32.mrf.mxu0 }
 0x1e9   :  { %v1972_v2 = vpop.f32.mrf.mxu1 }
 0x1ea   :  { %v1932_v57 = vpop.f32.mrf.mxu0  ;;  %v1971_v2 = vadd.f32 %v1970_v3, %v1930_v22  ;;  %v13675_v22 = vmov 0  ;;  %v13684_v3 = vmov 0 }
 0x1eb   :  { %v1973_v28 = vpop.f32.mrf.mxu1 }
 0x224   :  { %v2009_v20 = vpop.f32.mrf.mxu0 }
 0x225   :  { %v2050_v54 = vpop.f32.mrf.mxu1  ;;  %v2010_v57 = vadd.f32 %v2009_v20, %v1969_v55  ;;  %v13421_v20 = vmov 0.0  }
 0x226   :  { %v2011_v28 = vpop.f32.mrf.mxu0  ;;  %2677 = vmatprep.mubr.f32.mxu0 %v13421_v20 }
 0x227   :  { %v2052_v48 = vpop.f32.mrf.mxu1  ;;  %v2012_v4 = vadd.f32 %v2011_v28, %v1971_v2  ;;  %v12266_v32 = vadd.f32 %v2050_v54, %v2010_v57 }
 0x228   :  { %v2013_v34 = vpop.f32.mrf.mxu0 }
 0x229   :  { %v2054_v62 = vpop.f32.mrf.mxu1  ;;  %v12264_v60 = vadd.f32 %v2052_v48, %v2012_v4  ;;  %v2454_v55 = vmul.f32 %v12266_v32, %v12266_v32  ;;  %v12275_v34 = vadd.s32 128, %v11463_v33  ;;  %v12279_v48 = vadd.s32 384, %v11463_v33 }
 0x22a   :  { %v2014_v13 = vpop.f32.mrf.mxu0  ;;  %v2320_v62 = vand.u32 7, %v11463_v33 }
 0x22b   :  { %v2055_v45 = vpop.f32.mrf.mxu1  ;;  %2595 = vmatprep.mubr.f32.mxu1 %v12264_v60  ;;  %v2455_v56 = vmul.f32 %v12264_v60, %v12264_v60  ;;  %13673 = vst [vmem:[#allocation118_spill] sm:$0xff] %v12279_v48  ;;  %v2321_v4 = vand.u32 7, %v12275_v34  ;;  %v2323_v50 = vand.u32 7, %v12279_v48 }
 0x22c   :  { %2596 = vmatmul.mubr.f32.vlgmr.msra.gmra.mxu1 %v12266_v32  ;;  %v12282_v45 = vadd.s32 256, %v11463_v33  ;;  %vm12289_vm11 = vcmp.eq.s32.totalorder %v11446_v19, %v2320_v62 }
 0x22d   :  { %2600 = vmatprep.mubr.f32.mxu1 %v2455_v56  ;;  %v13676_v22 = vsel %vm12289_vm11, 4294967295, %v13675_v22  ;;  %vm12295_vm15 = vcmp.eq.s32.totalorder %v11446_v19, %v2321_v4  ;;  %vm12300_vm4 = vcmp.eq.s32.totalorder %v11446_v19, %v2323_v50 }
 0x22e   :  { %13674 = vst [vmem:[#allocation119_spill] sm:$0xff] %v12282_v45  ;;  %13677 = vst [vmem:[#allocation120_spill] sm:$0xff] %v13676_v22  ;;  %v2322_v13 = vand.u32 7, %v12282_v45  ;;  %v13679_v15 = vsel %vm12295_vm15, 4294967295, %v13678_v15  ;;  %v13682_v31 = vsel %vm12300_vm4, 4294967295, %v13681_v31  ;;  %8772 = vmatprep.subr.msk.mxu0 %vm12295_vm15, %v13427_v59  ;;  %8774 = vmatprep.subr.msk.mxu1 %vm12300_vm4, %v13427_v59 }
 0x22f   :  { %13680 = vst [vmem:[#allocation121_spill] sm:$0xff] %v13679_v15  ;;  %13683 = vst [vmem:[#allocation122_spill] sm:$0xff] %v13682_v31  ;;  %8773 = vmatpush1.msk.msra.mxu0 %vm12289_vm11, %v13427_v59 }
 0x230   :  { %2601 = vmatmul.mubr.f32.gmra.mxu1 %v2454_v55  ;;  %vm12311_vm7 = vcmp.eq.s32.totalorder %v11446_v19, %v2322_v13  ;;  %3188 = vmatprep.subr.bf16.mxu0 %v10211_v40  ;;  %v10209_v40 = vld [vmem:[#allocation6 + $0x70] ss:$8 sps:$4 sm:$0xff]  }
 0x231   :  { %2754 = vmatprep.mubr.f32.mxu1 %v13421_v20  ;;  %v13685_v3 = vsel %vm12311_vm7, 4294967295, %v13684_v3  ;;  %8775 = vmatpush1.msk.msra.mxu1 %vm12311_vm7, %v13427_v59 }
 0x232   :  { %13686 = vst [vmem:[#allocation123_spill] sm:$0xff] %v13685_v3  ;;  %3229 = vmatprep.subr.bf16.mxu1 %v10214_v21  ;;  %v10212_v21 = vld [vmem:[#allocation6 + $0x170] ss:$8 sps:$4 sm:$0xff]  }
 0x26c   :  { %v9575_v54 = vpop.f32.mrf.mxu0 }
 0x26e   :  { %v9576_v2 = vpop.f32.mrf.mxu0 }
 0x26f   :  { %v9577_v55 = vadd.f32 %v9576_v2, %v9575_v54  ;;  %v13687_v54 = vmov 0.0  }
 0x270   :  { %v9578_v57 = vpop.f32.mrf.mxu0 }
 0x272   :  { %v9579_v4 = vpop.f32.mrf.mxu0 }
 0x273   :  { %v9580_v22 = vadd.f32 %v9579_v4, %v9578_v57  ;;  %v10233_v57 = vld [vmem:[#allocation6 + $0x30] ss:$8 sps:$4 sm:$0xff]   ;;  %v10242_v4 = vld [vmem:[#allocation6 + $0x120] ss:$8 sps:$4 sm:$0xff]  }
 0x2ec   :  { %v9613_v28 = vpop.f32.mrf.mxu1 }
 0x2ee   :  { %v9614_v56 = vpop.f32.mrf.mxu1 }
 0x2ef   :  { %v9615_v62 = vadd.f32 %v9614_v56, %v9613_v28  ;;  %v10236_v28 = vld [vmem:[#allocation6 + $0x130] ss:$8 sps:$4 sm:$0xff]   ;;  %v10241_v56 = vld [vmem:[#allocation6 + $0x24] ss:$8 sps:$4 sm:$0xff]  }
 0x2f0   :  { %v9616_v50 = vpop.f32.mrf.mxu1 }
 0x2f1   :  { %v2598_v13 = vadd.f32 %v9615_v62, %v9577_v55  ;;  %v10244_v55 = vld [vmem:[#allocation6 + $0x124] ss:$8 sps:$4 sm:$0xff]   ;;  %v10239_v62 = vld [vmem:[#allocation6 + $0x20] ss:$8 sps:$4 sm:$0xff]  }
 0x2f2   :  { %v9617_v20 = vpop.f32.mrf.mxu1 }
 0x2f3   :  { %v9618_v31 = vadd.f32 %v9617_v20, %v9616_v50  ;;  %v2606_v15 = vmul.f32 %v2598_v13, %v2598_v13  ;;  %v2611_v5 = vsub.f32 0.0, %v2598_v13  ;;  %v10215_v20 = vld [vmem:[#allocation6 + $0x60] ss:$8 sps:$4 sm:$0xff]   ;;  %v10247_v50 = vld [vmem:[#allocation6 + $0x14] ss:$8 sps:$4 sm:$0xff]  }
 0x2f4   :  { %v10250_v13 = vld [vmem:[#allocation6 + $0x114] ss:$8 sps:$4 sm:$0xff]  }
 0x2f5   :  { %v2603_v3 = vadd.f32 %v9618_v31, %v9580_v22  ;;  %v10218_v22 = vld [vmem:[#allocation6 + $0x160] ss:$8 sps:$4 sm:$0xff]   ;;  %v10224_v31 = vld [vmem:[#allocation6 + $0x150] ss:$8 sps:$4 sm:$0xff]  }
 0x2f7   :  { %v2607_v59 = vsub.f32 %v2603_v3, %v2606_v15  ;;  %v10221_v15 = vld [vmem:[#allocation6 + $0x50] ss:$8 sps:$4 sm:$0xff]   ;;  %v10232_v3 = vld [vmem:[#allocation6 + $0x144] ss:$8 sps:$4 sm:$0xff]  }
 0x2f9   :  { %v2608_v45 = vmax.f32 %v2607_v59, 0.0  ;;  %v10229_v59 = vld [vmem:[#allocation6 + $0x44] ss:$8 sps:$4 sm:$0xff]  }
 0x2fb   :  { %v2609_v48 = vadd.f32 1e-05, %v2608_v45  ;;  %v10226_v45 = vld [vmem:[#allocation6 + $0x154] ss:$8 sps:$4 sm:$0xff]  }
 0x2fd   :  { %11073 = vrsqrt.f32 %v2609_v48  ;;  %v10223_v48 = vld [vmem:[#allocation6 + $0x54] ss:$8 sps:$4 sm:$0xff]  }
 0x30a   :  { %v11074_v61 = vpop.eup %11073 }
 0x30b   :  { %2678 = vmatmul.mubr.f32.vlgmr.msra.gmra.mxu0 %v11074_v61  ;;  %2755 = vmatmul.mubr.f32.vlgmr.msra.gmra.mxu1 %v11074_v61  ;;  %v2612_v2 = vmul.f32 %v11074_v61, %v2611_v5  ;;  %v10227_v5 = vld [vmem:[#allocation6 + $0x40] ss:$8 sps:$4 sm:$0xff]  }
 0x30c   :  { %2683 = vmatprep.mubr.f32.mxu0 %v13687_v54  ;;  %2760 = vmatprep.mubr.f32.mxu1 %v13687_v54  ;;  %v10230_v61 = vld [vmem:[#allocation6 + $0x140] ss:$8 sps:$4 sm:$0xff]  }
 0x30d   :  { %3189 = vmatpush1.bf16.msra.mxu0 %v10209_v40  ;;  %3230 = vmatpush1.bf16.msra.mxu1 %v10212_v21  ;;  %v10245_v40 = vld [vmem:[#allocation6 + $0x10] ss:$8 sps:$4 sm:$0xff]  }
 0x30e   :  { %3190 = vmatprep.subr.bf16.mxu0 %v10217_v58  ;;  %3231 = vmatprep.subr.bf16.mxu1 %v10220_v9  ;;  %v10235_v58 = vld [vmem:[#allocation6 + $0x34] ss:$8 sps:$4 sm:$0xff]   ;;  %v10248_v21 = vld [vmem:[#allocation6 + $0x110] ss:$8 sps:$4 sm:$0xff]  }
 0x30f   :  { %2684 = vmatmul.mubr.f32.gmra.mxu0 %v2612_v2  ;;  %2761 = vmatmul.mubr.f32.gmra.mxu1 %v2612_v2  ;;  %v10238_v9 = vld [vmem:[#allocation6 + $0x134] ss:$8 sps:$4 sm:$0xff]   ;;  %v10253_v2 = vld [vmem:[#allocation6 + $0x4] ss:$8 sps:$4 sm:$0xff]  }
 0x311   :  { %3191 = vmatpush1.bf16.msra.mxu0 %v10215_v20  ;;  %3232 = vmatpush1.bf16.msra.mxu1 %v10218_v22  ;;  %v10256_v20 = vld [vmem:[#allocation6 + $0x104] ss:$8 sps:$4 sm:$0xff]   ;;  %v10251_v22 = vld [vmem:[#allocation6] ss:$8 sps:$4 sm:$0xff]  }
 0x312   :  { %3192 = vmatprep.subr.bf16.mxu0 %v10223_v48  ;;  %3233 = vmatprep.subr.bf16.mxu1 %v10226_v45  ;;  %v10254_v48 = vld [vmem:[#allocation6 + $0x100] ss:$8 sps:$4 sm:$0xff]   ;;  %v10259_v45 = vld [vmem:[#allocation6 + $0xf4] ss:$8 sps:$4 sm:$0xff]  }
 0x315   :  { %3193 = vmatpush1.bf16.msra.mxu0 %v10221_v15  ;;  %3234 = vmatpush1.bf16.msra.mxu1 %v10224_v31  ;;  %v10262_v15 = vld [vmem:[#allocation6 + $0x1f4] ss:$8 sps:$4 sm:$0xff]   ;;  %v10257_v31 = vld [vmem:[#allocation6 + $0xf0] ss:$8 sps:$4 sm:$0xff]  }
 0x316   :  { %3194 = vmatprep.subr.bf16.mxu0 %v10229_v59  ;;  %3235 = vmatprep.subr.bf16.mxu1 %v10232_v3  ;;  %v10260_v59 = vld [vmem:[#allocation6 + $0x1f0] ss:$8 sps:$4 sm:$0xff]   ;;  %v10265_v3 = vld [vmem:[#allocation6 + $0xe4] ss:$8 sps:$4 sm:$0xff]  }
 0x319   :  { %3195 = vmatpush1.bf16.msra.mxu0 %v10227_v5  ;;  %3236 = vmatpush1.bf16.msra.mxu1 %v10230_v61  ;;  %v10268_v5 = vld [vmem:[#allocation6 + $0x1e4] ss:$8 sps:$4 sm:$0xff]   ;;  %v10263_v61 = vld [vmem:[#allocation6 + $0xe0] ss:$8 sps:$4 sm:$0xff]  }
 0x31a   :  { %3196 = vmatprep.subr.bf16.mxu0 %v10235_v58  ;;  %3237 = vmatprep.subr.bf16.mxu1 %v10238_v9  ;;  %v10266_v58 = vld [vmem:[#allocation6 + $0x1e0] ss:$8 sps:$4 sm:$0xff]   ;;  %v10271_v9 = vld [vmem:[#allocation6 + $0xd4] ss:$8 sps:$4 sm:$0xff]  }
 0x31d   :  { %3197 = vmatpush1.bf16.msra.mxu0 %v10233_v57  ;;  %3238 = vmatpush1.bf16.msra.mxu1 %v10236_v28  ;;  %v10274_v57 = vld [vmem:[#allocation6 + $0x1d4] ss:$8 sps:$4 sm:$0xff]   ;;  %v10269_v28 = vld [vmem:[#allocation6 + $0xd0] ss:$8 sps:$4 sm:$0xff]  }
 0x31e   :  { %3198 = vmatprep.subr.bf16.mxu0 %v10241_v56  ;;  %3239 = vmatprep.subr.bf16.mxu1 %v10244_v55  ;;  %v10272_v56 = vld [vmem:[#allocation6 + $0x1d0] ss:$8 sps:$4 sm:$0xff]   ;;  %v10277_v55 = vld [vmem:[#allocation6 + $0xc4] ss:$8 sps:$4 sm:$0xff]  }
 0x321   :  { %3199 = vmatpush1.bf16.msra.mxu0 %v10239_v62  ;;  %3240 = vmatpush1.bf16.msra.mxu1 %v10242_v4  ;;  %v10280_v62 = vld [vmem:[#allocation6 + $0x1c4] ss:$8 sps:$4 sm:$0xff]   ;;  %v10275_v4 = vld [vmem:[#allocation6 + $0xc0] ss:$8 sps:$4 sm:$0xff]  }
 0x322   :  { %3200 = vmatprep.subr.bf16.mxu0 %v10247_v50  ;;  %3241 = vmatprep.subr.bf16.mxu1 %v10250_v13  ;;  %v10278_v50 = vld [vmem:[#allocation6 + $0x1c0] ss:$8 sps:$4 sm:$0xff]   ;;  %v10283_v13 = vld [vmem:[#allocation6 + $0xb4] ss:$8 sps:$4 sm:$0xff]  }
 0x325   :  { %3201 = vmatpush1.bf16.msra.mxu0 %v10245_v40  ;;  %3242 = vmatpush1.bf16.msra.mxu1 %v10248_v21  ;;  %v10286_v40 = vld [vmem:[#allocation6 + $0x1b4] ss:$8 sps:$4 sm:$0xff]   ;;  %v10281_v21 = vld [vmem:[#allocation6 + $0xb0] ss:$8 sps:$4 sm:$0xff]  }
 0x326   :  { %3202 = vmatprep.subr.bf16.mxu0 %v10253_v2  ;;  %3243 = vmatprep.subr.bf16.mxu1 %v10256_v20  ;;  %v10284_v2 = vld [vmem:[#allocation6 + $0x1b0] ss:$8 sps:$4 sm:$0xff]   ;;  %v10289_v20 = vld [vmem:[#allocation6 + $0xa4] ss:$8 sps:$4 sm:$0xff]  }
 0x329   :  { %3203 = vmatpush1.bf16.msra.mxu0 %v10251_v22  ;;  %3244 = vmatpush1.bf16.msra.mxu1 %v10254_v48  ;;  %v10292_v22 = vld [vmem:[#allocation6 + $0x1a4] ss:$8 sps:$4 sm:$0xff]   ;;  %v10287_v48 = vld [vmem:[#allocation6 + $0xa0] ss:$8 sps:$4 sm:$0xff]  }
 0x32a   :  { %3204 = vmatprep.subr.bf16.mxu0 %v10259_v45  ;;  %3245 = vmatprep.subr.bf16.mxu1 %v10262_v15  ;;  %v10290_v45 = vld [vmem:[#allocation6 + $0x1a0] ss:$8 sps:$4 sm:$0xff]   ;;  %v10295_v15 = vld [vmem:[#allocation6 + $0x94] ss:$8 sps:$4 sm:$0xff]  }
 0x32d   :  { %3205 = vmatpush2.bf16.msra.mxu0 %v10257_v31  ;;  %3246 = vmatpush2.bf16.msra.mxu1 %v10260_v59  ;;  %v10298_v31 = vld [vmem:[#allocation6 + $0x194] ss:$8 sps:$4 sm:$0xff]   ;;  %v10293_v59 = vld [vmem:[#allocation6 + $0x90] ss:$8 sps:$4 sm:$0xff]  }
 0x32e   :  { %3206 = vmatprep.subr.bf16.mxu0 %v10265_v3  ;;  %3247 = vmatprep.subr.bf16.mxu1 %v10268_v5  ;;  %v10296_v3 = vld [vmem:[#allocation6 + $0x190] ss:$8 sps:$4 sm:$0xff]   ;;  %v10299_v5 = vld [vmem:[#allocation6 + $0x80] ss:$8 sps:$4 sm:$0xff]  }
 0x331   :  { %3207 = vmatpush2.bf16.msra.mxu0 %v10263_v61  ;;  %3248 = vmatpush2.bf16.msra.mxu1 %v10266_v58  ;;  %v10301_v61 = vld [vmem:[#allocation6 + $0x84] ss:$8 sps:$4 sm:$0xff]   ;;  %v10302_v58 = vld [vmem:[#allocation6 + $0x180] ss:$8 sps:$4 sm:$0xff]  }
 0x332   :  { %3208 = vmatprep.subr.bf16.mxu0 %v10271_v9  ;;  %3249 = vmatprep.subr.bf16.mxu1 %v10274_v57  ;;  %v10304_v9 = vld [vmem:[#allocation6 + $0x184] ss:$8 sps:$4 sm:$0xff]   ;;  %v3302_v57 = vand.u32 15, %v11449_v24 }
 0x334   :  { %vm3334_vm7 = vcmp.eq.s32.totalorder %v3302_v57, %v11463_v33  ;;  %v3301_v57 = vand.u32 15, %v11455_v26 }
 0x335   :  { %3209 = vmatpush2.bf16.msra.mxu0 %v10269_v28  ;;  %3250 = vmatpush2.bf16.msra.mxu1 %v10272_v56  ;;  %v11274_v28 = vmov 0.0625  }
 0x336   :  { %3210 = vmatprep.subr.bf16.mxu0 %v10277_v55  ;;  %3251 = vmatprep.subr.bf16.mxu1 %v10280_v62 }
 0x339   :  { %3211 = vmatpush2.bf16.msra.mxu0 %v10275_v4  ;;  %3252 = vmatpush2.bf16.msra.mxu1 %v10278_v50 }
 0x33a   :  { %3212 = vmatprep.subr.bf16.mxu0 %v10283_v13  ;;  %3253 = vmatprep.subr.bf16.mxu1 %v10286_v40 }
 0x33d   :  { %3213 = vmatpush2.bf16.msra.mxu0 %v10281_v21  ;;  %3254 = vmatpush2.bf16.msra.mxu1 %v10284_v2  ;;  %v2779_v21 = vstv %s2057_s3 }
 0x33e   :  { %3214 = vmatprep.subr.bf16.mxu0 %v10289_v20  ;;  %3255 = vmatprep.subr.bf16.mxu1 %v10292_v22 }
 0x341   :  { %3215 = vmatpush2.bf16.msra.mxu0 %v10287_v48  ;;  %3256 = vmatpush2.bf16.msra.mxu1 %v10290_v45 }
 0x342   :  { %3216 = vmatprep.subr.bf16.mxu0 %v10295_v15  ;;  %3257 = vmatprep.subr.bf16.mxu1 %v10298_v31 }
 0x345   :  { %3217 = vmatpush2.bf16.msra.mxu0 %v10293_v59  ;;  %3258 = vmatpush2.bf16.msra.mxu1 %v10296_v3 }
 0x346   :  { %3218 = vmatprep.subr.bf16.mxu0 %v10301_v61  ;;  %3259 = vmatprep.subr.bf16.mxu1 %v10304_v9 }
 0x349   :  { %3219 = vmatpush2.bf16.msra.mxu0 %v10299_v5  ;;  %3260 = vmatpush2.bf16.msra.mxu1 %v10302_v58 }
 0x34a   :  { %9619 = vmatprep.subr.msk.mxu0 %vm3334_vm7, %v11274_v28 }
 0x3cb   :  { %v2679_v56 = vpop.f32.mrf.mxu0  ;;  %v2756_v55 = vpop.f32.mrf.mxu1 }
 0x3cc   :  { %v2767_v50 = vmul.f32 %v2679_v56, %v12235_v14  ;;  %v2769_v13 = vmul.f32 %v2756_v55, %v12266_v32  ;;  %v3286_v32 = vand.u32 15, %v11452_v25 }
 0x3cd   :  { %v2681_v62 = vpop.f32.mrf.mxu0  ;;  %v2758_v4 = vpop.f32.mrf.mxu1 }
 0x3ce   :  { %v2768_v48 = vmul.f32 %v2681_v62, %v12225_v29  ;;  %v2770_v45 = vmul.f32 %v2758_v4, %v12264_v60  ;;  %v3285_v60 = vand.u32 15, %v11458_v27  ;;  %v3300_v4 = vand.u32 15, %v11461_v30 }
 0x3cf   :  { %v2685_v40 = vpop.f32.mrf.mxu0  ;;  %v2762_v2 = vpop.f32.mrf.mxu1  ;;  %vm3318_vm12 = vcmp.eq.s32.totalorder %v3286_v32, %v11463_v33  ;;  %v3293_v32 = vand.u32 15, %v11564_v10 }
 0x3d0   :  { %v2771_v20 = vadd.f32 %v2767_v50, %v2685_v40  ;;  %v2773_v22 = vadd.f32 %v2769_v13, %v2762_v2  ;;  %v3284_v40 = vand.u32 15, %v11468_v36  ;;  %v3299_v2 = vand.u32 15, %v11473_v49 }
 0x3d1   :  { %v2687_v15 = vpop.f32.mrf.mxu0  ;;  %v2764_v31 = vpop.f32.mrf.mxu1 }
 0x3d2   :  { %v2780_v59 = vmul.f32 %v2779_v21, %v2771_v20  ;;  %vm2775_vm7 = vcmp.ge.f32.partialorder %v2771_v20, 0.0  ;;  %v2782_v3 = vmul.f32 %v2779_v21, %v2773_v22  ;;  %v2772_v5 = vadd.f32 %v2768_v48, %v2687_v15 }
 0x3d3   :  { %v2774_v61 = vadd.f32 %v2770_v45, %v2764_v31  ;;  %vm2777_vm11 = vcmp.ge.f32.partialorder %v2773_v22, 0.0  ;;  %v3282_v48 = vand.u32 15, %v11483_v43  ;;  %vm3331_vm8 = vcmp.eq.s32.totalorder %v3299_v2, %v11463_v33 }
 0x3d4   :  { %vm2776_vm4 = vcmp.ge.f32.partialorder %v2772_v5, 0.0  ;;  %v2781_v14 = vmul.f32 %v2779_v21, %v2772_v5  ;;  %v2784_v58 = vsel %vm2775_vm7, %v2771_v20, %v2780_v59  ;;  %v2786_v29 = vsel %vm2777_vm11, %v2773_v22, %v2782_v3 }
 0x3d5   :  { %vm2778_vm15 = vcmp.ge.f32.partialorder %v2774_v61, 0.0  ;;  %v2783_v9 = vmul.f32 %v2779_v21, %v2774_v61  ;;  %v12336_v50 = vpack.c.bf16 %v2784_v58, %v2784_v58  ;;  %v12342_v21 = vpack.c.bf16 %v2786_v29, %v2786_v29 }
 0x3d6   :  { %v2785_v56 = vsel %vm2776_vm4, %v2772_v5, %v2781_v14  ;;  %vm3333_vm4 = vcmp.eq.s32.totalorder %v3301_v57, %v11463_v33  ;;  %vm3317_vm11 = vcmp.eq.s32.totalorder %v3285_v60, %v11463_v33  ;;  %v3283_v20 = vand.u32 15, %v11477_v41  ;;  %v13688_v60 = vld [vmem:[#allocation31_spill] sm:$0xff] }
 0x3d7   :  { %v12333_v55 = vpack.c.bf16 %v2785_v56, %v2785_v56  ;;  %v2787_v62 = vsel %vm2778_vm15, %v2774_v61, %v2783_v9  ;;  %vm3332_vm15 = vcmp.eq.s32.totalorder %v3300_v4, %v11463_v33  ;;  %v3298_v22 = vand.u32 15, %v11480_v42 }
 0x3d8   :  { %v12338_v13 = vpack.c.bf16 %v2787_v62, %v2787_v62  ;;  %vm3316_vm7 = vcmp.eq.s32.totalorder %v3284_v40, %v11463_v33  ;;  %v3297_v45 = vand.u32 15, %v11486_v44  ;;  %v3281_v15 = vand.u32 15, %v11489_v37 }
 0x3d9   :  { %3220 = vmatprep.mubr.bf16.mxu0 %v12333_v55  ;;  %v3296_v31 = vand.u32 15, %v11498_v46  ;;  %v3280_v59 = vand.u32 15, %v11501_v47  ;;  %v3295_v3 = vand.u32 15, %v11510_v51  ;;  %v3279_v5 = vand.u32 15, %v11513_v53 }
 0x3da   :  { %3261 = vmatprep.mubr.bf16.mxu1 %v12338_v13  ;;  %3221 = vmatmul.mubr.bf16.vlgmr.msra.gmra.mxu0 %v12336_v50  ;;  %v3294_v61 = vand.u32 15, %v11543_v1  ;;  %v3278_v14 = vand.u32 15, %v11556_v6  ;;  %v3277_v58 = vand.u32 15, %v11567_v11  ;;  %v3292_v9 = vand.u32 15, %v11570_v12 }
 0x3db   :  { %3262 = vmatmul.mubr.bf16.vlgmr.msra.gmra.mxu1 %v12342_v21  ;;  %9620 = vmatpush3.msk.msra.mxu0 %vm3318_vm12, %v11274_v28  ;;  %vm3315_vm12 = vcmp.eq.s32.totalorder %v3283_v20, %v11463_v33  ;;  %v3276_v57 = vand.u32 15, %v11584_v16  ;;  %v3291_v29 = vand.u32 15, %v11587_v17  ;;  %v3275_v56 = vand.u32 15, %v11590_v18 }
 0x3dc   :  { %9621 = vmatprep.subr.msk.mxu0 %vm3333_vm4, %v11274_v28  ;;  %3581 = vmatprep.mubr.f32.mxu1 %v13687_v54  ;;  %vm3330_vm4 = vcmp.eq.s32.totalorder %v3298_v22, %v11463_v33  ;;  %v3290_v62 = vand.u32 15, %v13688_v60  ;;  %v3274_v4 = vand.u32 15, %v11664_v63  ;;  %v3289_v40 = vand.u32 15, %v11667_v0 }
 0x3dd   :  { %9622 = vmatpush3.msk.msra.mxu0 %vm3317_vm11, %v11274_v28  ;;  %vm3314_vm11 = vcmp.eq.s32.totalorder %v3282_v48, %v11463_v33  ;;  %vm3308_vm10 = vcmp.eq.s32.totalorder %v3276_v57, %v11463_v33  ;;  %v3273_v2 = vand.u32 15, %v11731_v23  ;;  %v3288_v20 = vand.u32 15, %v11848_v38 }
 0x3de   :  { %9623 = vmatprep.subr.msk.mxu0 %vm3332_vm15, %v11274_v28  ;;  %vm3329_vm15 = vcmp.eq.s32.totalorder %v3297_v45, %v11463_v33  ;;  %v3272_v22 = vand.u32 15, %v11884_v8  ;;  %v3287_v48 = vand.u32 15, %v11920_v35  ;;  %v3271_v45 = vand.u32 15, %v11446_v19 }
 0x3df   :  { %9624 = vmatpush3.msk.msra.mxu0 %vm3316_vm7, %v11274_v28  ;;  %vm3313_vm7 = vcmp.eq.s32.totalorder %v3281_v15, %v11463_v33  ;;  %v2856_v15 = vld [vmem:[%s13260_s5] sm:$0x3]  ;;  %s8840_s5 = sld [smem:[#allocation2 + $0x1]] }
 0x3e0   :  { %9625 = vmatprep.subr.msk.mxu0 %vm3331_vm8, %v11274_v28  ;;  %vm3328_vm8 = vcmp.eq.s32.totalorder %v3296_v31, %v11463_v33  ;;  %v2861_v31 = vrot.slane %v2856_v15, %v12135_v39 }
 0x3e1   :  { %9626 = vmatpush3.msk.msra.mxu0 %vm3315_vm12, %v11274_v28  ;;  %vm3312_vm12 = vcmp.eq.s32.totalorder %v3280_v59, %v11463_v33  ;;  %v2865_v59 = vrot.slane %v2856_v15, %v12138_v7  ;;  %v10308_v15 = vld [vmem:[#allocation8 + $0xe8] ss:$16 sps:$4 sm:$0xff]  }
 0x3e2   :  { %9627 = vmatprep.subr.msk.mxu0 %vm3330_vm4, %v11274_v28  ;;  %vm3327_vm4 = vcmp.eq.s32.totalorder %v3295_v3, %v11463_v33 }
 0x3e3   :  { %9628 = vmatpush3.msk.msra.mxu0 %vm3314_vm11, %v11274_v28  ;;  %vm3311_vm11 = vcmp.eq.s32.totalorder %v3279_v5, %v11463_v33 }
 0x3e4   :  { %9629 = vmatprep.subr.msk.mxu0 %vm3329_vm15, %v11274_v28  ;;  %vm3326_vm15 = vcmp.eq.s32.totalorder %v3294_v61, %v11463_v33 }
 0x3e5   :  { %9630 = vmatpush3.msk.msra.mxu0 %vm3313_vm7, %v11274_v28  ;;  %vm3310_vm7 = vcmp.eq.s32.totalorder %v3278_v14, %v11463_v33 }
 0x3e6   :  { %9631 = vmatprep.subr.msk.mxu0 %vm3328_vm8, %v11274_v28  ;;  %vm3325_vm8 = vcmp.eq.s32.totalorder %v3293_v32, %v11463_v33 }
 0x3e7   :  { %9632 = vmatpush3.msk.msra.mxu0 %vm3312_vm12, %v11274_v28  ;;  %vm3309_vm12 = vcmp.eq.s32.totalorder %v3277_v58, %v11463_v33 }
 0x3e8   :  { %9633 = vmatprep.subr.msk.mxu0 %vm3327_vm4, %v11274_v28  ;;  %vm3324_vm4 = vcmp.eq.s32.totalorder %v3292_v9, %v11463_v33 }
 0x3e9   :  { %9634 = vmatpush3.msk.msra.mxu0 %vm3311_vm11, %v11274_v28  ;;  %vm3323_vm11 = vcmp.eq.s32.totalorder %v3291_v29, %v11463_v33 }
 0x3ea   :  { %9635 = vmatprep.subr.msk.mxu0 %vm3326_vm15, %v11274_v28  ;;  %vm3307_vm15 = vcmp.eq.s32.totalorder %v3275_v56, %v11463_v33 }
 0x3eb   :  { %9636 = vmatpush3.msk.msra.mxu0 %vm3310_vm7, %v11274_v28  ;;  %vm3322_vm7 = vcmp.eq.s32.totalorder %v3290_v62, %v11463_v33 }
 0x3ec   :  { %9637 = vmatprep.subr.msk.mxu0 %vm3325_vm8, %v11274_v28  ;;  %vm3306_vm8 = vcmp.eq.s32.totalorder %v3274_v4, %v11463_v33 }
 0x3ed   :  { %9638 = vmatpush3.msk.msra.mxu0 %vm3309_vm12, %v11274_v28  ;;  %vm3305_vm12 = vcmp.eq.s32.totalorder %v3273_v2, %v11463_v33 }
 0x3ee   :  { %9639 = vmatprep.subr.msk.mxu0 %vm3324_vm4, %v11274_v28  ;;  %vm3320_vm4 = vcmp.eq.s32.totalorder %v3288_v20, %v11463_v33  ;;  %v3368_v20 = vand.u32 15, %v12275_v34 }
 0x3ef   :  { %9640 = vmatpush3.msk.msra.mxu0 %vm3308_vm10, %v11274_v28  ;;  %vm3321_vm10 = vcmp.eq.s32.totalorder %v3289_v40, %v11463_v33 }
 0x3f0   :  { %9641 = vmatprep.subr.msk.mxu0 %vm3323_vm11, %v11274_v28  ;;  %vm3304_vm11 = vcmp.eq.s32.totalorder %v3272_v22, %v11463_v33  ;;  %v3367_v22 = vand.u32 15, %v11463_v33 }
 0x3f1   :  { %9642 = vmatpush3.msk.msra.mxu0 %vm3307_vm15, %v11274_v28  ;;  %vm3319_vm15 = vcmp.eq.s32.totalorder %v3287_v48, %v11463_v33  ;;  %v13689_v48 = vmov 1.0  }
 0x3f2   :  { %9643 = vmatprep.subr.msk.mxu0 %vm3322_vm7, %v11274_v28  ;;  %vm3303_vm7 = vcmp.eq.s32.totalorder %v3271_v45, %v11463_v33  ;;  %v10307_v45 = vld [vmem:[#allocation8 + $0xe4] ss:$16 sps:$4 sm:$0xff]  }
 0x3f3   :  { %9644 = vmatpush3.msk.msra.mxu0 %vm3306_vm8, %v11274_v28  ;;  %vm3372_vm8 = vcmp.eq.s32.totalorder %v11884_v8, %v3368_v20 }
 0x3f4   :  { %9645 = vmatprep.subr.msk.mxu0 %vm3321_vm10, %v11274_v28  ;;  %vm3371_vm10 = vcmp.eq.s32.totalorder %v11884_v8, %v3367_v22  ;;  %8873 = vmatprep.subr.msk.mxu1 %vm3372_vm8, %v13689_v48 }
 0x3f5   :  { %9646 = vmatpush3.msk.msra.mxu0 %vm3305_vm12, %v11274_v28  ;;  %vm3370_vm12 = vcmp.eq.s32.totalorder %v11446_v19, %v3368_v20  ;;  %8874 = vmatpush1.msk.msra.mxu1 %vm3371_vm10, %v13689_v48  ;;  %v10350_v20 = vld [vmem:[#allocation8 + $0x8] ss:$16 sps:$4 sm:$0xff]  }
 0x3f6   :  { %9647 = vmatprep.subr.msk.mxu0 %vm3320_vm4, %v11274_v28  ;;  %vm3369_vm4 = vcmp.eq.s32.totalorder %v11446_v19, %v3367_v22  ;;  %8875 = vmatprep.subr.msk.mxu1 %vm3370_vm12, %v13689_v48  ;;  %v10358_v22 = vld [vmem:[#allocation8 + $0x1ec] ss:$16 sps:$4 sm:$0xff]  }
 0x3f7   :  { %9648 = vmatpush3.msk.msra.mxu0 %vm3304_vm11, %v11274_v28  ;;  %8876 = vmatpush1.msk.msra.mxu1 %vm3369_vm4, %v13689_v48 }
 0x3f8   :  { %9649 = vmatprep.subr.msk.mxu0 %vm3319_vm15, %v11274_v28  ;;  %4013 = vmatprep.subr.bf16.mxu1 %v10307_v45  ;;  %v10356_v45 = vld [vmem:[#allocation8 + $0x1e8] ss:$16 sps:$4 sm:$0xff]  }
 0x3f9   :  { %9650 = vmatpush3.msk.msra.mxu0 %vm3303_vm7, %v11274_v28 }
 0x49a   :  { %v3222_v3 = vpop.f32.mrf.mxu0 }
 0x49b   :  { %v3263_v5 = vpop.f32.mrf.mxu1  ;;  %v3223_v61 = vadd.f32 %v3222_v3, %v2861_v31  ;;  %v10310_v31 = vld [vmem:[#allocation8 + $0xec] ss:$16 sps:$4 sm:$0xff]   ;;  %v10314_v3 = vld [vmem:[#allocation8 + $0xc8] ss:$16 sps:$4 sm:$0xff]  }
 0x49c   :  { %v3224_v14 = vpop.f32.mrf.mxu0  ;;  %4054 = vmatprep.subr.bf16.mxu0 %v10310_v31  ;;  %v10362_v31 = vld [vmem:[#allocation8 + $0x1c8] ss:$16 sps:$4 sm:$0xff]  }
 0x49d   :  { %v3225_v32 = vadd.f32 %v3224_v14, %v2865_v59  ;;  %v3265_v58 = vpop.f32.mrf.mxu1  ;;  %v12443_v56 = vadd.f32 %v3263_v5, %v3223_v61  ;;  %v10316_v59 = vld [vmem:[#allocation8 + $0xcc] ss:$16 sps:$4 sm:$0xff]   ;;  %v10320_v61 = vld [vmem:[#allocation8 + $0xa8] ss:$16 sps:$4 sm:$0xff]  }
 0x49e   :  { %v3226_v9 = vpop.f32.mrf.mxu0  ;;  %v10322_v5 = vld [vmem:[#allocation8 + $0xac] ss:$16 sps:$4 sm:$0xff]  }
 0x49f   :  { %v12441_v57 = vadd.f32 %v3265_v58, %v3225_v32  ;;  %v3267_v29 = vpop.f32.mrf.mxu1  ;;  %v3433_v2 = vmul.f32 %v12443_v56, %v12443_v56  ;;  %v10328_v14 = vld [vmem:[#allocation8 + $0x8c] ss:$16 sps:$4 sm:$0xff]   ;;  %v10326_v32 = vld [vmem:[#allocation8 + $0x88] ss:$16 sps:$4 sm:$0xff]  }
 0x4a0   :  { %v3227_v62 = vpop.f32.mrf.mxu0  ;;  %v10334_v58 = vld [vmem:[#allocation8 + $0x6c] ss:$16 sps:$4 sm:$0xff]   ;;  %v10332_v9 = vld [vmem:[#allocation8 + $0x68] ss:$16 sps:$4 sm:$0xff]  }
 0x4a1   :  { %v3268_v4 = vpop.f32.mrf.mxu1  ;;  %3499 = vmatprep.mubr.f32.mxu0 %v12441_v57  ;;  %v3434_v40 = vmul.f32 %v12441_v57, %v12441_v57  ;;  %v10340_v29 = vld [vmem:[#allocation8 + $0x4c] ss:$16 sps:$4 sm:$0xff]   ;;  %v10338_v62 = vld [vmem:[#allocation8 + $0x48] ss:$16 sps:$4 sm:$0xff]  }
 0x4a2   :  { %3500 = vmatmul.mubr.f32.vlgmr.msra.gmra.mxu0 %v12443_v56  ;;  %v10346_v4 = vld [vmem:[#allocation8 + $0x2c] ss:$16 sps:$4 sm:$0xff]  }
 0x4a3   :  { %3504 = vmatprep.mubr.f32.mxu0 %v3434_v40  ;;  %4055 = vmatpush1.bf16.msra.mxu0 %v10308_v15  ;;  %v10344_v40 = vld [vmem:[#allocation8 + $0x28] ss:$16 sps:$4 sm:$0xff]   ;;  %v10364_v15 = vld [vmem:[#allocation8 + $0x1cc] ss:$16 sps:$4 sm:$0xff]  }
 0x4a4   :  { %4056 = vmatprep.subr.bf16.mxu0 %v10316_v59  ;;  %v10370_v59 = vld [vmem:[#allocation8 + $0x1ac] ss:$16 sps:$4 sm:$0xff]  }
 0x4a6   :  { %3505 = vmatmul.mubr.f32.gmra.mxu0 %v3433_v2  ;;  %v10352_v2 = vld [vmem:[#allocation8 + $0xc] ss:$16 sps:$4 sm:$0xff]  }
 0x4a7   :  { %4057 = vmatpush1.bf16.msra.mxu0 %v10314_v3  ;;  %v10368_v3 = vld [vmem:[#allocation8 + $0x1a8] ss:$16 sps:$4 sm:$0xff]  }
 0x4a8   :  { %4058 = vmatprep.subr.bf16.mxu0 %v10322_v5  ;;  %v10376_v5 = vld [vmem:[#allocation8 + $0x18c] ss:$16 sps:$4 sm:$0xff]  }
 0x4ab   :  { %4059 = vmatpush1.bf16.msra.mxu0 %v10320_v61  ;;  %v10374_v61 = vld [vmem:[#allocation8 + $0x188] ss:$16 sps:$4 sm:$0xff]  }
 0x4ac   :  { %4060 = vmatprep.subr.bf16.mxu0 %v10328_v14  ;;  %v10382_v14 = vld [vmem:[#allocation8 + $0x16c] ss:$16 sps:$4 sm:$0xff]  }
 0x4af   :  { %4061 = vmatpush1.bf16.msra.mxu0 %v10326_v32  ;;  %v10380_v32 = vld [vmem:[#allocation8 + $0x168] ss:$16 sps:$4 sm:$0xff]  }
 0x4b0   :  { %4062 = vmatprep.subr.bf16.mxu0 %v10334_v58 }
 0x4b3   :  { %4063 = vmatpush1.bf16.msra.mxu0 %v10332_v9 }
 0x4b4   :  { %4064 = vmatprep.subr.bf16.mxu0 %v10340_v29 }
 0x4b7   :  { %4065 = vmatpush1.bf16.msra.mxu0 %v10338_v62 }
 0x4b8   :  { %4066 = vmatprep.subr.bf16.mxu0 %v10346_v4 }
 0x4bb   :  { %4067 = vmatpush1.bf16.msra.mxu0 %v10344_v40 }
 0x4bc   :  { %4068 = vmatprep.subr.bf16.mxu0 %v10352_v2 }
 0x4bf   :  { %4069 = vmatpush1.bf16.msra.mxu0 %v10350_v20 }
 0x4c0   :  { %4070 = vmatprep.subr.bf16.mxu0 %v10358_v22 }
 0x4c3   :  { %4071 = vmatpush2.bf16.msra.mxu0 %v10356_v45 }
 0x4c4   :  { %4072 = vmatprep.subr.bf16.mxu0 %v10364_v15  ;;  %v10305_v15 = vld [vmem:[#allocation8 + $0xe0] ss:$16 sps:$4 sm:$0xff]  }
 0x4c7   :  { %4073 = vmatpush2.bf16.msra.mxu0 %v10362_v31  ;;  %v10313_v31 = vld [vmem:[#allocation8 + $0xc4] ss:$16 sps:$4 sm:$0xff]  }
 0x4c8   :  { %4074 = vmatprep.subr.bf16.mxu0 %v10370_v59 }
 0x4cb   :  { %4075 = vmatpush2.bf16.msra.mxu0 %v10368_v3 }
 0x4cc   :  { %4076 = vmatprep.subr.bf16.mxu0 %v10376_v5  ;;  %v10311_v5 = vld [vmem:[#allocation8 + $0xc0] ss:$16 sps:$4 sm:$0xff]  }
 0x4cf   :  { %4077 = vmatpush2.bf16.msra.mxu0 %v10374_v61 }
 0x4d0   :  { %4078 = vmatprep.subr.bf16.mxu0 %v10382_v14  ;;  %v10319_v14 = vld [vmem:[#allocation8 + $0xa4] ss:$16 sps:$4 sm:$0xff]  }
 0x4d3   :  { %4079 = vmatpush2.bf16.msra.mxu0 %v10380_v32  ;;  %v10317_v32 = vld [vmem:[#allocation8 + $0xa0] ss:$16 sps:$4 sm:$0xff]  }
 0x562   :  { %v9651_v58 = vpop.f32.mrf.mxu0 }
 0x564   :  { %v9652_v9 = vpop.f32.mrf.mxu0 }
 0x565   :  { %v9653_v29 = vadd.f32 %v9652_v9, %v9651_v58  ;;  %v10325_v58 = vld [vmem:[#allocation8 + $0x84] ss:$16 sps:$4 sm:$0xff]   ;;  %v10323_v9 = vld [vmem:[#allocation8 + $0x80] ss:$16 sps:$4 sm:$0xff]  }
 0x566   :  { %v9654_v62 = vpop.f32.mrf.mxu0 }
 0x567   :  { %v3510_v40 = vmul.f32 %v9653_v29, %v9653_v29  ;;  %v3515_v3 = vsub.f32 0.0, %v9653_v29  ;;  %v10337_v29 = vld [vmem:[#allocation8 + $0x44] ss:$16 sps:$4 sm:$0xff]  }
 0x568   :  { %v9655_v4 = vpop.f32.mrf.mxu0 }
 0x569   :  { %v9656_v2 = vadd.f32 %v9655_v4, %v9654_v62  ;;  %v10331_v62 = vld [vmem:[#allocation8 + $0x64] ss:$16 sps:$4 sm:$0xff]   ;;  %v10329_v4 = vld [vmem:[#allocation8 + $0x60] ss:$16 sps:$4 sm:$0xff]  }
 0x56b   :  { %v3511_v20 = vsub.f32 %v9656_v2, %v3510_v40  ;;  %v10335_v40 = vld [vmem:[#allocation8 + $0x40] ss:$16 sps:$4 sm:$0xff]   ;;  %v10343_v2 = vld [vmem:[#allocation8 + $0x24] ss:$16 sps:$4 sm:$0xff]  }
 0x56d   :  { %v3512_v22 = vmax.f32 %v3511_v20, 0.0  ;;  %v10341_v20 = vld [vmem:[#allocation8 + $0x20] ss:$16 sps:$4 sm:$0xff]  }
 0x56f   :  { %v3513_v45 = vadd.f32 1e-05, %v3512_v22  ;;  %v10349_v22 = vld [vmem:[#allocation8 + $0x4] ss:$16 sps:$4 sm:$0xff]  }
 0x571   :  { %11075 = vrsqrt.f32 %v3513_v45  ;;  %v10347_v45 = vld [vmem:[#allocation8] ss:$16 sps:$4 sm:$0xff]  }
 0x57e   :  { %v11076_v59 = vpop.eup %11075 }
 0x57f   :  { %3582 = vmatmul.mubr.f32.vlgmr.msra.gmra.mxu1 %v11076_v59  ;;  %v3516_v61 = vmul.f32 %v11076_v59, %v3515_v3  ;;  %v10361_v59 = vld [vmem:[#allocation8 + $0x1c4] ss:$16 sps:$4 sm:$0xff]   ;;  %v10359_v3 = vld [vmem:[#allocation8 + $0x1c0] ss:$16 sps:$4 sm:$0xff]  }
 0x580   :  { %3587 = vmatprep.mubr.f32.mxu1 %v13687_v54  ;;  %4014 = vmatpush1.bf16.msra.mxu1 %v10305_v15  ;;  %v10355_v15 = vld [vmem:[#allocation8 + $0x1e4] ss:$16 sps:$4 sm:$0xff]  }
 0x581   :  { %4015 = vmatprep.subr.bf16.mxu1 %v10313_v31  ;;  %v10353_v31 = vld [vmem:[#allocation8 + $0x1e0] ss:$16 sps:$4 sm:$0xff]  }
 0x583   :  { %3588 = vmatmul.mubr.f32.gmra.mxu1 %v3516_v61  ;;  %v10365_v61 = vld [vmem:[#allocation8 + $0x1a0] ss:$16 sps:$4 sm:$0xff]  }
 0x584   :  { %4016 = vmatpush1.bf16.msra.mxu1 %v10311_v5  ;;  %v10367_v5 = vld [vmem:[#allocation8 + $0x1a4] ss:$16 sps:$4 sm:$0xff]  }
 0x585   :  { %4017 = vmatprep.subr.bf16.mxu1 %v10319_v14  ;;  %v10373_v14 = vld [vmem:[#allocation8 + $0x184] ss:$16 sps:$4 sm:$0xff]  }
 0x588   :  { %4018 = vmatpush1.bf16.msra.mxu1 %v10317_v32  ;;  %v10371_v32 = vld [vmem:[#allocation8 + $0x180] ss:$16 sps:$4 sm:$0xff]  }
 0x589   :  { %4019 = vmatprep.subr.bf16.mxu1 %v10325_v58  ;;  %v10379_v58 = vld [vmem:[#allocation8 + $0x164] ss:$16 sps:$4 sm:$0xff]  }
 0x58c   :  { %4020 = vmatpush1.bf16.msra.mxu1 %v10323_v9  ;;  %v10377_v9 = vld [vmem:[#allocation8 + $0x160] ss:$16 sps:$4 sm:$0xff]  }
 0x58d   :  { %4021 = vmatprep.subr.bf16.mxu1 %v10331_v62  ;;  %v10385_v62 = vld [vmem:[#allocation8 + $0x144] ss:$16 sps:$4 sm:$0xff]  }
 0x590   :  { %4022 = vmatpush1.bf16.msra.mxu1 %v10329_v4  ;;  %v10388_v4 = vld [vmem:[#allocation8 + $0x14c] ss:$16 sps:$4 sm:$0xff]  }
 0x591   :  { %4023 = vmatprep.subr.bf16.mxu1 %v10337_v29  ;;  %v10383_v29 = vld [vmem:[#allocation8 + $0x140] ss:$16 sps:$4 sm:$0xff]   ;;  %4080 = vmatprep.subr.bf16.mxu0 %v10388_v4 }
 0x594   :  { %4024 = vmatpush1.bf16.msra.mxu1 %v10335_v40  ;;  %v10386_v40 = vld [vmem:[#allocation8 + $0x148] ss:$16 sps:$4 sm:$0xff]  }
 0x595   :  { %4025 = vmatprep.subr.bf16.mxu1 %v10343_v2  ;;  %4081 = vmatpush2.bf16.msra.mxu0 %v10386_v40  ;;  %v10391_v2 = vld [vmem:[#allocation8 + $0x124] ss:$16 sps:$4 sm:$0xff]  }
 0x598   :  { %4026 = vmatpush1.bf16.msra.mxu1 %v10341_v20  ;;  %v10394_v20 = vld [vmem:[#allocation8 + $0x12c] ss:$16 sps:$4 sm:$0xff]  }
 0x599   :  { %4027 = vmatprep.subr.bf16.mxu1 %v10349_v22  ;;  %v10389_v22 = vld [vmem:[#allocation8 + $0x120] ss:$16 sps:$4 sm:$0xff]   ;;  %4082 = vmatprep.subr.bf16.mxu0 %v10394_v20 }
 0x59c   :  { %4028 = vmatpush1.bf16.msra.mxu1 %v10347_v45  ;;  %v10392_v45 = vld [vmem:[#allocation8 + $0x128] ss:$16 sps:$4 sm:$0xff]  }
 0x59d   :  { %4029 = vmatprep.subr.bf16.mxu1 %v10355_v15  ;;  %4083 = vmatpush2.bf16.msra.mxu0 %v10392_v45  ;;  %v10397_v15 = vld [vmem:[#allocation8 + $0x104] ss:$16 sps:$4 sm:$0xff]  }
 0x5a0   :  { %4030 = vmatpush2.bf16.msra.mxu1 %v10353_v31  ;;  %v10400_v31 = vld [vmem:[#allocation8 + $0x10c] ss:$16 sps:$4 sm:$0xff]  }
 0x5a1   :  { %4031 = vmatprep.subr.bf16.mxu1 %v10361_v59  ;;  %v10395_v59 = vld [vmem:[#allocation8 + $0x100] ss:$16 sps:$4 sm:$0xff]   ;;  %4084 = vmatprep.subr.bf16.mxu0 %v10400_v31  ;;  %v4126_v31 = vand.u32 31, %v11455_v26  ;;  %v13794_v26 = vld [vmem:[#allocation107_spill] sm:$0xff] }
 0x5a3   :  { %vm12497_vm4 = vcmp.eq.s32.totalorder %v4126_v31, %v11463_v33 }
 0x5a4   :  { %4032 = vmatpush2.bf16.msra.mxu1 %v10359_v3  ;;  %v10398_v3 = vld [vmem:[#allocation8 + $0x108] ss:$16 sps:$4 sm:$0xff]  }
 0x5a5   :  { %4033 = vmatprep.subr.bf16.mxu1 %v10367_v5  ;;  %4085 = vmatpush2.bf16.msra.mxu0 %v10398_v3  ;;  %v4127_v5 = vand.u32 31, %v11449_v24 }
 0x5a7   :  { %vm4191_vm11 = vcmp.eq.s32.totalorder %v4127_v5, %v11463_v33  ;;  %v4110_v5 = vand.u32 31, %v11458_v27  ;;  %v4109_v27 = vand.u32 31, %v11468_v36 }
 0x5a8   :  { %4034 = vmatpush2.bf16.msra.mxu1 %v10365_v61  ;;  %v4159_v61 = vand.u32 31, %v11678_v52 }
 0x5a9   :  { %4035 = vmatprep.subr.bf16.mxu1 %v10373_v14 }
 0x5aa   :  { %vm4223_vm15 = vcmp.eq.s32.totalorder %v4159_v61, %v11463_v33 }
 0x5ab   :  { %9695 = vmatprep.subr.msk.mxu0 %vm4223_vm15, %v11274_v28  ;;  %vm12511_vm15 = vcmp.eq.s32.totalorder %v4110_v5, %v11463_v33 }
 0x5ac   :  { %4036 = vmatpush2.bf16.msra.mxu1 %v10371_v32 }
 0x5ad   :  { %4037 = vmatprep.subr.bf16.mxu1 %v10379_v58 }
 0x5b0   :  { %4038 = vmatpush2.bf16.msra.mxu1 %v10377_v9 }
 0x5b1   :  { %4039 = vmatprep.subr.bf16.mxu1 %v10385_v62  ;;  %v3600_v62 = vstv %s8840_s5 }
 0x5b4   :  { %4040 = vmatpush2.bf16.msra.mxu1 %v10383_v29 }
 0x5b5   :  { %4041 = vmatprep.subr.bf16.mxu1 %v10391_v2  ;;  %v4111_v2 = vand.u32 31, %v11452_v25  ;;  %v4125_v25 = vand.u32 31, %v11461_v30  ;;  %v13768_v30 = vld [vmem:[#allocation77_spill] sm:$0xff] }
 0x5b7   :  { %vm12479_vm10 = vcmp.eq.s32.totalorder %v4111_v2, %v11463_v33 }
 0x5b8   :  { %4042 = vmatpush2.bf16.msra.mxu1 %v10389_v22  ;;  %v13690_v22 = vld [vmem:[#allocation39_spill] sm:$0xff] }
 0x5b9   :  { %4043 = vmatprep.subr.bf16.mxu1 %v10397_v15  ;;  %v4143_v45 = vand.u32 31, %v13690_v22  ;;  %v4108_v22 = vand.u32 31, %v11477_v41  ;;  %v4123_v41 = vand.u32 31, %v11480_v42  ;;  %v4107_v42 = vand.u32 31, %v11483_v43 }
 0x5ba   :  { %v4122_v43 = vand.u32 31, %v11486_v44  ;;  %v4106_v44 = vand.u32 31, %v11489_v37  ;;  %v4121_v37 = vand.u32 31, %v11498_v46  ;;  %v4105_v46 = vand.u32 31, %v11501_v47 }
 0x5bb   :  { %vm12488_vm12 = vcmp.eq.s32.totalorder %v4143_v45, %v11463_v33  ;;  %v13708_v45 = vld [vmem:[#allocation46_spill] sm:$0xff]  ;;  %v4120_v47 = vand.u32 31, %v11510_v51  ;;  %v4104_v51 = vand.u32 31, %v11513_v53  ;;  %v4119_v53 = vand.u32 31, %v11543_v1 }
 0x5bc   :  { %4044 = vmatpush2.bf16.msra.mxu1 %v10395_v59  ;;  %v13691_v59 = vld [vmem:[#allocation40_spill] sm:$0xff]  ;;  %v4103_v1 = vand.u32 31, %v11556_v6  ;;  %v4118_v6 = vand.u32 31, %v11564_v10  ;;  %v4102_v10 = vand.u32 31, %v11567_v11  ;;  %v4117_v11 = vand.u32 31, %v11570_v12 }
 0x5bd   :  { %9657 = vmatprep.subr.msk.mxu1 %vm4191_vm11, %v11274_v28  ;;  %v4101_v12 = vand.u32 31, %v11584_v16  ;;  %v4116_v16 = vand.u32 31, %v11587_v17  ;;  %v4100_v17 = vand.u32 31, %v11590_v18  ;;  %v4099_v18 = vand.u32 31, %v11664_v63 }
 0x5bf   :  { %vm4164_vm6 = vcmp.eq.s32.totalorder %v4100_v17, %v11463_v33 }
 0x63f   :  { %v3583_v14 = vpop.f32.mrf.mxu1 }
 0x640   :  { %v3594_v58 = vmul.f32 %v3583_v14, %v12443_v56  ;;  %v4158_v56 = vand.u32 31, %v13691_v59  ;;  %v13713_v59 = vld [vmem:[#allocation55_spill] sm:$0xff] }
 0x641   :  { %v3585_v32 = vpop.f32.mrf.mxu1 }
 0x642   :  { %v3595_v4 = vmul.f32 %v3585_v32, %v12441_v57  ;;  %v13692_v57 = vld [vmem:[#allocation41_spill] sm:$0xff]  ;;  %vm12502_vm11 = vcmp.eq.s32.totalorder %v4158_v56, %v11463_v33  ;;  %v4155_v56 = vand.u32 31, %v13713_v59  ;;  %v13788_v59 = vld [vmem:[#allocation86_spill] sm:$0xff]  ;;  %v4098_v32 = vand.u32 31, %v11731_v23 }
 0x643   :  { %v3589_v9 = vpop.f32.mrf.mxu1  ;;  %v4142_v61 = vand.u32 31, %v13692_v57  ;;  %v13718_v57 = vld [vmem:[#allocation58_spill] sm:$0xff] }
 0x644   :  { %v3596_v24 = vadd.f32 %v3594_v58, %v3589_v9  ;;  %v13695_v58 = vld [vmem:[#allocation43_spill] sm:$0xff] }
 0x645   :  { %v3591_v29 = vpop.f32.mrf.mxu1  ;;  %v4157_v9 = vand.u32 31, %v13695_v58  ;;  %v13723_v58 = vld [vmem:[#allocation59_spill] sm:$0xff] }
 0x646   :  { %vm3598_vm7 = vcmp.ge.f32.partialorder %v3596_v24, 0.0  ;;  %v3601_v52 = vmul.f32 %v3600_v62, %v3596_v24  ;;  %v3597_v40 = vadd.f32 %v3595_v4, %v3591_v29  ;;  %v13698_v4 = vld [vmem:[#allocation44_spill] sm:$0xff]  ;;  %v4134_v29 = vand.u32 31, %v13768_v30 }
 0x647   :  { %vm12534_vm9 = vcmp.eq.s32.totalorder %v4157_v9, %v11463_v33  ;;  %v4154_v9 = vand.u32 31, %v13723_v58 }
 0x648   :  { %vm3599_vm8 = vcmp.ge.f32.partialorder %v3597_v40, 0.0  ;;  %v3602_v20 = vmul.f32 %v3600_v62, %v3597_v40  ;;  %v3603_v15 = vsel %vm3598_vm7, %v3596_v24, %v3601_v52  ;;  %v4141_v24 = vand.u32 31, %v13698_v4  ;;  %v13728_v4 = vld [vmem:[#allocation60_spill] sm:$0xff] }
 0x649   :  { %v12485_v62 = vpack.c.bf16 %v3603_v15, %v3603_v15  ;;  %v4124_v52 = vand.u32 31, %v11473_v49  ;;  %vm12516_vm7 = vcmp.eq.s32.totalorder %v4142_v61, %v11463_v33  ;;  %v4140_v49 = vand.u32 31, %v13708_v45  ;;  %v13743_v15 = vld [vmem:[#allocation66_spill] sm:$0xff] }
 0x64a   :  { %v3604_v3 = vsel %vm3599_vm8, %v3597_v40, %v3602_v20  ;;  %v13703_v40 = vld [vmem:[#allocation45_spill] sm:$0xff]  ;;  %vm12529_vm8 = vcmp.eq.s32.totalorder %v4125_v25, %v11463_v33  ;;  %v4139_v61 = vand.u32 31, %v13718_v57  ;;  %v13738_v20 = vld [vmem:[#allocation64_spill] sm:$0xff]  ;;  %v4152_v31 = vand.u32 31, %v13743_v15  ;;  %v13792_v25 = vld [vmem:[#allocation103_spill] sm:$0xff] }
 0x64b   :  { %v12476_v14 = vpack.c.bf16 %v3604_v3, %v3604_v3  ;;  %v4156_v36 = vand.u32 31, %v13703_v40  ;;  %v13753_v57 = vld [vmem:[#allocation72_spill] sm:$0xff] }
 0x64d   :  { %4045 = vmatprep.mubr.bf16.mxu1 %v12476_v14  ;;  %4086 = vmatprep.mubr.bf16.mxu0 %v12476_v14 }
 0x64e   :  { %4046 = vmatmul.mubr.bf16.vlgmr.msra.gmra.mxu1 %v12485_v62  ;;  %4087 = vmatmul.mubr.bf16.vlgmr.msra.gmra.mxu0 %v12485_v62 }
 0x64f   :  { %9658 = vmatpush3.msk.msra.mxu1 %vm12479_vm10, %v11274_v28  ;;  %9696 = vmatpush3.msk.msra.mxu0 %vm12488_vm12, %v11274_v28  ;;  %vm12547_vm10 = vcmp.eq.s32.totalorder %v4109_v27, %v11463_v33  ;;  %vm12552_vm12 = vcmp.eq.s32.totalorder %v4141_v24, %v11463_v33  ;;  %v4138_v24 = vand.u32 31, %v13728_v4  ;;  %v13763_v27 = vld [vmem:[#allocation75_spill] sm:$0xff]  ;;  %v4096_v4 = vand.u32 31, %v11446_v19 }
 0x650   :  { %9659 = vmatprep.subr.msk.mxu1 %vm12497_vm4, %v11274_v28  ;;  %9697 = vmatprep.subr.msk.mxu0 %vm12502_vm11, %v11274_v28  ;;  %vm12565_vm4 = vcmp.eq.s32.totalorder %v4124_v52, %v11463_v33  ;;  %vm12570_vm11 = vcmp.eq.s32.totalorder %v4156_v36, %v11463_v33  ;;  %v13733_v52 = vld [vmem:[#allocation63_spill] sm:$0xff] }
 0x651   :  { %9660 = vmatpush3.msk.msra.mxu1 %vm12511_vm15, %v11274_v28  ;;  %9698 = vmatpush3.msk.msra.mxu0 %vm12516_vm7, %v11274_v28  ;;  %vm12583_vm15 = vcmp.eq.s32.totalorder %v4108_v22, %v11463_v33  ;;  %vm12588_vm7 = vcmp.eq.s32.totalorder %v4140_v49, %v11463_v33  ;;  %v4153_v40 = vand.u32 31, %v13733_v52  ;;  %v4137_v22 = vand.u32 31, %v13738_v20  ;;  %v13778_v20 = vld [vmem:[#allocation82_spill] sm:$0xff] }
 0x652   :  { %9661 = vmatprep.subr.msk.mxu1 %vm12529_vm8, %v11274_v28  ;;  %9699 = vmatprep.subr.msk.mxu0 %vm12534_vm9, %v11274_v28  ;;  %vm12601_vm9 = vcmp.eq.s32.totalorder %v4123_v41, %v11463_v33  ;;  %vm12606_vm8 = vcmp.eq.s32.totalorder %v4155_v56, %v11463_v33  ;;  %v13748_v56 = vld [vmem:[#allocation68_spill] sm:$0xff] }
 0x653   :  { %9662 = vmatpush3.msk.msra.mxu1 %vm12547_vm10, %v11274_v28  ;;  %9700 = vmatpush3.msk.msra.mxu0 %vm12552_vm12, %v11274_v28  ;;  %vm12619_vm10 = vcmp.eq.s32.totalorder %v4107_v42, %v11463_v33  ;;  %vm12624_vm12 = vcmp.eq.s32.totalorder %v4139_v61, %v11463_v33  ;;  %v4136_v3 = vand.u32 31, %v13748_v56  ;;  %v4151_v61 = vand.u32 31, %v13753_v57  ;;  %v13790_v42 = vld [vmem:[#allocation101_spill] sm:$0xff]  ;;  %v13791_v57 = vld [vmem:[#allocation102_spill] sm:$0xff] }
 0x654   :  { %9663 = vmatprep.subr.msk.mxu1 %vm12565_vm4, %v11274_v28  ;;  %9701 = vmatprep.subr.msk.mxu0 %vm12570_vm11, %v11274_v28  ;;  %vm12637_vm4 = vcmp.eq.s32.totalorder %v4122_v43, %v11463_v33  ;;  %vm12642_vm11 = vcmp.eq.s32.totalorder %v4154_v9, %v11463_v33  ;;  %v13758_v43 = vld [vmem:[#allocation74_spill] sm:$0xff]  ;;  %v4115_v56 = vand.u32 31, %v13688_v60  ;;  %v4114_v60 = vand.u32 31, %v11667_v0  ;;  %v13793_v0 = vld [vmem:[#allocation105_spill] sm:$0xff] }
 0x655   :  { %9664 = vmatpush3.msk.msra.mxu1 %vm12583_vm15, %v11274_v28  ;;  %9702 = vmatpush3.msk.msra.mxu0 %vm12588_vm7, %v11274_v28  ;;  %vm12655_vm15 = vcmp.eq.s32.totalorder %v4106_v44, %v11463_v33  ;;  %vm12660_vm7 = vcmp.eq.s32.totalorder %v4138_v24, %v11463_v33  ;;  %v4135_v58 = vand.u32 31, %v13758_v43  ;;  %v4150_v44 = vand.u32 31, %v13763_v27  ;;  %v13795_v27 = vld [vmem:[#allocation109_spill] sm:$0xff]  ;;  %v13796_v24 = vld [vmem:[#allocation111_spill] sm:$0xff] }
 0x656   :  { %9665 = vmatprep.subr.msk.mxu1 %vm12601_vm9, %v11274_v28  ;;  %9703 = vmatprep.subr.msk.mxu0 %vm12606_vm8, %v11274_v28  ;;  %vm12673_vm9 = vcmp.eq.s32.totalorder %v4121_v37, %v11463_v33  ;;  %vm12678_vm8 = vcmp.eq.s32.totalorder %v4153_v40, %v11463_v33  ;;  %v13773_v40 = vld [vmem:[#allocation80_spill] sm:$0xff]  ;;  %v4113_v43 = vand.u32 31, %v11848_v38  ;;  %v4097_v9 = vand.u32 31, %v11884_v8 }
 0x657   :  { %9666 = vmatpush3.msk.msra.mxu1 %vm12619_vm10, %v11274_v28  ;;  %9704 = vmatpush3.msk.msra.mxu0 %vm12624_vm12, %v11274_v28  ;;  %vm12691_vm10 = vcmp.eq.s32.totalorder %v4105_v46, %v11463_v33  ;;  %vm12696_vm12 = vcmp.eq.s32.totalorder %v4137_v22, %v11463_v33  ;;  %v4149_v36 = vand.u32 31, %v13773_v40  ;;  %v4133_v22 = vand.u32 31, %v13778_v20  ;;  %v13798_v40 = vld [vmem:[#allocation116_spill] sm:$0xff] }
 0x658   :  { %9667 = vmatprep.subr.msk.mxu1 %vm12637_vm4, %v11274_v28  ;;  %9705 = vmatprep.subr.msk.mxu0 %vm12642_vm11, %v11274_v28  ;;  %vm12709_vm4 = vcmp.eq.s32.totalorder %v4120_v47, %v11463_v33  ;;  %vm12714_vm11 = vcmp.eq.s32.totalorder %v4152_v31, %v11463_v33  ;;  %v13783_v47 = vld [vmem:[#allocation84_spill] sm:$0xff]  ;;  %v4129_v38 = vand.u32 31, %v13794_v26 }
 0x659   :  { %9668 = vmatpush3.msk.msra.mxu1 %vm12655_vm15, %v11274_v28  ;;  %9706 = vmatpush3.msk.msra.mxu0 %vm12660_vm7, %v11274_v28  ;;  %vm12727_vm15 = vcmp.eq.s32.totalorder %v4104_v51, %v11463_v33  ;;  %vm12732_vm7 = vcmp.eq.s32.totalorder %v4136_v3, %v11463_v33  ;;  %v4148_v15 = vand.u32 31, %v13783_v47  ;;  %v4132_v51 = vand.u32 31, %v13788_v59  ;;  %v13789_v3 = vld [vmem:[#allocation100_spill] sm:$0xff] }
 0x65a   :  { %9669 = vmatprep.subr.msk.mxu1 %vm12673_vm9, %v11274_v28  ;;  %9707 = vmatprep.subr.msk.mxu0 %vm12678_vm8, %v11274_v28  ;;  %vm12745_vm9 = vcmp.eq.s32.totalorder %v4119_v53, %v11463_v33  ;;  %vm12750_vm8 = vcmp.eq.s32.totalorder %v4151_v61, %v11463_v33  ;;  %v4147_v5 = vand.u32 31, %v13789_v3  ;;  %v4131_v53 = vand.u32 31, %v13790_v42  ;;  %v13799_v3 = vld [vmem:[#allocation118_spill] sm:$0xff] }
 0x65b   :  { %9670 = vmatpush3.msk.msra.mxu1 %vm12691_vm10, %v11274_v28  ;;  %9708 = vmatpush3.msk.msra.mxu0 %vm12696_vm12, %v11274_v28  ;;  %vm12763_vm10 = vcmp.eq.s32.totalorder %v4103_v1, %v11463_v33  ;;  %vm12768_vm12 = vcmp.eq.s32.totalorder %v4135_v58, %v11463_v33  ;;  %vm4196_vm5 = vcmp.eq.s32.totalorder %v4132_v51, %v11463_v33  ;;  %v4146_v61 = vand.u32 31, %v13791_v57  ;;  %v10418_v42 = vld [vmem:[#allocation11 + $0x2c4] ss:$16 sps:$4 sm:$0xff]   ;;  %v10428_v57 = vld [vmem:[#allocation11 + $0x280] ss:$16 sps:$4 sm:$0xff]  }
 0x65c   :  { %9671 = vmatprep.subr.msk.mxu1 %vm12709_vm4, %v11274_v28  ;;  %9709 = vmatprep.subr.msk.mxu0 %vm12714_vm11, %v11274_v28  ;;  %vm12781_vm4 = vcmp.eq.s32.totalorder %v4118_v6, %v11463_v33  ;;  %vm12786_vm11 = vcmp.eq.s32.totalorder %v4150_v44, %v11463_v33  ;;  %v4130_v1 = vand.u32 31, %v13792_v25  ;;  %v4145_v58 = vand.u32 31, %v13793_v0  ;;  %v10436_v25 = vld [vmem:[#allocation11 + $0x264] ss:$16 sps:$4 sm:$0xff]   ;;  %v10446_v0 = vld [vmem:[#allocation11 + $0x220] ss:$16 sps:$4 sm:$0xff]  }
 0x65d   :  { %9672 = vmatpush3.msk.msra.mxu1 %vm12727_vm15, %v11274_v28  ;;  %9710 = vmatpush3.msk.msra.mxu0 %vm12732_vm7, %v11274_v28  ;;  %vm12799_vm15 = vcmp.eq.s32.totalorder %v4102_v10, %v11463_v33  ;;  %vm12804_vm7 = vcmp.eq.s32.totalorder %v4134_v29, %v11463_v33  ;;  %v4112_v6 = vand.u32 31, %v11920_v35  ;;  %v4144_v44 = vand.u32 31, %v13795_v27  ;;  %v3671_v35 = vld [vmem:[%s13262_s7] sm:$0xf]  ;;  %v13797_v29 = vld [vmem:[#allocation117_spill] sm:$0xff]  ;;  %s8941_s7 = sld [smem:[#allocation2 + $0x2]] }
 0x65e   :  { %9673 = vmatprep.subr.msk.mxu1 %vm12745_vm9, %v11274_v28  ;;  %9711 = vmatprep.subr.msk.mxu0 %vm12750_vm8, %v11274_v28  ;;  %vm4181_vm9 = vcmp.eq.s32.totalorder %v4117_v11, %v11463_v33  ;;  %vm4213_vm8 = vcmp.eq.s32.totalorder %v4149_v36, %v11463_v33  ;;  %v4128_v10 = vand.u32 31, %v13796_v24  ;;  %v3680_v30 = vrot.slane %v3671_v35, %v12138_v7  ;;  %v10454_v26 = vld [vmem:[#allocation11 + $0x204] ss:$16 sps:$4 sm:$0xff]   ;;  %v10464_v27 = vld [vmem:[#allocation11 + $0x3c0] ss:$16 sps:$4 sm:$0xff]  }
 0x65f   :  { %9674 = vmatpush3.msk.msra.mxu1 %vm12763_vm10, %v11274_v28  ;;  %9712 = vmatpush3.msk.msra.mxu0 %vm12768_vm12, %v11274_v28  ;;  %vm4165_vm10 = vcmp.eq.s32.totalorder %v4101_v12, %v11463_v33  ;;  %vm4197_vm12 = vcmp.eq.s32.totalorder %v4133_v22, %v11463_v33  ;;  %v3688_v37 = vrot.slane %v3671_v35, %v13797_v29  ;;  %v4289_v51 = vand.u32 31, %v12275_v34  ;;  %v10412_v34 = vld [vmem:[#allocation11 + $0x2e4] ss:$16 sps:$4 sm:$0xff]  }
 0x660   :  { %9675 = vmatprep.subr.msk.mxu1 %vm12781_vm4, %v11274_v28  ;;  %9713 = vmatprep.subr.msk.mxu0 %vm12786_vm11, %v11274_v28  ;;  %vm4180_vm4 = vcmp.eq.s32.totalorder %v4116_v16, %v11463_v33  ;;  %vm4212_vm11 = vcmp.eq.s32.totalorder %v4148_v15, %v11463_v33  ;;  %v3676_v52 = vrot.slane %v3671_v35, %v12135_v39  ;;  %v10472_v24 = vld [vmem:[#allocation11 + $0x3a4] ss:$16 sps:$4 sm:$0xff]  }
 0x661   :  { %9676 = vmatpush3.msk.msra.mxu1 %vm12799_vm15, %v11274_v28  ;;  %9714 = vmatpush3.msk.msra.mxu0 %vm12804_vm7, %v11274_v28  ;;  %vm4179_vm15 = vcmp.eq.s32.totalorder %v4115_v56, %v11463_v33  ;;  %vm4211_vm7 = vcmp.eq.s32.totalorder %v4147_v5, %v11463_v33  ;;  %v3684_v36 = vrot.slane %v3671_v35, %v13798_v40  ;;  %v4288_v56 = vand.u32 31, %v11463_v33 }
 0x662   :  { %9677 = vmatprep.subr.msk.mxu1 %vm4181_vm9, %v11274_v28  ;;  %9715 = vmatprep.subr.msk.mxu0 %vm4213_vm8, %v11274_v28  ;;  %vm4163_vm9 = vcmp.eq.s32.totalorder %v4099_v18, %v11463_v33  ;;  %vm4195_vm8 = vcmp.eq.s32.totalorder %v4131_v53, %v11463_v33  ;;  %v12928_v5 = vand.u32 31, %v13799_v3  ;;  %v10416_v18 = vld [vmem:[#allocation11 + $0x2c0] ss:$16 sps:$4 sm:$0xff]  }
 0x663   :  { %9678 = vmatpush3.msk.msra.mxu1 %vm4165_vm10, %v11274_v28  ;;  %9716 = vmatpush3.msk.msra.mxu0 %vm4197_vm12, %v11274_v28  ;;  %vm4162_vm10 = vcmp.eq.s32.totalorder %v4098_v32, %v11463_v33  ;;  %vm4194_vm12 = vcmp.eq.s32.totalorder %v4130_v1, %v11463_v33  ;;  %v10422_v53 = vld [vmem:[#allocation11 + $0x2a0] ss:$16 sps:$4 sm:$0xff]  }
 0x664   :  { %9679 = vmatprep.subr.msk.mxu1 %vm4180_vm4, %v11274_v28  ;;  %9717 = vmatprep.subr.msk.mxu0 %vm4212_vm11, %v11274_v28  ;;  %vm4177_vm4 = vcmp.eq.s32.totalorder %v4113_v43, %v11463_v33  ;;  %vm4209_vm11 = vcmp.eq.s32.totalorder %v4145_v58, %v11463_v33  ;;  %v10434_v32 = vld [vmem:[#allocation11 + $0x260] ss:$16 sps:$4 sm:$0xff]   ;;  %v10442_v43 = vld [vmem:[#allocation11 + $0x244] ss:$16 sps:$4 sm:$0xff]  }
 0x665   :  { %9680 = vmatpush3.msk.msra.mxu1 %vm4164_vm6, %v11274_v28  ;;  %9718 = vmatpush3.msk.msra.mxu0 %vm4196_vm5, %v11274_v28  ;;  %vm4178_vm6 = vcmp.eq.s32.totalorder %v4114_v60, %v11463_v33  ;;  %vm4210_vm5 = vcmp.eq.s32.totalorder %v4146_v61, %v11463_v33  ;;  %v10424_v60 = vld [vmem:[#allocation11 + $0x2a4] ss:$16 sps:$4 sm:$0xff]   ;;  %v10440_v1 = vld [vmem:[#allocation11 + $0x240] ss:$16 sps:$4 sm:$0xff]  }
 0x666   :  { %9681 = vmatprep.subr.msk.mxu1 %vm4179_vm15, %v11274_v28  ;;  %9719 = vmatprep.subr.msk.mxu0 %vm4211_vm7, %v11274_v28  ;;  %vm4161_vm15 = vcmp.eq.s32.totalorder %v4097_v9, %v11463_v33  ;;  %vm4193_vm7 = vcmp.eq.s32.totalorder %v4129_v38, %v11463_v33  ;;  %v10430_v61 = vld [vmem:[#allocation11 + $0x284] ss:$16 sps:$4 sm:$0xff]   ;;  %v10452_v9 = vld [vmem:[#allocation11 + $0x200] ss:$16 sps:$4 sm:$0xff]  }
 0x667   :  { %9682 = vmatpush3.msk.msra.mxu1 %vm4163_vm9, %v11274_v28  ;;  %9720 = vmatpush3.msk.msra.mxu0 %vm4195_vm8, %v11274_v28  ;;  %vm4176_vm9 = vcmp.eq.s32.totalorder %v4112_v6, %v11463_v33  ;;  %vm4208_vm8 = vcmp.eq.s32.totalorder %v4144_v44, %v11463_v33  ;;  %v10448_v58 = vld [vmem:[#allocation11 + $0x224] ss:$16 sps:$4 sm:$0xff]   ;;  %v10458_v38 = vld [vmem:[#allocation11 + $0x3e0] ss:$16 sps:$4 sm:$0xff]  }
 0x668   :  { %9683 = vmatprep.subr.msk.mxu1 %vm4178_vm6, %v11274_v28  ;;  %9721 = vmatprep.subr.msk.mxu0 %vm4210_vm5, %v11274_v28  ;;  %vm4160_vm6 = vcmp.eq.s32.totalorder %v4096_v4, %v11463_v33  ;;  %vm4192_vm5 = vcmp.eq.s32.totalorder %v4128_v10, %v11463_v33  ;;  %v10410_v33 = vld [vmem:[#allocation11 + $0x2e0] ss:$16 sps:$4 sm:$0xff]   ;;  %v10460_v6 = vld [vmem:[#allocation11 + $0x3e4] ss:$16 sps:$4 sm:$0xff]  }
 0x669   :  { %9684 = vmatpush3.msk.msra.mxu1 %vm4162_vm10, %v11274_v28  ;;  %9722 = vmatpush3.msk.msra.mxu0 %vm4194_vm12, %v11274_v28  ;;  %vm4305_vm10 = vcmp.eq.s32.totalorder %v11664_v63, %v4289_v51  ;;  %vm4304_vm12 = vcmp.eq.s32.totalorder %v11664_v63, %v4288_v56  ;;  %v10466_v44 = vld [vmem:[#allocation11 + $0x3c4] ss:$16 sps:$4 sm:$0xff]   ;;  %v10470_v4 = vld [vmem:[#allocation11 + $0x3a0] ss:$16 sps:$4 sm:$0xff]  }
 0x66a   :  { %9685 = vmatprep.subr.msk.mxu1 %vm4177_vm4, %v11274_v28  ;;  %9723 = vmatprep.subr.msk.mxu0 %vm4209_vm11, %v11274_v28  ;;  %vm4301_vm4 = vcmp.eq.s32.totalorder %v11731_v23, %v4289_v51  ;;  %vm4300_vm11 = vcmp.eq.s32.totalorder %v11731_v23, %v4288_v56 }
 0x66b   :  { %9686 = vmatpush3.msk.msra.mxu1 %vm4161_vm15, %v11274_v28  ;;  %9724 = vmatpush3.msk.msra.mxu0 %vm4193_vm7, %v11274_v28  ;;  %vm4297_vm15 = vcmp.eq.s32.totalorder %v11884_v8, %v4289_v51  ;;  %vm4296_vm7 = vcmp.eq.s32.totalorder %v11884_v8, %v4288_v56 }
 0x66c   :  { %9687 = vmatprep.subr.msk.mxu1 %vm4176_vm9, %v11274_v28  ;;  %9725 = vmatprep.subr.msk.mxu0 %vm4208_vm8, %v11274_v28  ;;  %vm4293_vm9 = vcmp.eq.s32.totalorder %v11446_v19, %v4289_v51  ;;  %vm4292_vm8 = vcmp.eq.s32.totalorder %v11446_v19, %v4288_v56  ;;  %v13800_v51 = vld [vmem:[#allocation119_spill] sm:$0xff] }
 0x66d   :  { %9688 = vmatpush3.msk.msra.mxu1 %vm4160_vm6, %v11274_v28  ;;  %9726 = vmatpush3.msk.msra.mxu0 %vm4192_vm5, %v11274_v28  ;;  %vm4307_vm6 = vcmp.eq.s32.totalorder %v11664_v63, %v12928_v5  ;;  %v4290_v56 = vand.u32 31, %v13800_v51  ;;  %v10508_v51 = vld [vmem:[#allocation11 + $0x2ec] ss:$16 sps:$4 sm:$0xff]  }
 0x66e   :  { %9006 = vmatprep.subr.msk.mxu1 %vm4305_vm10, %v13689_v48  ;;  %5633 = vmatprep.subr.bf16.mxu0 %v10412_v34  ;;  %vm4303_vm10 = vcmp.eq.s32.totalorder %v11731_v23, %v12928_v5 }
 0x66f   :  { %vm4306_vm5 = vcmp.eq.s32.totalorder %v11664_v63, %v4290_v56  ;;  %v10401_v63 = vld [vmem:[#allocation11 + $0xe0] ss:$16 sps:$4 sm:$0xff]  }
 0x70e   :  { %v4047_v11 = vpop.f32.mrf.mxu1  ;;  %v4088_v2 = vpop.f32.mrf.mxu0 }
 0x70f   :  { %v12903_v28 = vadd.f32 %v4047_v11, %v3676_v52  ;;  %v12905_v45 = vadd.f32 %v4088_v2, %v3684_v36 }
 0x710   :  { %v4049_v46 = vpop.f32.mrf.mxu1  ;;  %v4090_v12 = vpop.f32.mrf.mxu0 }
 0x711   :  { %v12899_v20 = vadd.f32 %v4049_v46, %v3680_v30  ;;  %v12901_v22 = vadd.f32 %v4090_v12, %v3688_v37  ;;  %v4420_v17 = vmul.f32 %v12903_v28, %v12903_v28  ;;  %v4422_v59 = vmul.f32 %v12905_v45, %v12905_v45 }
 0x712   :  { %v4051_v49 = vpop.f32.mrf.mxu1  ;;  %v4092_v16 = vpop.f32.mrf.mxu0 }
 0x713   :  { %4488 = vmatprep.mubr.f32.mxu1 %v12899_v20  ;;  %4563 = vmatprep.mubr.f32.mxu0 %v12901_v22  ;;  %v4421_v47 = vmul.f32 %v12899_v20, %v12899_v20  ;;  %v4423_v15 = vmul.f32 %v12901_v22, %v12901_v22 }
 0x714   :  { %v4052_v31 = vpop.f32.mrf.mxu1  ;;  %v4093_v41 = vpop.f32.mrf.mxu0  ;;  %4489 = vmatmul.mubr.f32.vlgmr.msra.gmra.mxu1 %v12903_v28  ;;  %4564 = vmatmul.mubr.f32.vlgmr.msra.gmra.mxu0 %v12905_v45 }
 0x715   :  { %4493 = vmatprep.mubr.f32.mxu1 %v4421_v47  ;;  %4568 = vmatprep.mubr.f32.mxu0 %v4423_v15 }
 0x716   :  { %9007 = vmatpush1.msk.msra.mxu1 %vm4304_vm12, %v13689_v48  ;;  %5634 = vmatpush1.bf16.msra.mxu0 %v10410_v33  ;;  %vm4302_vm12 = vcmp.eq.s32.totalorder %v11731_v23, %v4290_v56  ;;  %v10403_v23 = vld [vmem:[#allocation11 + $0xe4] ss:$16 sps:$4 sm:$0xff]  }
 0x717   :  { %9008 = vmatprep.subr.msk.mxu1 %vm4301_vm4, %v13689_v48  ;;  %5635 = vmatprep.subr.bf16.mxu0 %v10418_v42  ;;  %vm4299_vm4 = vcmp.eq.s32.totalorder %v11884_v8, %v12928_v5  ;;  %v10415_v42 = vld [vmem:[#allocation11 + $0x84] ss:$16 sps:$4 sm:$0xff]  }
 0x718   :  { %4494 = vmatmul.mubr.f32.gmra.mxu1 %v4420_v17  ;;  %4569 = vmatmul.mubr.f32.gmra.mxu0 %v4422_v59 }
 0x719   :  { %4645 = vmatprep.mubr.f32.mxu1 %v13687_v54  ;;  %9009 = vmatpush1.msk.msra.mxu1 %vm4300_vm11, %v13689_v48  ;;  %vm4298_vm11 = vcmp.eq.s32.totalorder %v11884_v8, %v4290_v56  ;;  %v10404_v8 = vld [vmem:[#allocation11 + $0xc0] ss:$16 sps:$4 sm:$0xff]  }
 0x71a   :  { %9010 = vmatprep.subr.msk.mxu1 %vm4297_vm15, %v13689_v48  ;;  %5636 = vmatpush1.bf16.msra.mxu0 %v10416_v18  ;;  %vm4295_vm15 = vcmp.eq.s32.totalorder %v11446_v19, %v12928_v5  ;;  %v10406_v18 = vld [vmem:[#allocation11 + $0xc4] ss:$16 sps:$4 sm:$0xff]  }
 0x71b   :  { %9011 = vmatpush1.msk.msra.mxu1 %vm4296_vm7, %v13689_v48  ;;  %5637 = vmatprep.subr.bf16.mxu0 %v10424_v60  ;;  %vm4294_vm7 = vcmp.eq.s32.totalorder %v11446_v19, %v4290_v56  ;;  %v10409_v5 = vld [vmem:[#allocation11 + $0xa4] ss:$16 sps:$4 sm:$0xff]   ;;  %v10407_v19 = vld [vmem:[#allocation11 + $0xa0] ss:$16 sps:$4 sm:$0xff]  }
 0x71c   :  { %9012 = vmatprep.subr.msk.mxu1 %vm4293_vm9, %v13689_v48  ;;  %v10421_v60 = vld [vmem:[#allocation11 + $0x64] ss:$16 sps:$4 sm:$0xff]  }
 0x71d   :  { %9013 = vmatpush1.msk.msra.mxu1 %vm4292_vm8, %v13689_v48 }
 0x71e   :  { %9014 = vmatprep.subr.msk.mxu1 %vm4307_vm6, %v13689_v48  ;;  %5638 = vmatpush1.bf16.msra.mxu0 %v10422_v53  ;;  %v10413_v53 = vld [vmem:[#allocation11 + $0x80] ss:$16 sps:$4 sm:$0xff]  }
 0x71f   :  { %5639 = vmatprep.subr.bf16.mxu0 %v10430_v61  ;;  %v10427_v61 = vld [vmem:[#allocation11 + $0x44] ss:$16 sps:$4 sm:$0xff]  }
 0x722   :  { %5640 = vmatpush1.bf16.msra.mxu0 %v10428_v57  ;;  %v10419_v57 = vld [vmem:[#allocation11 + $0x60] ss:$16 sps:$4 sm:$0xff]  }
 0x723   :  { %5641 = vmatprep.subr.bf16.mxu0 %v10436_v25  ;;  %v10433_v25 = vld [vmem:[#allocation11 + $0x24] ss:$16 sps:$4 sm:$0xff]  }
 0x726   :  { %5642 = vmatpush1.bf16.msra.mxu0 %v10434_v32  ;;  %v10425_v32 = vld [vmem:[#allocation11 + $0x40] ss:$16 sps:$4 sm:$0xff]  }
 0x727   :  { %5643 = vmatprep.subr.bf16.mxu0 %v10442_v43  ;;  %v10439_v43 = vld [vmem:[#allocation11 + $0x4] ss:$16 sps:$4 sm:$0xff]  }
 0x72a   :  { %5644 = vmatpush1.bf16.msra.mxu0 %v10440_v1  ;;  %v10431_v1 = vld [vmem:[#allocation11 + $0x20] ss:$16 sps:$4 sm:$0xff]  }
 0x72b   :  { %5645 = vmatprep.subr.bf16.mxu0 %v10448_v58  ;;  %v10445_v58 = vld [vmem:[#allocation11 + $0x1e4] ss:$16 sps:$4 sm:$0xff]  }
 0x72e   :  { %5646 = vmatpush1.bf16.msra.mxu0 %v10446_v0  ;;  %v10437_v0 = vld [vmem:[#allocation11] ss:$16 sps:$4 sm:$0xff]  }
 0x72f   :  { %5647 = vmatprep.subr.bf16.mxu0 %v10454_v26  ;;  %v10451_v26 = vld [vmem:[#allocation11 + $0x1c4] ss:$16 sps:$4 sm:$0xff]  }
 0x732   :  { %5648 = vmatpush1.bf16.msra.mxu0 %v10452_v9  ;;  %v10443_v9 = vld [vmem:[#allocation11 + $0x1e0] ss:$16 sps:$4 sm:$0xff]  }
 0x733   :  { %5649 = vmatprep.subr.bf16.mxu0 %v10460_v6  ;;  %v10457_v6 = vld [vmem:[#allocation11 + $0x1a4] ss:$16 sps:$4 sm:$0xff]  }
 0x736   :  { %5650 = vmatpush2.bf16.msra.mxu0 %v10458_v38  ;;  %v10449_v38 = vld [vmem:[#allocation11 + $0x1c0] ss:$16 sps:$4 sm:$0xff]  }
 0x737   :  { %5651 = vmatprep.subr.bf16.mxu0 %v10466_v44  ;;  %v10463_v44 = vld [vmem:[#allocation11 + $0x184] ss:$16 sps:$4 sm:$0xff]  }
 0x73a   :  { %5652 = vmatpush2.bf16.msra.mxu0 %v10464_v27  ;;  %v10455_v27 = vld [vmem:[#allocation11 + $0x1a0] ss:$16 sps:$4 sm:$0xff]  }
 0x73b   :  { %5653 = vmatprep.subr.bf16.mxu0 %v10472_v24  ;;  %v10469_v24 = vld [vmem:[#allocation11 + $0x164] ss:$16 sps:$4 sm:$0xff]  }
 0x73e   :  { %5654 = vmatpush2.bf16.msra.mxu0 %v10470_v4  ;;  %v10461_v4 = vld [vmem:[#allocation11 + $0x180] ss:$16 sps:$4 sm:$0xff]  }
 0x7d4   :  { %v9689_v10 = vpop.f32.mrf.mxu1  ;;  %v9727_v35 = vpop.f32.mrf.mxu0 }
 0x7d6   :  { %v9690_v30 = vpop.f32.mrf.mxu1  ;;  %v9728_v37 = vpop.f32.mrf.mxu0 }
 0x7d7   :  { %v9691_v52 = vadd.f32 %v9690_v30, %v9689_v10  ;;  %v9729_v11 = vadd.f32 %v9728_v37, %v9727_v35  ;;  %v10467_v10 = vld [vmem:[#allocation11 + $0x160] ss:$16 sps:$4 sm:$0xff]   ;;  %v10475_v35 = vld [vmem:[#allocation11 + $0x144] ss:$16 sps:$4 sm:$0xff]  }
 0x7d8   :  { %v9692_v36 = vpop.f32.mrf.mxu1  ;;  %v9730_v2 = vpop.f32.mrf.mxu0  ;;  %v10478_v30 = vld [vmem:[#allocation11 + $0x384] ss:$16 sps:$4 sm:$0xff]   ;;  %v10473_v37 = vld [vmem:[#allocation11 + $0x140] ss:$16 sps:$4 sm:$0xff]  }
 0x7d9   :  { %v4566_v46 = vadd.f32 %v9729_v11, %v9691_v52  ;;  %v10476_v52 = vld [vmem:[#allocation11 + $0x380] ss:$16 sps:$4 sm:$0xff]   ;;  %5655 = vmatprep.subr.bf16.mxu0 %v10478_v30  ;;  %v10481_v11 = vld [vmem:[#allocation11 + $0x124] ss:$16 sps:$4 sm:$0xff]   ;;  %v10511_v30 = vld [vmem:[#allocation11 + $0x8c] ss:$16 sps:$4 sm:$0xff]  }
 0x7da   :  { %v9693_v12 = vpop.f32.mrf.mxu1  ;;  %v9731_v49 = vpop.f32.mrf.mxu0  ;;  %5656 = vmatpush2.bf16.msra.mxu0 %v10476_v52  ;;  %v10509_v52 = vld [vmem:[#allocation11 + $0x88] ss:$16 sps:$4 sm:$0xff]  }
 0x7db   :  { %v9694_v16 = vadd.f32 %v9693_v12, %v9692_v36  ;;  %v9732_v47 = vadd.f32 %v9731_v49, %v9730_v2  ;;  %v4574_v15 = vmul.f32 %v4566_v46, %v4566_v46  ;;  %v4579_v33 = vsub.f32 0.0, %v4566_v46  ;;  %v10484_v36 = vld [vmem:[#allocation11 + $0x364] ss:$16 sps:$4 sm:$0xff]   ;;  %v10479_v2 = vld [vmem:[#allocation11 + $0x120] ss:$16 sps:$4 sm:$0xff]  }
 0x7dc   :  { %v10482_v46 = vld [vmem:[#allocation11 + $0x360] ss:$16 sps:$4 sm:$0xff]   ;;  %5657 = vmatprep.subr.bf16.mxu0 %v10484_v36  ;;  %v10487_v12 = vld [vmem:[#allocation11 + $0x104] ss:$16 sps:$4 sm:$0xff]   ;;  %v10517_v36 = vld [vmem:[#allocation11 + $0x6c] ss:$16 sps:$4 sm:$0xff]  }
 0x7dd   :  { %v4571_v31 = vadd.f32 %v9732_v47, %v9694_v16  ;;  %v10490_v49 = vld [vmem:[#allocation11 + $0x344] ss:$16 sps:$4 sm:$0xff]   ;;  %v10485_v16 = vld [vmem:[#allocation11 + $0x100] ss:$16 sps:$4 sm:$0xff]  }
 0x7de   :  { %5658 = vmatpush2.bf16.msra.mxu0 %v10482_v46  ;;  %v10488_v47 = vld [vmem:[#allocation11 + $0x340] ss:$16 sps:$4 sm:$0xff]   ;;  %v10515_v46 = vld [vmem:[#allocation11 + $0x68] ss:$16 sps:$4 sm:$0xff]  }
 0x7df   :  { %v4575_v41 = vsub.f32 %v4571_v31, %v4574_v15  ;;  %5659 = vmatprep.subr.bf16.mxu0 %v10490_v49  ;;  %v10493_v15 = vld [vmem:[#allocation11 + $0x324] ss:$16 sps:$4 sm:$0xff]   ;;  %v10496_v31 = vld [vmem:[#allocation11 + $0xec] ss:$16 sps:$4 sm:$0xff]  }
 0x7e0   :  { %v10523_v49 = vld [vmem:[#allocation11 + $0x4c] ss:$16 sps:$4 sm:$0xff]  }
 0x7e1   :  { %v4576_v17 = vmax.f32 %v4575_v41, 0.0  ;;  %v10491_v41 = vld [vmem:[#allocation11 + $0x320] ss:$16 sps:$4 sm:$0xff]  }
 0x7e2   :  { %5660 = vmatpush2.bf16.msra.mxu0 %v10488_v47  ;;  %v10521_v47 = vld [vmem:[#allocation11 + $0x48] ss:$16 sps:$4 sm:$0xff]  }
 0x7e3   :  { %v4577_v59 = vadd.f32 1e-05, %v4576_v17  ;;  %5661 = vmatprep.subr.bf16.mxu0 %v10493_v15  ;;  %v10499_v17 = vld [vmem:[#allocation11 + $0x304] ss:$16 sps:$4 sm:$0xff]   ;;  %v10524_v15 = vld [vmem:[#allocation11 + $0x288] ss:$16 sps:$4 sm:$0xff]  }
 0x7e5   :  { %11077 = vrsqrt.f32 %v4577_v59  ;;  %v10497_v59 = vld [vmem:[#allocation11 + $0x300] ss:$16 sps:$4 sm:$0xff]  }
 0x7e6   :  { %5662 = vmatpush2.bf16.msra.mxu0 %v10491_v41  ;;  %v10532_v41 = vld [vmem:[#allocation11 + $0x26c] ss:$16 sps:$4 sm:$0xff]  }
 0x7e7   :  { %5663 = vmatprep.subr.bf16.mxu0 %v10499_v17  ;;  %v10527_v17 = vld [vmem:[#allocation11 + $0x28] ss:$16 sps:$4 sm:$0xff]  }
 0x7ea   :  { %5664 = vmatpush2.bf16.msra.mxu0 %v10497_v59  ;;  %v10530_v59 = vld [vmem:[#allocation11 + $0x268] ss:$16 sps:$4 sm:$0xff]  }
 0x7eb   :  { %5715 = vmatprep.subr.bf16.mxu0 %v10508_v51  ;;  %v10535_v51 = vld [vmem:[#allocation11 + $0xc] ss:$16 sps:$4 sm:$0xff]  }
 0x7f2   :  { %v11078_v3 = vpop.eup %11077 }
 0x7f3   :  { %4646 = vmatmul.mubr.f32.vlgmr.msra.gmra.mxu1 %v11078_v3  ;;  %v4580_v34 = vmul.f32 %v11078_v3, %v4579_v33 }
 0x7f4   :  { %9015 = vmatpush1.msk.msra.mxu1 %vm4306_vm5, %v13689_v48  ;;  %4651 = vmatprep.mubr.f32.mxu1 %v13687_v54 }
 0x7f5   :  { %9016 = vmatprep.subr.msk.mxu1 %vm4303_vm10, %v13689_v48 }
 0x7f6   :  { %9017 = vmatpush1.msk.msra.mxu1 %vm4302_vm12, %v13689_v48 }
 0x7f7   :  { %9018 = vmatprep.subr.msk.mxu1 %vm4299_vm4, %v13689_v48  ;;  %4652 = vmatmul.mubr.f32.gmra.mxu1 %v4580_v34 }
 0x7f8   :  { %9019 = vmatpush1.msk.msra.mxu1 %vm4298_vm11, %v13689_v48  ;;  %4722 = vmatprep.mubr.f32.mxu1 %v13687_v54 }
 0x7f9   :  { %9020 = vmatprep.subr.msk.mxu1 %vm4295_vm15, %v13689_v48 }
 0x7fa   :  { %9021 = vmatpush1.msk.msra.mxu1 %vm4294_vm7, %v13689_v48 }
 0x7fb   :  { %4723 = vmatmul.mubr.f32.vlgmr.msra.gmra.mxu1 %v11078_v3  ;;  %5592 = vmatprep.subr.bf16.mxu1 %v10403_v23  ;;  %v4747_v23 = vstv %s8941_s7 }
 0x7fc   :  { %4728 = vmatprep.mubr.f32.mxu1 %v13687_v54  ;;  %5593 = vmatpush1.bf16.msra.mxu1 %v10401_v63 }
 0x7fd   :  { %5594 = vmatprep.subr.bf16.mxu1 %v10406_v18 }
 0x7ff   :  { %4729 = vmatmul.mubr.f32.gmra.mxu1 %v4580_v34 }
 0x800   :  { %5595 = vmatpush1.bf16.msra.mxu1 %v10404_v8 }
 0x801   :  { %5596 = vmatprep.subr.bf16.mxu1 %v10409_v5 }
 0x804   :  { %5597 = vmatpush1.bf16.msra.mxu1 %v10407_v19 }
 0x805   :  { %5598 = vmatprep.subr.bf16.mxu1 %v10415_v42 }
 0x808   :  { %5599 = vmatpush1.bf16.msra.mxu1 %v10413_v53 }
 0x809   :  { %5600 = vmatprep.subr.bf16.mxu1 %v10421_v60 }
 0x80c   :  { %5601 = vmatpush1.bf16.msra.mxu1 %v10419_v57 }
 0x80d   :  { %5602 = vmatprep.subr.bf16.mxu1 %v10427_v61 }
 0x810   :  { %5603 = vmatpush1.bf16.msra.mxu1 %v10425_v32 }
 0x811   :  { %5604 = vmatprep.subr.bf16.mxu1 %v10433_v25 }
 0x814   :  { %5605 = vmatpush1.bf16.msra.mxu1 %v10431_v1 }
 0x815   :  { %5606 = vmatprep.subr.bf16.mxu1 %v10439_v43 }
 0x818   :  { %5607 = vmatpush1.bf16.msra.mxu1 %v10437_v0 }
 0x819   :  { %5608 = vmatprep.subr.bf16.mxu1 %v10445_v58  ;;  %v10502_v58 = vld [vmem:[#allocation11 + $0xcc] ss:$16 sps:$4 sm:$0xff]  }
 0x81c   :  { %5609 = vmatpush2.bf16.msra.mxu1 %v10443_v9 }
 0x81d   :  { %5610 = vmatprep.subr.bf16.mxu1 %v10451_v26 }
 0x820   :  { %5611 = vmatpush2.bf16.msra.mxu1 %v10449_v38 }
 0x821   :  { %5612 = vmatprep.subr.bf16.mxu1 %v10457_v6 }
 0x824   :  { %5613 = vmatpush2.bf16.msra.mxu1 %v10455_v27  ;;  %v10505_v27 = vld [vmem:[#allocation11 + $0xac] ss:$16 sps:$4 sm:$0xff]  }
 0x825   :  { %5614 = vmatprep.subr.bf16.mxu1 %v10463_v44 }
 0x828   :  { %5615 = vmatpush2.bf16.msra.mxu1 %v10461_v4 }
 0x829   :  { %5616 = vmatprep.subr.bf16.mxu1 %v10469_v24  ;;  %v10503_v24 = vld [vmem:[#allocation11 + $0xa8] ss:$16 sps:$4 sm:$0xff]  }
 0x82c   :  { %5617 = vmatpush2.bf16.msra.mxu1 %v10467_v10  ;;  %v10506_v10 = vld [vmem:[#allocation11 + $0x2e8] ss:$16 sps:$4 sm:$0xff]  }
 0x82d   :  { %5618 = vmatprep.subr.bf16.mxu1 %v10475_v35 }
 0x830   :  { %5619 = vmatpush2.bf16.msra.mxu1 %v10473_v37  ;;  %v10514_v37 = vld [vmem:[#allocation11 + $0x2cc] ss:$16 sps:$4 sm:$0xff]  }
 0x831   :  { %5620 = vmatprep.subr.bf16.mxu1 %v10481_v11  ;;  %v10512_v11 = vld [vmem:[#allocation11 + $0x2c8] ss:$16 sps:$4 sm:$0xff]  }
 0x834   :  { %5621 = vmatpush2.bf16.msra.mxu1 %v10479_v2  ;;  %v10520_v2 = vld [vmem:[#allocation11 + $0x2ac] ss:$16 sps:$4 sm:$0xff]  }
 0x835   :  { %5622 = vmatprep.subr.bf16.mxu1 %v10487_v12  ;;  %v10518_v12 = vld [vmem:[#allocation11 + $0x2a8] ss:$16 sps:$4 sm:$0xff]  }
 0x838   :  { %5623 = vmatpush2.bf16.msra.mxu1 %v10485_v16  ;;  %v10526_v16 = vld [vmem:[#allocation11 + $0x28c] ss:$16 sps:$4 sm:$0xff]  }
 0x839   :  { %5674 = vmatprep.subr.bf16.mxu1 %v10496_v31  ;;  %v10529_v31 = vld [vmem:[#allocation11 + $0x2c] ss:$16 sps:$4 sm:$0xff]  }
 0x8b3   :  { %v4647_v56 = vpop.f32.mrf.mxu1 }
 0x8b4   :  { %v4735_v33 = vmul.f32 %v4647_v56, %v12903_v28  ;;  %v10494_v28 = vld [vmem:[#allocation11 + $0xe8] ss:$16 sps:$4 sm:$0xff]   ;;  %v10538_v56 = vld [vmem:[#allocation11 + $0x24c] ss:$16 sps:$4 sm:$0xff]  }
 0x8b5   :  { %v4649_v3 = vpop.f32.mrf.mxu1 }
 0x8b6   :  { %v4736_v63 = vmul.f32 %v4649_v3, %v12899_v20  ;;  %v10533_v3 = vld [vmem:[#allocation11 + $0x8] ss:$16 sps:$4 sm:$0xff]  }
 0x8b7   :  { %v4653_v34 = vpop.f32.mrf.mxu1 }
 0x8b8   :  { %v4739_v18 = vadd.f32 %v4735_v33, %v4653_v34  ;;  %v10536_v33 = vld [vmem:[#allocation11 + $0x248] ss:$16 sps:$4 sm:$0xff]   ;;  %v10541_v34 = vld [vmem:[#allocation11 + $0x1ec] ss:$16 sps:$4 sm:$0xff]  }
 0x8b9   :  { %v4655_v8 = vpop.f32.mrf.mxu1 }
 0x8ba   :  { %vm4743_vm9 = vcmp.ge.f32.partialorder %v4739_v18, 0.0  ;;  %v4748_v5 = vmul.f32 %v4747_v23, %v4739_v18  ;;  %v4740_v19 = vadd.f32 %v4736_v63, %v4655_v8  ;;  %v10539_v63 = vld [vmem:[#allocation11 + $0x1e8] ss:$16 sps:$4 sm:$0xff]   ;;  %v10547_v8 = vld [vmem:[#allocation11 + $0x1cc] ss:$16 sps:$4 sm:$0xff]  }
 0x8bb   :  { %v4724_v42 = vpop.f32.mrf.mxu1 }
 0x8bc   :  { %vm4744_vm8 = vcmp.ge.f32.partialorder %v4740_v19, 0.0  ;;  %v4749_v53 = vmul.f32 %v4747_v23, %v4740_v19  ;;  %v4752_v60 = vsel %vm4743_vm9, %v4739_v18, %v4748_v5  ;;  %v4737_v61 = vmul.f32 %v4724_v42, %v12905_v45  ;;  %v10500_v45 = vld [vmem:[#allocation11 + $0xc8] ss:$16 sps:$4 sm:$0xff]   ;;  %v10550_v5 = vld [vmem:[#allocation11 + $0x20c] ss:$16 sps:$4 sm:$0xff]  }
 0x8bd   :  { %v4726_v57 = vpop.f32.mrf.mxu1  ;;  %v12968_v43 = vpack.c.bf16 %v4752_v60, %v4752_v60  ;;  %v10542_v18 = vld [vmem:[#allocation11 + $0x228] ss:$16 sps:$4 sm:$0xff]   ;;  %v10556_v60 = vld [vmem:[#allocation11 + $0x3ec] ss:$16 sps:$4 sm:$0xff]  }
 0x8be   :  { %v4753_v32 = vsel %vm4744_vm8, %v4740_v19, %v4749_v53  ;;  %v4738_v20 = vmul.f32 %v4726_v57, %v12901_v22  ;;  %v10545_v19 = vld [vmem:[#allocation11 + $0x1c8] ss:$16 sps:$4 sm:$0xff]   ;;  %v10553_v53 = vld [vmem:[#allocation11 + $0x1ac] ss:$16 sps:$4 sm:$0xff]  }
 0x8bf   :  { %v4730_v25 = vpop.f32.mrf.mxu1  ;;  %v4821_v1 = vpack.c.bf16 %v4753_v32, %v4753_v32  ;;  %v10548_v42 = vld [vmem:[#allocation11 + $0x208] ss:$16 sps:$4 sm:$0xff]   ;;  %v10559_v32 = vld [vmem:[#allocation11 + $0x18c] ss:$16 sps:$4 sm:$0xff]  }
 0x8c0   :  { %v4741_v0 = vadd.f32 %v4737_v61, %v4730_v25  ;;  %v10551_v57 = vld [vmem:[#allocation11 + $0x1a8] ss:$16 sps:$4 sm:$0xff]   ;;  %v10562_v25 = vld [vmem:[#allocation11 + $0x3cc] ss:$16 sps:$4 sm:$0xff]  }
 0x8c1   :  { %v4732_v9 = vpop.f32.mrf.mxu1  ;;  %5624 = vmatprep.mubr.bf16.mxu1 %v4821_v1  ;;  %v10554_v61 = vld [vmem:[#allocation11 + $0x3e8] ss:$16 sps:$4 sm:$0xff]  }
 0x8c2   :  { %vm4745_vm6 = vcmp.ge.f32.partialorder %v4741_v0, 0.0  ;;  %v4750_v26 = vmul.f32 %v4747_v23, %v4741_v0  ;;  %v4742_v38 = vadd.f32 %v4738_v20, %v4732_v9  ;;  %5625 = vmatmul.mubr.bf16.vlgmr.msra.gmra.mxu1 %v12968_v43  ;;  %v10565_v20 = vld [vmem:[#allocation11 + $0x16c] ss:$16 sps:$4 sm:$0xff]   ;;  %v10566_v9 = vld [vmem:[#allocation11 + $0x3a8] ss:$16 sps:$4 sm:$0xff]  }
 0x8c3   :  { %5675 = vmatpush1.bf16.msra.mxu1 %v10494_v28  ;;  %5706 = vmatprep.mubr.bf16.mxu1 %v4821_v1  ;;  %v10557_v1 = vld [vmem:[#allocation11 + $0x188] ss:$16 sps:$4 sm:$0xff]  }
 0x8c4   :  { %vm4746_vm5 = vcmp.ge.f32.partialorder %v4742_v38, 0.0  ;;  %v4751_v6 = vmul.f32 %v4747_v23, %v4742_v38  ;;  %5676 = vmatprep.subr.bf16.mxu1 %v10502_v58  ;;  %v4754_v44 = vsel %vm4745_vm6, %v4741_v0, %v4750_v26  ;;  %v10544_v23 = vld [vmem:[#allocation11 + $0x22c] ss:$16 sps:$4 sm:$0xff]   ;;  %v10560_v28 = vld [vmem:[#allocation11 + $0x3c8] ss:$16 sps:$4 sm:$0xff]  }
 0x8c5   :  { %v12972_v35 = vpack.c.bf16 %v4754_v44, %v4754_v44  ;;  %v10568_v0 = vld [vmem:[#allocation11 + $0x3ac] ss:$16 sps:$4 sm:$0xff]   ;;  %v10563_v58 = vld [vmem:[#allocation11 + $0x168] ss:$16 sps:$4 sm:$0xff]  }
 0x8c6   :  { %v4755_v4 = vsel %vm4746_vm5, %v4742_v38, %v4751_v6  ;;  %v10571_v26 = vld [vmem:[#allocation11 + $0x14c] ss:$16 sps:$4 sm:$0xff]   ;;  %v10572_v6 = vld [vmem:[#allocation11 + $0x388] ss:$16 sps:$4 sm:$0xff]  }
 0x8c7   :  { %5677 = vmatpush1.bf16.msra.mxu1 %v10500_v45  ;;  %v4823_v22 = vpack.c.bf16 %v4755_v4, %v4755_v4  ;;  %v10574_v38 = vld [vmem:[#allocation11 + $0x38c] ss:$16 sps:$4 sm:$0xff]   ;;  %v10569_v45 = vld [vmem:[#allocation11 + $0x148] ss:$16 sps:$4 sm:$0xff]  }
 0x8c8   :  { %5678 = vmatprep.subr.bf16.mxu1 %v10505_v27  ;;  %v10577_v27 = vld [vmem:[#allocation11 + $0x12c] ss:$16 sps:$4 sm:$0xff]   ;;  %v10575_v4 = vld [vmem:[#allocation11 + $0x128] ss:$16 sps:$4 sm:$0xff]  }
 0x8c9   :  { %5665 = vmatprep.mubr.bf16.mxu0 %v4823_v22  ;;  %v10580_v44 = vld [vmem:[#allocation11 + $0x36c] ss:$16 sps:$4 sm:$0xff]  }
 0x8ca   :  { %5666 = vmatmul.mubr.bf16.vlgmr.msra.gmra.mxu0 %v12972_v35 }
 0x8cb   :  { %5679 = vmatpush1.bf16.msra.mxu1 %v10503_v24  ;;  %5716 = vmatpush1.bf16.msra.mxu0 %v10506_v10  ;;  %v10583_v24 = vld [vmem:[#allocation11 + $0x10c] ss:$16 sps:$4 sm:$0xff]  }
 0x8cc   :  { %5747 = vmatprep.mubr.bf16.mxu0 %v4823_v22  ;;  %5680 = vmatprep.subr.bf16.mxu1 %v10511_v30  ;;  %v10578_v22 = vld [vmem:[#allocation11 + $0x368] ss:$16 sps:$4 sm:$0xff]   ;;  %v10586_v10 = vld [vmem:[#allocation11 + $0x34c] ss:$16 sps:$4 sm:$0xff]  }
 0x8cd   :  { %5717 = vmatprep.subr.bf16.mxu0 %v10514_v37  ;;  %v10581_v30 = vld [vmem:[#allocation11 + $0x108] ss:$16 sps:$4 sm:$0xff]  }
 0x8ce   :  { %v10584_v37 = vld [vmem:[#allocation11 + $0x348] ss:$16 sps:$4 sm:$0xff]  }
 0x8cf   :  { %5681 = vmatpush1.bf16.msra.mxu1 %v10509_v52  ;;  %5718 = vmatpush1.bf16.msra.mxu0 %v10512_v11  ;;  %v10589_v52 = vld [vmem:[#allocation11 + $0x32c] ss:$16 sps:$4 sm:$0xff]   ;;  %v10592_v11 = vld [vmem:[#allocation9 + $0xe4] ss:$16 sps:$4 sm:$0xff]  }
 0x8d0   :  { %5682 = vmatprep.subr.bf16.mxu1 %v10517_v36  ;;  %5719 = vmatprep.subr.bf16.mxu0 %v10520_v2  ;;  %v10587_v36 = vld [vmem:[#allocation11 + $0x328] ss:$16 sps:$4 sm:$0xff]   ;;  %v10590_v2 = vld [vmem:[#allocation9 + $0xe0] ss:$16 sps:$4 sm:$0xff]  }
 0x8d3   :  { %5683 = vmatpush1.bf16.msra.mxu1 %v10515_v46  ;;  %5720 = vmatpush1.bf16.msra.mxu0 %v10518_v12  ;;  %v10595_v46 = vld [vmem:[#allocation11 + $0x30c] ss:$16 sps:$4 sm:$0xff]   ;;  %v10598_v12 = vld [vmem:[#allocation9 + $0xc4] ss:$16 sps:$4 sm:$0xff]  }
 0x8d4   :  { %5684 = vmatprep.subr.bf16.mxu1 %v10523_v49  ;;  %5721 = vmatprep.subr.bf16.mxu0 %v10526_v16  ;;  %v10593_v49 = vld [vmem:[#allocation11 + $0x308] ss:$16 sps:$4 sm:$0xff]   ;;  %v10596_v16 = vld [vmem:[#allocation9 + $0xc0] ss:$16 sps:$4 sm:$0xff]  }
 0x8d7   :  { %5685 = vmatpush1.bf16.msra.mxu1 %v10521_v47  ;;  %5722 = vmatpush1.bf16.msra.mxu0 %v10524_v15  ;;  %v10601_v47 = vld [vmem:[#allocation9 + $0xa4] ss:$16 sps:$4 sm:$0xff]   ;;  %v10604_v15 = vld [vmem:[#allocation9 + $0xec] ss:$16 sps:$4 sm:$0xff]  }
 0x8d8   :  { %5686 = vmatprep.subr.bf16.mxu1 %v10529_v31  ;;  %5723 = vmatprep.subr.bf16.mxu0 %v10532_v41  ;;  %v10599_v31 = vld [vmem:[#allocation9 + $0xa0] ss:$16 sps:$4 sm:$0xff]   ;;  %v10602_v41 = vld [vmem:[#allocation9 + $0xe8] ss:$16 sps:$4 sm:$0xff]  }
 0x8db   :  { %5687 = vmatpush1.bf16.msra.mxu1 %v10527_v17  ;;  %5724 = vmatpush1.bf16.msra.mxu0 %v10530_v59  ;;  %v10607_v17 = vld [vmem:[#allocation9 + $0x84] ss:$16 sps:$4 sm:$0xff]   ;;  %v10610_v59 = vld [vmem:[#allocation9 + $0xcc] ss:$16 sps:$4 sm:$0xff]  }
 0x8dc   :  { %5688 = vmatprep.subr.bf16.mxu1 %v10535_v51  ;;  %5725 = vmatprep.subr.bf16.mxu0 %v10538_v56  ;;  %v10608_v51 = vld [vmem:[#allocation9 + $0xc8] ss:$16 sps:$4 sm:$0xff]   ;;  %v10613_v56 = vld [vmem:[#allocation9 + $0x64] ss:$16 sps:$4 sm:$0xff]  }
 0x8df   :  { %5689 = vmatpush1.bf16.msra.mxu1 %v10533_v3  ;;  %5726 = vmatpush1.bf16.msra.mxu0 %v10536_v33  ;;  %v10616_v3 = vld [vmem:[#allocation9 + $0xac] ss:$16 sps:$4 sm:$0xff]   ;;  %v10611_v33 = vld [vmem:[#allocation9 + $0x60] ss:$16 sps:$4 sm:$0xff]  }
 0x8e0   :  { %5690 = vmatprep.subr.bf16.mxu1 %v10541_v34  ;;  %5727 = vmatprep.subr.bf16.mxu0 %v10544_v23  ;;  %v10614_v34 = vld [vmem:[#allocation9 + $0xa8] ss:$16 sps:$4 sm:$0xff]   ;;  %v10619_v23 = vld [vmem:[#allocation9 + $0x44] ss:$16 sps:$4 sm:$0xff]  }
 0x8e3   :  { %5691 = vmatpush2.bf16.msra.mxu1 %v10539_v63  ;;  %5728 = vmatpush1.bf16.msra.mxu0 %v10542_v18  ;;  %v10622_v63 = vld [vmem:[#allocation9 + $0x8c] ss:$16 sps:$4 sm:$0xff]   ;;  %v10620_v18 = vld [vmem:[#allocation9 + $0x88] ss:$16 sps:$4 sm:$0xff]  }
 0x8e4   :  { %5692 = vmatprep.subr.bf16.mxu1 %v10547_v8  ;;  %5729 = vmatprep.subr.bf16.mxu0 %v10550_v5  ;;  %v10625_v8 = vld [vmem:[#allocation9 + $0x24] ss:$16 sps:$4 sm:$0xff]   ;;  %v10623_v5 = vld [vmem:[#allocation9 + $0x20] ss:$16 sps:$4 sm:$0xff]  }
 0x8e7   :  { %5693 = vmatpush2.bf16.msra.mxu1 %v10545_v19  ;;  %5730 = vmatpush1.bf16.msra.mxu0 %v10548_v42  ;;  %v10626_v19 = vld [vmem:[#allocation9 + $0x68] ss:$16 sps:$4 sm:$0xff]   ;;  %v10631_v42 = vld [vmem:[#allocation9 + $0x4] ss:$16 sps:$4 sm:$0xff]  }
 0x8e8   :  { %5694 = vmatprep.subr.bf16.mxu1 %v10553_v53  ;;  %5731 = vmatprep.subr.bf16.mxu0 %v10556_v60  ;;  %v10634_v53 = vld [vmem:[#allocation9 + $0x4c] ss:$16 sps:$4 sm:$0xff]   ;;  %v10629_v60 = vld [vmem:[#allocation9] ss:$16 sps:$4 sm:$0xff]  }
 0x8eb   :  { %5695 = vmatpush2.bf16.msra.mxu1 %v10551_v57  ;;  %5732 = vmatpush2.bf16.msra.mxu0 %v10554_v61  ;;  %v10632_v57 = vld [vmem:[#allocation9 + $0x48] ss:$16 sps:$4 sm:$0xff]   ;;  %v10637_v61 = vld [vmem:[#allocation9 + $0x1e4] ss:$16 sps:$4 sm:$0xff]  }
 0x8ec   :  { %5696 = vmatprep.subr.bf16.mxu1 %v10559_v32  ;;  %5733 = vmatprep.subr.bf16.mxu0 %v10562_v25  ;;  %v10640_v32 = vld [vmem:[#allocation9 + $0x2c] ss:$16 sps:$4 sm:$0xff]   ;;  %v10635_v25 = vld [vmem:[#allocation9 + $0x1e0] ss:$16 sps:$4 sm:$0xff]  }
 0x8ef   :  { %5697 = vmatpush2.bf16.msra.mxu1 %v10557_v1  ;;  %5734 = vmatpush2.bf16.msra.mxu0 %v10560_v28  ;;  %v10638_v1 = vld [vmem:[#allocation9 + $0x28] ss:$16 sps:$4 sm:$0xff]   ;;  %v10643_v28 = vld [vmem:[#allocation9 + $0x1c4] ss:$16 sps:$4 sm:$0xff]  }
 0x8f0   :  { %5698 = vmatprep.subr.bf16.mxu1 %v10565_v20  ;;  %5735 = vmatprep.subr.bf16.mxu0 %v10568_v0  ;;  %v10646_v20 = vld [vmem:[#allocation9 + $0xc] ss:$16 sps:$4 sm:$0xff]   ;;  %v10641_v0 = vld [vmem:[#allocation9 + $0x1c0] ss:$16 sps:$4 sm:$0xff]  }
 0x8f3   :  { %5699 = vmatpush2.bf16.msra.mxu1 %v10563_v58  ;;  %5736 = vmatpush2.bf16.msra.mxu0 %v10566_v9  ;;  %v10644_v58 = vld [vmem:[#allocation9 + $0x8] ss:$16 sps:$4 sm:$0xff]   ;;  %v10649_v9 = vld [vmem:[#allocation9 + $0x1a4] ss:$16 sps:$4 sm:$0xff]  }
 0x8f4   :  { %5700 = vmatprep.subr.bf16.mxu1 %v10571_v26  ;;  %5737 = vmatprep.subr.bf16.mxu0 %v10574_v38  ;;  %v10652_v26 = vld [vmem:[#allocation9 + $0x1ec] ss:$16 sps:$4 sm:$0xff]   ;;  %v10647_v38 = vld [vmem:[#allocation9 + $0x1a0] ss:$16 sps:$4 sm:$0xff]  }
 0x8f7   :  { %5701 = vmatpush2.bf16.msra.mxu1 %v10569_v45  ;;  %5738 = vmatpush2.bf16.msra.mxu0 %v10572_v6  ;;  %v10650_v45 = vld [vmem:[#allocation9 + $0x1e8] ss:$16 sps:$4 sm:$0xff]   ;;  %v10655_v6 = vld [vmem:[#allocation9 + $0x184] ss:$16 sps:$4 sm:$0xff]  }
 0x8f8   :  { %5702 = vmatprep.subr.bf16.mxu1 %v10577_v27  ;;  %5739 = vmatprep.subr.bf16.mxu0 %v10580_v44  ;;  %v10658_v27 = vld [vmem:[#allocation9 + $0x1cc] ss:$16 sps:$4 sm:$0xff]   ;;  %v10653_v44 = vld [vmem:[#allocation9 + $0x180] ss:$16 sps:$4 sm:$0xff]  }
 0x8fb   :  { %5703 = vmatpush2.bf16.msra.mxu1 %v10575_v4  ;;  %5740 = vmatpush2.bf16.msra.mxu0 %v10578_v22  ;;  %v10656_v4 = vld [vmem:[#allocation9 + $0x1c8] ss:$16 sps:$4 sm:$0xff]   ;;  %v10661_v22 = vld [vmem:[#allocation9 + $0x164] ss:$16 sps:$4 sm:$0xff]  }
 0x8fc   :  { %5704 = vmatprep.subr.bf16.mxu1 %v10583_v24  ;;  %5741 = vmatprep.subr.bf16.mxu0 %v10586_v10  ;;  %v10664_v24 = vld [vmem:[#allocation9 + $0x1ac] ss:$16 sps:$4 sm:$0xff]   ;;  %v10659_v10 = vld [vmem:[#allocation9 + $0x160] ss:$16 sps:$4 sm:$0xff]  }
 0x8ff   :  { %5705 = vmatpush2.bf16.msra.mxu1 %v10581_v30  ;;  %5742 = vmatpush2.bf16.msra.mxu0 %v10584_v37  ;;  %v10662_v30 = vld [vmem:[#allocation9 + $0x1a8] ss:$16 sps:$4 sm:$0xff]   ;;  %v10667_v37 = vld [vmem:[#allocation9 + $0x144] ss:$16 sps:$4 sm:$0xff]  }
 0x900   :  { %5743 = vmatprep.subr.bf16.mxu0 %v10589_v52  ;;  %6076 = vmatprep.subr.bf16.mxu1 %v10592_v11  ;;  %v10670_v52 = vld [vmem:[#allocation9 + $0x18c] ss:$16 sps:$4 sm:$0xff]   ;;  %v10665_v11 = vld [vmem:[#allocation9 + $0x140] ss:$16 sps:$4 sm:$0xff]  }
 0x902   :  { %5707 = vmatmul.mubr.bf16.vlgmr.msra.gmra.mxu1 %v12968_v43  ;;  %v10605_v43 = vld [vmem:[#allocation9 + $0x80] ss:$16 sps:$4 sm:$0xff]  }
 0x903   :  { %5744 = vmatpush2.bf16.msra.mxu0 %v10587_v36  ;;  %6077 = vmatpush1.bf16.msra.mxu1 %v10590_v2  ;;  %v10668_v36 = vld [vmem:[#allocation9 + $0x188] ss:$16 sps:$4 sm:$0xff]   ;;  %v10673_v2 = vld [vmem:[#allocation9 + $0x124] ss:$16 sps:$4 sm:$0xff]  }
 0x904   :  { %6108 = vmatprep.mubr.bf16.mxu1 %v12476_v14  ;;  %5745 = vmatprep.subr.bf16.mxu0 %v10595_v46  ;;  %v10676_v46 = vld [vmem:[#allocation9 + $0x16c] ss:$16 sps:$4 sm:$0xff]  }
 0x905   :  { %6078 = vmatprep.subr.bf16.mxu1 %v10598_v12  ;;  %v10671_v12 = vld [vmem:[#allocation9 + $0x120] ss:$16 sps:$4 sm:$0xff]  }
 0x907   :  { %5746 = vmatpush2.bf16.msra.mxu0 %v10593_v49  ;;  %6079 = vmatpush1.bf16.msra.mxu1 %v10596_v16  ;;  %v10674_v49 = vld [vmem:[#allocation9 + $0x168] ss:$16 sps:$4 sm:$0xff]   ;;  %v10679_v16 = vld [vmem:[#allocation9 + $0x104] ss:$16 sps:$4 sm:$0xff]  }
 0x908   :  { %6080 = vmatprep.subr.bf16.mxu1 %v10601_v47  ;;  %6117 = vmatprep.subr.bf16.mxu0 %v10604_v15  ;;  %v10682_v47 = vld [vmem:[#allocation9 + $0x14c] ss:$16 sps:$4 sm:$0xff]   ;;  %v10677_v15 = vld [vmem:[#allocation9 + $0x100] ss:$16 sps:$4 sm:$0xff]  }
 0x90a   :  { %5748 = vmatmul.mubr.bf16.vlgmr.msra.gmra.mxu0 %v12972_v35  ;;  %v10617_v35 = vld [vmem:[#allocation9 + $0x40] ss:$16 sps:$4 sm:$0xff]  }
 0x90b   :  { %6081 = vmatpush1.bf16.msra.mxu1 %v10599_v31  ;;  %6118 = vmatpush1.bf16.msra.mxu0 %v10602_v41  ;;  %v10680_v31 = vld [vmem:[#allocation9 + $0x148] ss:$16 sps:$4 sm:$0xff]   ;;  %v10685_v41 = vld [vmem:[#allocation9 + $0x12c] ss:$16 sps:$4 sm:$0xff]  }
 0x90c   :  { %6149 = vmatprep.mubr.bf16.mxu0 %v12476_v14  ;;  %6082 = vmatprep.subr.bf16.mxu1 %v10607_v17  ;;  %v10628_v14 = vld [vmem:[#allocation9 + $0x6c] ss:$16 sps:$4 sm:$0xff]   ;;  %v10683_v17 = vld [vmem:[#allocation9 + $0x128] ss:$16 sps:$4 sm:$0xff]  }
 0x90d   :  { %6119 = vmatprep.subr.bf16.mxu0 %v10610_v59  ;;  %v10688_v59 = vld [vmem:[#allocation9 + $0x10c] ss:$16 sps:$4 sm:$0xff]  }
 0x90f   :  { %6083 = vmatpush1.bf16.msra.mxu1 %v10605_v43  ;;  %6120 = vmatpush1.bf16.msra.mxu0 %v10608_v51  ;;  %v13801_v43 = vmov 0.015625   ;;  %v13802_v51 = vld [vmem:[#allocation20_spill] sm:$0xff] }
 0x910   :  { %6084 = vmatprep.subr.bf16.mxu1 %v10613_v56  ;;  %6121 = vmatprep.subr.bf16.mxu0 %v10616_v3  ;;  %vm13803_vm10 = vnez %v13802_v51  ;;  %v10686_v56 = vld [vmem:[#allocation9 + $0x108] ss:$16 sps:$4 sm:$0xff]  }
 0x911   :  { %v13804_v3 = vld [vmem:[#allocation21_spill] sm:$0xff] }
 0x912   :  { %vm13805_vm12 = vnez %v13804_v3  ;;  %v13900_v51 = vld [vmem:[#allocation93_spill] sm:$0xff]  ;;  %v13904_v3 = vld [vmem:[#allocation95_spill] sm:$0xff] }
 0x913   :  { %6085 = vmatpush1.bf16.msra.mxu1 %v10611_v33  ;;  %6122 = vmatpush1.bf16.msra.mxu0 %v10614_v34  ;;  %v13806_v33 = vld [vmem:[#allocation22_spill] sm:$0xff]  ;;  %v13808_v34 = vld [vmem:[#allocation23_spill] sm:$0xff] }
 0x914   :  { %6086 = vmatprep.subr.bf16.mxu1 %v10619_v23  ;;  %6123 = vmatprep.subr.bf16.mxu0 %v10622_v63  ;;  %vm13807_vm4 = vnez %v13806_v33  ;;  %vm13809_vm11 = vnez %v13808_v34  ;;  %v13810_v23 = vld [vmem:[#allocation24_spill] sm:$0xff]  ;;  %v13812_v63 = vld [vmem:[#allocation25_spill] sm:$0xff]  ;;  %v13906_v33 = vld [vmem:[#allocation99_spill] sm:$0xff] }
 0x915   :  { %vm13811_vm15 = vnez %v13810_v23  ;;  %vm13813_vm7 = vnez %v13812_v63  ;;  %v13908_v34 = vld [vmem:[#allocation104_spill] sm:$0xff]  ;;  %v13910_v23 = vld [vmem:[#allocation121_spill] sm:$0xff]  ;;  %v13912_v63 = vld [vmem:[#allocation106_spill] sm:$0xff] }
 0x917   :  { %6087 = vmatpush1.bf16.msra.mxu1 %v10617_v35  ;;  %6124 = vmatpush1.bf16.msra.mxu0 %v10620_v18  ;;  %v13814_v35 = vld [vmem:[#allocation26_spill] sm:$0xff] }
 0x918   :  { %6088 = vmatprep.subr.bf16.mxu1 %v10625_v8  ;;  %6125 = vmatprep.subr.bf16.mxu0 %v10628_v14  ;;  %vm13815_vm9 = vnez %v13814_v35  ;;  %v13816_v18 = vld [vmem:[#allocation50_spill] sm:$0xff]  ;;  %v13818_v8 = vld [vmem:[#allocation27_spill] sm:$0xff]  ;;  %v13820_v14 = vld [vmem:[#allocation28_spill] sm:$0xff] }
 0x919   :  { %vm13817_vm8 = vnez %v13816_v18  ;;  %vm13819_vm6 = vnez %v13818_v8  ;;  %vm13821_vm5 = vnez %v13820_v14  ;;  %v13914_v35 = vld [vmem:[#allocation108_spill] sm:$0xff]  ;;  %v13916_v18 = vld [vmem:[#allocation110_spill] sm:$0xff]  ;;  %v13920_v14 = vld [vmem:[#allocation113_spill] sm:$0xff] }
 0x91a   :  { %v13918_v8 = vld [vmem:[#allocation112_spill] sm:$0xff] }
 0x91b   :  { %6089 = vmatpush1.bf16.msra.mxu1 %v10623_v5  ;;  %6126 = vmatpush1.bf16.msra.mxu0 %v10626_v19  ;;  %v13822_v5 = vld [vmem:[#allocation29_spill] sm:$0xff]  ;;  %v13824_v19 = vld [vmem:[#allocation51_spill] sm:$0xff] }
 0x91c   :  { %6090 = vmatprep.subr.bf16.mxu1 %v10631_v42  ;;  %6127 = vmatprep.subr.bf16.mxu0 %v10634_v53  ;;  %v13826_v42 = vld [vmem:[#allocation30_spill] sm:$0xff] }
 0x91f   :  { %6091 = vmatpush1.bf16.msra.mxu1 %v10629_v60  ;;  %6128 = vmatpush1.bf16.msra.mxu0 %v10632_v57  ;;  %v13832_v57 = vld [vmem:[#allocation33_spill] sm:$0xff] }
 0x920   :  { %6092 = vmatprep.subr.bf16.mxu1 %v10637_v61  ;;  %6129 = vmatprep.subr.bf16.mxu0 %v10640_v32  ;;  %v13834_v61 = vld [vmem:[#allocation57_spill] sm:$0xff]  ;;  %v13836_v32 = vld [vmem:[#allocation34_spill] sm:$0xff] }
 0x923   :  { %6093 = vmatpush2.bf16.msra.mxu1 %v10635_v25  ;;  %6130 = vmatpush1.bf16.msra.mxu0 %v10638_v1  ;;  %v13839_v1 = vld [vmem:[#allocation35_spill] sm:$0xff] }
 0x924   :  { %6094 = vmatprep.subr.bf16.mxu1 %v10643_v28  ;;  %6131 = vmatprep.subr.bf16.mxu0 %v10646_v20  ;;  %v13842_v20 = vld [vmem:[#allocation36_spill] sm:$0xff] }
 0x927   :  { %6095 = vmatpush2.bf16.msra.mxu1 %v10641_v0  ;;  %6132 = vmatpush1.bf16.msra.mxu0 %v10644_v58  ;;  %v13845_v58 = vld [vmem:[#allocation37_spill] sm:$0xff] }
 0x928   :  { %6096 = vmatprep.subr.bf16.mxu1 %v10649_v9  ;;  %6133 = vmatprep.subr.bf16.mxu0 %v10652_v26  ;;  %v13847_v9 = vld [vmem:[#allocation70_spill] sm:$0xff] }
 0x929   :  { %v13849_v26 = vld [vmem:[#allocation38_spill] sm:$0xff] }
 0x92b   :  { %6097 = vmatpush2.bf16.msra.mxu1 %v10647_v38  ;;  %6134 = vmatpush2.bf16.msra.mxu0 %v10650_v45  ;;  %v13852_v45 = vld [vmem:[#allocation42_spill] sm:$0xff] }
 0x92c   :  { %6098 = vmatprep.subr.bf16.mxu1 %v10655_v6  ;;  %6135 = vmatprep.subr.bf16.mxu0 %v10658_v27  ;;  %v13854_v6 = vld [vmem:[#allocation73_spill] sm:$0xff]  ;;  %v13856_v27 = vld [vmem:[#allocation47_spill] sm:$0xff] }
 0x92f   :  { %6099 = vmatpush2.bf16.msra.mxu1 %v10653_v44  ;;  %6136 = vmatpush2.bf16.msra.mxu0 %v10656_v4  ;;  %v13858_v44 = vld [vmem:[#allocation76_spill] sm:$0xff] }
 0x930   :  { %6100 = vmatprep.subr.bf16.mxu1 %v10661_v22  ;;  %6137 = vmatprep.subr.bf16.mxu0 %v10664_v24  ;;  %v13860_v4 = vld [vmem:[#allocation48_spill] sm:$0xff]  ;;  %v13862_v22 = vld [vmem:[#allocation79_spill] sm:$0xff]  ;;  %v13864_v24 = vld [vmem:[#allocation49_spill] sm:$0xff] }
 0x933   :  { %6101 = vmatpush2.bf16.msra.mxu1 %v10659_v10  ;;  %6138 = vmatpush2.bf16.msra.mxu0 %v10662_v30  ;;  %v13866_v10 = vld [vmem:[#allocation81_spill] sm:$0xff] }
 0x934   :  { %6102 = vmatprep.subr.bf16.mxu1 %v10667_v37  ;;  %6139 = vmatprep.subr.bf16.mxu0 %v10670_v52  ;;  %v13868_v30 = vld [vmem:[#allocation53_spill] sm:$0xff]  ;;  %v13870_v37 = vld [vmem:[#allocation83_spill] sm:$0xff]  ;;  %v13872_v52 = vld [vmem:[#allocation56_spill] sm:$0xff] }
 0x937   :  { %6103 = vmatpush2.bf16.msra.mxu1 %v10665_v11  ;;  %6140 = vmatpush2.bf16.msra.mxu0 %v10668_v36  ;;  %v13874_v11 = vld [vmem:[#allocation85_spill] sm:$0xff] }
 0x938   :  { %6104 = vmatprep.subr.bf16.mxu1 %v10673_v2  ;;  %6141 = vmatprep.subr.bf16.mxu0 %v10676_v46  ;;  %v13876_v36 = vld [vmem:[#allocation61_spill] sm:$0xff]  ;;  %v13878_v2 = vld [vmem:[#allocation88_spill] sm:$0xff] }
 0x939   :  { %v13880_v46 = vld [vmem:[#allocation69_spill] sm:$0xff] }
 0x93b   :  { %6105 = vmatpush2.bf16.msra.mxu1 %v10671_v12  ;;  %6142 = vmatpush2.bf16.msra.mxu0 %v10674_v49  ;;  %v13882_v12 = vld [vmem:[#allocation90_spill] sm:$0xff] }
 0x93c   :  { %6106 = vmatprep.subr.bf16.mxu1 %v10679_v16  ;;  %6143 = vmatprep.subr.bf16.mxu0 %v10682_v47  ;;  %v13884_v49 = vld [vmem:[#allocation78_spill] sm:$0xff]  ;;  %v13886_v16 = vld [vmem:[#allocation92_spill] sm:$0xff]  ;;  %v13888_v47 = vld [vmem:[#allocation87_spill] sm:$0xff] }
 0x93f   :  { %6107 = vmatpush2.bf16.msra.mxu1 %v10677_v15  ;;  %6144 = vmatpush2.bf16.msra.mxu0 %v10680_v31  ;;  %v13890_v15 = vld [vmem:[#allocation94_spill] sm:$0xff]  ;;  %v13892_v31 = vld [vmem:[#allocation89_spill] sm:$0xff] }
 0x940   :  { %6145 = vmatprep.subr.bf16.mxu0 %v10685_v41  ;;  %9733 = vmatprep.subr.msk.mxu1 %vm13803_vm10, %v13801_v43  ;;  %vm13823_vm10 = vnez %v13822_v5  ;;  %v13894_v41 = vld [vmem:[#allocation96_spill] sm:$0xff]  ;;  %v13922_v5 = vld [vmem:[#allocation114_spill] sm:$0xff] }
 0x942   :  { %6109 = vmatmul.mubr.bf16.vlgmr.msra.gmra.mxu1 %v12485_v62 }
 0x943   :  { %6146 = vmatpush2.bf16.msra.mxu0 %v10683_v17  ;;  %9734 = vmatpush3.msk.msra.mxu1 %vm13805_vm12, %v13801_v43  ;;  %vm13825_vm12 = vnez %v13824_v19  ;;  %v13896_v17 = vld [vmem:[#allocation91_spill] sm:$0xff] }
 0x944   :  { %6147 = vmatprep.subr.bf16.mxu0 %v10688_v59  ;;  %9735 = vmatprep.subr.msk.mxu1 %vm13807_vm4, %v13801_v43  ;;  %vm13827_vm4 = vnez %v13826_v42  ;;  %v13898_v59 = vld [vmem:[#allocation97_spill] sm:$0xff]  ;;  %v13924_v19 = vld [vmem:[#allocation115_spill] sm:$0xff]  ;;  %v13926_v42 = vld [vmem:[#allocation122_spill] sm:$0xff] }
 0x945   :  { %9736 = vmatpush3.msk.msra.mxu1 %vm13809_vm11, %v13801_v43 }
 0x946   :  { %9737 = vmatprep.subr.msk.mxu1 %vm13811_vm15, %v13801_v43  ;;  %vm13833_vm15 = vnez %v13832_v57 }
 0x947   :  { %6148 = vmatpush2.bf16.msra.mxu0 %v10686_v56  ;;  %9738 = vmatpush3.msk.msra.mxu1 %vm13813_vm7, %v13801_v43  ;;  %vm13835_vm7 = vnez %v13834_v61  ;;  %v13902_v56 = vld [vmem:[#allocation98_spill] sm:$0xff] }
 0x948   :  { %9739 = vmatprep.subr.msk.mxu1 %vm13815_vm9, %v13801_v43  ;;  %9771 = vmatprep.subr.msk.mxu0 %vm13817_vm8, %v13801_v43  ;;  %vm13837_vm9 = vnez %v13836_v32  ;;  %vm13846_vm8 = vnez %v13845_v58 }
 0x949   :  { %9740 = vmatpush3.msk.msra.mxu1 %vm13819_vm6, %v13801_v43  ;;  %vm13850_vm6 = vnez %v13849_v26 }
 0x94a   :  { %6150 = vmatmul.mubr.bf16.vlgmr.msra.gmra.mxu0 %v12485_v62  ;;  %9741 = vmatprep.subr.msk.mxu1 %vm13821_vm5, %v13801_v43  ;;  %v13829_v62 = vld [vmem:[#allocation32_spill] sm:$0xff]  ;;  %vm13857_vm5 = vnez %v13856_v27 }
 0x94b   :  { %9742 = vmatpush3.msk.msra.mxu1 %vm13823_vm10, %v13801_v43  ;;  %9772 = vmatpush3.msk.msra.mxu0 %vm13825_vm12, %v13801_v43  ;;  %vm13830_vm11 = vnez %v13829_v62  ;;  %vm13859_vm10 = vnez %v13858_v44  ;;  %vm13861_vm12 = vnez %v13860_v4  ;;  %v6158_v44 = vld [vmem:[%s13265_s10] sm:$0xf]  ;;  %s9214_s10 = sld [smem:[#allocation2 + $0x3]] }
 0x94c   :  { %9743 = vmatprep.subr.msk.mxu1 %vm13827_vm4, %v13801_v43  ;;  %9773 = vmatprep.subr.msk.mxu0 %vm11754_vm1, %v13801_v43  ;;  %vm13840_vm1 = vnez %v13839_v1  ;;  %vm13865_vm4 = vnez %v13864_v24 }
 0x94d   :  { %9744 = vmatpush3.msk.msra.mxu1 %vm13830_vm11, %v13801_v43  ;;  %9774 = vmatpush3.msk.msra.mxu0 %vm11772_vm0, %v13801_v43  ;;  %vm13843_vm0 = vnez %v13842_v20  ;;  %vm13867_vm11 = vnez %v13866_v10  ;;  %v6163_v10 = vrot.slane %v6158_v44, %v12135_v39 }
 0x94e   :  { %9745 = vmatprep.subr.msk.mxu1 %vm13833_vm15, %v13801_v43  ;;  %9775 = vmatprep.subr.msk.mxu0 %vm13835_vm7, %v13801_v43  ;;  %vm13869_vm15 = vnez %v13868_v30  ;;  %vm13871_vm7 = vnez %v13870_v37 }
 0x94f   :  { %9746 = vmatpush3.msk.msra.mxu1 %vm13837_vm9, %v13801_v43  ;;  %9776 = vmatpush3.msk.msra.mxu0 %vm11817_vm2, %v13801_v43  ;;  %vm13848_vm2 = vnez %v13847_v9  ;;  %vm13873_vm9 = vnez %v13872_v52 }
 0x950   :  { %9747 = vmatprep.subr.msk.mxu1 %vm13840_vm1, %v13801_v43  ;;  %9777 = vmatprep.subr.msk.mxu0 %vm11835_vm13, %v13801_v43  ;;  %vm13853_vm13 = vnez %v13852_v45  ;;  %vm13875_vm1 = vnez %v13874_v11 }
 0x951   :  { %9748 = vmatpush3.msk.msra.mxu1 %vm13843_vm0, %v13801_v43  ;;  %9778 = vmatpush3.msk.msra.mxu0 %vm11854_vm14, %v13801_v43  ;;  %vm13855_vm14 = vnez %v13854_v6  ;;  %vm13877_vm0 = vnez %v13876_v36 }
 0x952   :  { %9749 = vmatprep.subr.msk.mxu1 %vm13846_vm8, %v13801_v43  ;;  %9779 = vmatprep.subr.msk.mxu0 %vm13848_vm2, %v13801_v43  ;;  %vm13879_vm8 = vnez %v13878_v2  ;;  %vm13881_vm2 = vnez %v13880_v46 }
 0x953   :  { %9750 = vmatpush3.msk.msra.mxu1 %vm13850_vm6, %v13801_v43  ;;  %9780 = vmatpush3.msk.msra.mxu0 %vm11890_vm3, %v13801_v43  ;;  %vm13863_vm3 = vnez %v13862_v22  ;;  %vm13883_vm6 = vnez %v13882_v12  ;;  %v6167_v22 = vrot.slane %v6158_v44, %v12138_v7 }
 0x954   :  { %9751 = vmatprep.subr.msk.mxu1 %vm13853_vm13, %v13801_v43  ;;  %9781 = vmatprep.subr.msk.mxu0 %vm13855_vm14, %v13801_v43  ;;  %vm13885_vm13 = vnez %v13884_v49  ;;  %vm13887_vm14 = vnez %v13886_v16  ;;  %v6175_v16 = vrot.slane %v6158_v44, %v13797_v29 }
 0x955   :  { %9752 = vmatpush3.msk.msra.mxu1 %vm13857_vm5, %v13801_v43  ;;  %9782 = vmatpush3.msk.msra.mxu0 %vm13859_vm10, %v13801_v43  ;;  %vm13889_vm5 = vnez %v13888_v47  ;;  %vm13891_vm10 = vnez %v13890_v15  ;;  %v13928_v47 = vld [vmem:[#allocation120_spill] sm:$0xff] }
 0x956   :  { %9753 = vmatprep.subr.msk.mxu1 %vm13861_vm12, %v13801_v43  ;;  %9783 = vmatprep.subr.msk.mxu0 %vm13863_vm3, %v13801_v43  ;;  %vm13893_vm12 = vnez %v13892_v31  ;;  %vm13895_vm3 = vnez %v13894_v41  ;;  %v6171_v31 = vrot.slane %v6158_v44, %v13798_v40  ;;  %v10695_v44 = vld [vmem:[#allocation14 + $0xc0] ss:$16 sps:$4 sm:$0xff]  }
 0x957   :  { %9754 = vmatpush3.msk.msra.mxu1 %vm13865_vm4, %v13801_v43  ;;  %9784 = vmatpush3.msk.msra.mxu0 %vm13867_vm11, %v13801_v43  ;;  %vm13897_vm4 = vnez %v13896_v17  ;;  %vm13899_vm11 = vnez %v13898_v59 }
 0x958   :  { %9755 = vmatprep.subr.msk.mxu1 %vm13869_vm15, %v13801_v43  ;;  %9785 = vmatprep.subr.msk.mxu0 %vm13871_vm7, %v13801_v43  ;;  %vm13901_vm15 = vnez %v13900_v51  ;;  %vm13903_vm7 = vnez %v13902_v56 }
 0x959   :  { %9756 = vmatpush3.msk.msra.mxu1 %vm13873_vm9, %v13801_v43  ;;  %9786 = vmatpush3.msk.msra.mxu0 %vm13875_vm1, %v13801_v43  ;;  %vm13905_vm9 = vnez %v13904_v3  ;;  %vm13907_vm1 = vnez %v13906_v33 }
 0x95a   :  { %9757 = vmatprep.subr.msk.mxu1 %vm13877_vm0, %v13801_v43  ;;  %9787 = vmatprep.subr.msk.mxu0 %vm13879_vm8, %v13801_v43  ;;  %vm13909_vm0 = vnez %v13908_v34  ;;  %vm13911_vm8 = vnez %v13910_v23  ;;  %v13930_v23 = vld [vmem:[#allocation123_spill] sm:$0xff] }
 0x95b   :  { %9758 = vmatpush3.msk.msra.mxu1 %vm13881_vm2, %v13801_v43  ;;  %9788 = vmatpush3.msk.msra.mxu0 %vm13883_vm6, %v13801_v43  ;;  %vm13913_vm2 = vnez %v13912_v63  ;;  %vm13915_vm6 = vnez %v13914_v35  ;;  %v10691_v35 = vld [vmem:[#allocation14 + $0xe4] ss:$16 sps:$4 sm:$0xff]  }
 0x95c   :  { %9759 = vmatprep.subr.msk.mxu1 %vm13885_vm13, %v13801_v43  ;;  %9789 = vmatprep.subr.msk.mxu0 %vm13887_vm14, %v13801_v43  ;;  %vm13917_vm13 = vnez %v13916_v18  ;;  %vm13919_vm14 = vnez %v13918_v8  ;;  %v10694_v18 = vld [vmem:[#allocation14 + $0x2e4] ss:$16 sps:$4 sm:$0xff]  }
 0x95d   :  { %9760 = vmatpush3.msk.msra.mxu1 %vm13889_vm5, %v13801_v43  ;;  %9790 = vmatpush3.msk.msra.mxu0 %vm13891_vm10, %v13801_v43  ;;  %vm13921_vm5 = vnez %v13920_v14  ;;  %vm13923_vm10 = vnez %v13922_v5 }
 0x95e   :  { %9761 = vmatprep.subr.msk.mxu1 %vm13893_vm12, %v13801_v43  ;;  %9791 = vmatprep.subr.msk.mxu0 %vm13895_vm3, %v13801_v43  ;;  %vm13925_vm12 = vnez %v13924_v19  ;;  %vm13927_vm3 = vnez %v13926_v42 }
 0x95f   :  { %9762 = vmatpush3.msk.msra.mxu1 %vm13897_vm4, %v13801_v43  ;;  %9792 = vmatpush3.msk.msra.mxu0 %vm13899_vm11, %v13801_v43  ;;  %vm13929_vm4 = vnez %v13928_v47  ;;  %vm13931_vm11 = vnez %v13930_v23  ;;  %v10721_v47 = vld [vmem:[#allocation14 + $0x44] ss:$16 sps:$4 sm:$0xff]  }
 0x960   :  { %9763 = vmatprep.subr.msk.mxu1 %vm13901_vm15, %v13801_v43  ;;  %9793 = vmatprep.subr.msk.mxu0 %vm13903_vm7, %v13801_v43  ;;  %v10736_v23 = vld [vmem:[#allocation14 + $0x204] ss:$16 sps:$4 sm:$0xff]  }
 0x961   :  { %9764 = vmatpush3.msk.msra.mxu1 %vm13905_vm9, %v13801_v43  ;;  %9794 = vmatpush3.msk.msra.mxu0 %vm13907_vm1, %v13801_v43 }
 0x962   :  { %9795 = vmatprep.subr.msk.mxu0 %vm13909_vm0, %v13801_v43  ;;  %9279 = vmatprep.subr.msk.mxu1 %vm13911_vm8, %v13689_v48 }
 0x963   :  { %9796 = vmatpush3.msk.msra.mxu0 %vm13913_vm2, %v13801_v43 }
 0x964   :  { %9797 = vmatprep.subr.msk.mxu0 %vm13915_vm6, %v13801_v43 }
 0x965   :  { %9798 = vmatpush3.msk.msra.mxu0 %vm13917_vm13, %v13801_v43 }
 0x966   :  { %9799 = vmatprep.subr.msk.mxu0 %vm13919_vm14, %v13801_v43 }
 0x967   :  { %9800 = vmatpush3.msk.msra.mxu0 %vm13921_vm5, %v13801_v43 }
 0x968   :  { %9801 = vmatprep.subr.msk.mxu0 %vm13923_vm10, %v13801_v43 }
 0x969   :  { %9802 = vmatpush3.msk.msra.mxu0 %vm13925_vm12, %v13801_v43 }
 0x96a   :  { %9281 = vmatprep.subr.msk.mxu0 %vm13927_vm3, %v13689_v48 }
 0x982   :  { %v5626_v53 = vpop.f32.mrf.mxu1 }
 0x984   :  { %v5628_v62 = vpop.f32.mrf.mxu1 }
 0x986   :  { %v5630_v60 = vpop.f32.mrf.mxu1 }
 0x988   :  { %v5631_v57 = vpop.f32.mrf.mxu1 }
 0x98a   :  { %v5667_v61 = vpop.f32.mrf.mxu0 }
 0x98b   :  { %v5668_v32 = vadd.f32 %v5667_v61, %v5626_v53 }
 0x98c   :  { %v5669_v25 = vpop.f32.mrf.mxu0 }
 0x98d   :  { %v5670_v1 = vadd.f32 %v5669_v25, %v5628_v62 }
 0x98e   :  { %v5671_v28 = vpop.f32.mrf.mxu0 }
 0x990   :  { %v5672_v20 = vpop.f32.mrf.mxu0 }
 0x9c2   :  { %v5708_v0 = vpop.f32.mrf.mxu1 }
 0x9c4   :  { %v5710_v58 = vpop.f32.mrf.mxu1 }
 0x9c6   :  { %v5712_v9 = vpop.f32.mrf.mxu1 }
 0x9c7   :  { %v10689_v9 = vld [vmem:[#allocation14 + $0xe0] ss:$16 sps:$4 sm:$0xff]  }
 0x9c8   :  { %v5713_v26 = vpop.f32.mrf.mxu1 }
 0x9c9   :  { %v10692_v26 = vld [vmem:[#allocation14 + $0x2e0] ss:$16 sps:$4 sm:$0xff]  }
 0x9ca   :  { %v5749_v38 = vpop.f32.mrf.mxu0 }
 0x9cb   :  { %v5750_v43 = vadd.f32 %v5749_v38, %v5708_v0 }
 0x9cc   :  { %v5751_v45 = vpop.f32.mrf.mxu0 }
 0x9cd   :  { %v5752_v49 = vadd.f32 %v5751_v45, %v5710_v58  ;;  %v10700_v45 = vld [vmem:[#allocation14 + $0x2c4] ss:$16 sps:$4 sm:$0xff]  }
 0x9ce   :  { %v5753_v6 = vpop.f32.mrf.mxu0 }
 0x9d0   :  { %v5754_v27 = vpop.f32.mrf.mxu0 }
 0xa02   :  { %v6110_v4 = vpop.f32.mrf.mxu1 }
 0xa03   :  { %v6111_v24 = vadd.f32 %v6110_v4, %v5668_v32  ;;  %v10698_v4 = vld [vmem:[#allocation14 + $0x2c0] ss:$16 sps:$4 sm:$0xff]  }
 0xa04   :  { %v6112_v30 = vpop.f32.mrf.mxu1 }
 0xa05   :  { %v6113_v37 = vadd.f32 %v6112_v30, %v5670_v1  ;;  %v13186_v36 = vadd.f32 %v6163_v10, %v6111_v24  ;;  %v10706_v24 = vld [vmem:[#allocation14 + $0x2a4] ss:$16 sps:$4 sm:$0xff]   ;;  %v10701_v10 = vld [vmem:[#allocation14 + $0xa0] ss:$16 sps:$4 sm:$0xff]  }
 0xa06   :  { %v6114_v52 = vpop.f32.mrf.mxu1  ;;  %v10704_v30 = vld [vmem:[#allocation14 + $0x2a0] ss:$16 sps:$4 sm:$0xff]  }
 0xa07   :  { %v13184_v11 = vadd.f32 %v6167_v22, %v6113_v37  ;;  %v6185_v17 = vmul.f32 %v13186_v36, %v13186_v36  ;;  %v10703_v22 = vld [vmem:[#allocation14 + $0xa4] ss:$16 sps:$4 sm:$0xff]  }
 0xa08   :  { %v6115_v2 = vpop.f32.mrf.mxu1  ;;  %v10709_v37 = vld [vmem:[#allocation14 + $0x84] ss:$16 sps:$4 sm:$0xff]  }
 0xa09   :  { %6253 = vmatprep.mubr.f32.mxu1 %v13184_v11  ;;  %v6186_v46 = vmul.f32 %v13184_v11, %v13184_v11  ;;  %v10712_v52 = vld [vmem:[#allocation14 + $0x284] ss:$16 sps:$4 sm:$0xff]   ;;  %v10710_v2 = vld [vmem:[#allocation14 + $0x280] ss:$16 sps:$4 sm:$0xff]  }
 0xa0a   :  { %v6151_v12 = vpop.f32.mrf.mxu0  ;;  %6254 = vmatmul.mubr.f32.vlgmr.msra.gmra.mxu1 %v13186_v36 }
 0xa0b   :  { %6258 = vmatprep.mubr.f32.mxu1 %v6186_v46  ;;  %9280 = vmatpush1.msk.msra.mxu1 %vm13929_vm4, %v13689_v48  ;;  %v6152_v15 = vadd.f32 %v6151_v12, %v5750_v43  ;;  %v10697_v43 = vld [vmem:[#allocation14 + $0xc4] ss:$16 sps:$4 sm:$0xff]  }
 0xa0c   :  { %v6153_v41 = vpop.f32.mrf.mxu0  ;;  %7421 = vmatprep.subr.bf16.mxu1 %v10691_v35  ;;  %v10715_v46 = vld [vmem:[#allocation14 + $0x64] ss:$16 sps:$4 sm:$0xff]   ;;  %v10734_v35 = vld [vmem:[#allocation14 + $0x200] ss:$16 sps:$4 sm:$0xff]  }
 0xa0d   :  { %v6154_v59 = vadd.f32 %v6153_v41, %v5752_v49  ;;  %v13202_v3 = vadd.f32 %v6171_v31, %v6152_v15  ;;  %v10718_v12 = vld [vmem:[#allocation14 + $0x264] ss:$16 sps:$4 sm:$0xff]   ;;  %v10713_v49 = vld [vmem:[#allocation14 + $0x60] ss:$16 sps:$4 sm:$0xff]  }
 0xa0e   :  { %v6155_v51 = vpop.f32.mrf.mxu0  ;;  %6259 = vmatmul.mubr.f32.gmra.mxu1 %v6185_v17  ;;  %v10724_v15 = vld [vmem:[#allocation14 + $0x244] ss:$16 sps:$4 sm:$0xff]   ;;  %v10719_v31 = vld [vmem:[#allocation14 + $0x40] ss:$16 sps:$4 sm:$0xff]  }
 0xa0f   :  { %v13199_v56 = vadd.f32 %v6175_v16, %v6154_v59  ;;  %6410 = vmatprep.mubr.f32.mxu1 %v13687_v54  ;;  %v6187_v63 = vmul.f32 %v13202_v3, %v13202_v3  ;;  %v10716_v16 = vld [vmem:[#allocation14 + $0x260] ss:$16 sps:$4 sm:$0xff]   ;;  %v10727_v17 = vld [vmem:[#allocation14 + $0x24] ss:$16 sps:$4 sm:$0xff]  }
 0xa10   :  { %v6156_v33 = vpop.f32.mrf.mxu0  ;;  %v10722_v41 = vld [vmem:[#allocation14 + $0x240] ss:$16 sps:$4 sm:$0xff]   ;;  %v10730_v59 = vld [vmem:[#allocation14 + $0x224] ss:$16 sps:$4 sm:$0xff]  }
 0xa11   :  { %6328 = vmatprep.mubr.f32.mxu0 %v13199_v56  ;;  %v6188_v34 = vmul.f32 %v13199_v56, %v13199_v56  ;;  %v10725_v51 = vld [vmem:[#allocation14 + $0x20] ss:$16 sps:$4 sm:$0xff]  }
 0xa12   :  { %6329 = vmatmul.mubr.f32.vlgmr.msra.gmra.mxu0 %v13202_v3  ;;  %v10728_v33 = vld [vmem:[#allocation14 + $0x220] ss:$16 sps:$4 sm:$0xff]  }
 0xa13   :  { %6333 = vmatprep.mubr.f32.mxu0 %v6188_v34  ;;  %9282 = vmatpush1.msk.msra.mxu0 %vm13931_vm11, %v13689_v48  ;;  %v10733_v34 = vld [vmem:[#allocation14 + $0x4] ss:$16 sps:$4 sm:$0xff]  }
 0xa14   :  { %7462 = vmatprep.subr.bf16.mxu0 %v10694_v18  ;;  %v10739_v18 = vld [vmem:[#allocation14 + $0x1e4] ss:$16 sps:$4 sm:$0xff]  }
 0xa16   :  { %6334 = vmatmul.mubr.f32.gmra.mxu0 %v6187_v63  ;;  %v10731_v63 = vld [vmem:[#allocation14] ss:$16 sps:$4 sm:$0xff]  }
 0xa17   :  { %6487 = vmatprep.mubr.f32.mxu0 %v13687_v54 }
 0xaca   :  { %v9765_v8 = vpop.f32.mrf.mxu1 }
 0xacc   :  { %v9766_v14 = vpop.f32.mrf.mxu1 }
 0xacd   :  { %v9767_v53 = vadd.f32 %v9766_v14, %v9765_v8  ;;  %v10742_v8 = vld [vmem:[#allocation14 + $0x3e4] ss:$16 sps:$4 sm:$0xff]   ;;  %v10737_v14 = vld [vmem:[#allocation14 + $0x1e0] ss:$16 sps:$4 sm:$0xff]  }
 0xace   :  { %v9768_v5 = vpop.f32.mrf.mxu1 }
 0xad0   :  { %v9769_v60 = vpop.f32.mrf.mxu1 }
 0xad1   :  { %v9770_v32 = vadd.f32 %v9769_v60, %v9768_v5  ;;  %v10740_v5 = vld [vmem:[#allocation14 + $0x3e0] ss:$16 sps:$4 sm:$0xff]   ;;  %v10751_v60 = vld [vmem:[#allocation14 + $0x1a4] ss:$16 sps:$4 sm:$0xff]  }
 0xad2   :  { %v9803_v19 = vpop.f32.mrf.mxu0 }
 0xad4   :  { %v9804_v42 = vpop.f32.mrf.mxu0 }
 0xad5   :  { %v9805_v62 = vadd.f32 %v9804_v42, %v9803_v19  ;;  %v10745_v19 = vld [vmem:[#allocation14 + $0x1c4] ss:$16 sps:$4 sm:$0xff]  }
 0xad6   :  { %v9806_v57 = vpop.f32.mrf.mxu0  ;;  %v10748_v42 = vld [vmem:[#allocation14 + $0x3c4] ss:$16 sps:$4 sm:$0xff]  }
 0xad7   :  { %v6331_v48 = vadd.f32 %v9805_v62, %v9767_v53  ;;  %v10743_v53 = vld [vmem:[#allocation14 + $0x1c0] ss:$16 sps:$4 sm:$0xff]  }
 0xad8   :  { %v9807_v61 = vpop.f32.mrf.mxu0  ;;  %v10746_v62 = vld [vmem:[#allocation14 + $0x3c0] ss:$16 sps:$4 sm:$0xff]  }
 0xad9   :  { %v9808_v25 = vadd.f32 %v9807_v61, %v9806_v57  ;;  %v6339_v1 = vmul.f32 %v6331_v48, %v6331_v48  ;;  %v6344_v6 = vsub.f32 0.0, %v6331_v48  ;;  %v10754_v57 = vld [vmem:[#allocation14 + $0x3a4] ss:$16 sps:$4 sm:$0xff]   ;;  %v10749_v48 = vld [vmem:[#allocation14 + $0x1a0] ss:$16 sps:$4 sm:$0xff]  }
 0xada   :  { %v10752_v61 = vld [vmem:[#allocation14 + $0x3a0] ss:$16 sps:$4 sm:$0xff]  }
 0xadb   :  { %v6336_v28 = vadd.f32 %v9808_v25, %v9770_v32  ;;  %v10757_v32 = vld [vmem:[#allocation14 + $0x184] ss:$16 sps:$4 sm:$0xff]  }
 0xadc   :  { %v10760_v25 = vld [vmem:[#allocation14 + $0x384] ss:$16 sps:$4 sm:$0xff]  }
 0xadd   :  { %v6340_v20 = vsub.f32 %v6336_v28, %v6339_v1  ;;  %v10755_v1 = vld [vmem:[#allocation14 + $0x180] ss:$16 sps:$4 sm:$0xff]  }
 0xade   :  { %v10758_v28 = vld [vmem:[#allocation14 + $0x380] ss:$16 sps:$4 sm:$0xff]  }
 0xadf   :  { %v6341_v0 = vmax.f32 %v6340_v20, 0.0  ;;  %v10763_v20 = vld [vmem:[#allocation14 + $0x164] ss:$16 sps:$4 sm:$0xff]  }
 0xae1   :  { %v6342_v58 = vadd.f32 1e-05, %v6341_v0  ;;  %v10766_v0 = vld [vmem:[#allocation14 + $0x364] ss:$16 sps:$4 sm:$0xff]  }
 0xae3   :  { %11079 = vrsqrt.f32 %v6342_v58  ;;  %v10761_v58 = vld [vmem:[#allocation14 + $0x160] ss:$16 sps:$4 sm:$0xff]  }
 0xaf0   :  { %v11080_v38 = vpop.eup %11079 }
 0xaf1   :  { %6411 = vmatmul.mubr.f32.vlgmr.msra.gmra.mxu1 %v11080_v38  ;;  %6488 = vmatmul.mubr.f32.vlgmr.msra.gmra.mxu0 %v11080_v38  ;;  %v6345_v27 = vmul.f32 %v11080_v38, %v6344_v6  ;;  %v10772_v38 = vld [vmem:[#allocation14 + $0x344] ss:$16 sps:$4 sm:$0xff]  }
 0xaf2   :  { %6416 = vmatprep.mubr.f32.mxu1 %v13687_v54  ;;  %6493 = vmatprep.mubr.f32.mxu0 %v13687_v54  ;;  %v10707_v54 = vld [vmem:[#allocation14 + $0x80] ss:$16 sps:$4 sm:$0xff]   ;;  %v10775_v6 = vld [vmem:[#allocation14 + $0x124] ss:$16 sps:$4 sm:$0xff]  }
 0xaf3   :  { %7422 = vmatpush1.bf16.msra.mxu1 %v10689_v9  ;;  %7463 = vmatpush1.bf16.msra.mxu0 %v10692_v26  ;;  %v10764_v9 = vld [vmem:[#allocation14 + $0x360] ss:$16 sps:$4 sm:$0xff]   ;;  %v10769_v26 = vld [vmem:[#allocation14 + $0x144] ss:$16 sps:$4 sm:$0xff]  }
 0xaf4   :  { %7423 = vmatprep.subr.bf16.mxu1 %v10697_v43  ;;  %7464 = vmatprep.subr.bf16.mxu0 %v10700_v45  ;;  %v10767_v43 = vld [vmem:[#allocation14 + $0x140] ss:$16 sps:$4 sm:$0xff]  }
 0xaf5   :  { %6417 = vmatmul.mubr.f32.gmra.mxu1 %v6345_v27  ;;  %6494 = vmatmul.mubr.f32.gmra.mxu0 %v6345_v27  ;;  %v10770_v45 = vld [vmem:[#allocation14 + $0x340] ss:$16 sps:$4 sm:$0xff]   ;;  %v10778_v27 = vld [vmem:[#allocation14 + $0x324] ss:$16 sps:$4 sm:$0xff]  }
 0xaf7   :  { %7424 = vmatpush1.bf16.msra.mxu1 %v10695_v44  ;;  %7465 = vmatpush1.bf16.msra.mxu0 %v10698_v4  ;;  %v10773_v44 = vld [vmem:[#allocation14 + $0x120] ss:$16 sps:$4 sm:$0xff]  }
 0xaf8   :  { %7425 = vmatprep.subr.bf16.mxu1 %v10703_v22  ;;  %7466 = vmatprep.subr.bf16.mxu0 %v10706_v24  ;;  %v10776_v4 = vld [vmem:[#allocation14 + $0x320] ss:$16 sps:$4 sm:$0xff]   ;;  %v10781_v22 = vld [vmem:[#allocation14 + $0x104] ss:$16 sps:$4 sm:$0xff]  }
 0xaf9   :  { %v10784_v24 = vld [vmem:[#allocation14 + $0x304] ss:$16 sps:$4 sm:$0xff]  }
 0xafb   :  { %7426 = vmatpush1.bf16.msra.mxu1 %v10701_v10  ;;  %7467 = vmatpush1.bf16.msra.mxu0 %v10704_v30  ;;  %v10779_v10 = vld [vmem:[#allocation14 + $0x100] ss:$16 sps:$4 sm:$0xff]  }
 0xafc   :  { %7427 = vmatprep.subr.bf16.mxu1 %v10709_v37  ;;  %7468 = vmatprep.subr.bf16.mxu0 %v10712_v52  ;;  %v10782_v30 = vld [vmem:[#allocation14 + $0x300] ss:$16 sps:$4 sm:$0xff]   ;;  %v10787_v37 = vld [vmem:[#allocation14 + $0xec] ss:$16 sps:$4 sm:$0xff]  }
 0xafd   :  { %v10790_v52 = vld [vmem:[#allocation14 + $0x2ec] ss:$16 sps:$4 sm:$0xff]  }
 0xaff   :  { %7428 = vmatpush1.bf16.msra.mxu1 %v10707_v54  ;;  %7469 = vmatpush1.bf16.msra.mxu0 %v10710_v2 }
 0xb00   :  { %7429 = vmatprep.subr.bf16.mxu1 %v10715_v46  ;;  %7470 = vmatprep.subr.bf16.mxu0 %v10718_v12 }
 0xb03   :  { %7430 = vmatpush1.bf16.msra.mxu1 %v10713_v49  ;;  %7471 = vmatpush1.bf16.msra.mxu0 %v10716_v16 }
 0xb04   :  { %7431 = vmatprep.subr.bf16.mxu1 %v10721_v47  ;;  %7472 = vmatprep.subr.bf16.mxu0 %v10724_v15  ;;  %v6512_v15 = vstv %s9214_s10 }
 0xb07   :  { %7432 = vmatpush1.bf16.msra.mxu1 %v10719_v31  ;;  %7473 = vmatpush1.bf16.msra.mxu0 %v10722_v41 }
 0xb08   :  { %7433 = vmatprep.subr.bf16.mxu1 %v10727_v17  ;;  %7474 = vmatprep.subr.bf16.mxu0 %v10730_v59 }
 0xb0b   :  { %7434 = vmatpush1.bf16.msra.mxu1 %v10725_v51  ;;  %7475 = vmatpush1.bf16.msra.mxu0 %v10728_v33 }
 0xb0c   :  { %7435 = vmatprep.subr.bf16.mxu1 %v10733_v34  ;;  %7476 = vmatprep.subr.bf16.mxu0 %v10736_v23 }
 0xb0f   :  { %7436 = vmatpush1.bf16.msra.mxu1 %v10731_v63  ;;  %7477 = vmatpush1.bf16.msra.mxu0 %v10734_v35 }
 0xb10   :  { %7437 = vmatprep.subr.bf16.mxu1 %v10739_v18  ;;  %7478 = vmatprep.subr.bf16.mxu0 %v10742_v8 }
 0xb13   :  { %7438 = vmatpush2.bf16.msra.mxu1 %v10737_v14  ;;  %7479 = vmatpush2.bf16.msra.mxu0 %v10740_v5 }
 0xb14   :  { %7439 = vmatprep.subr.bf16.mxu1 %v10745_v19  ;;  %7480 = vmatprep.subr.bf16.mxu0 %v10748_v42 }
 0xb17   :  { %7440 = vmatpush2.bf16.msra.mxu1 %v10743_v53  ;;  %7481 = vmatpush2.bf16.msra.mxu0 %v10746_v62  ;;  %v10788_v62 = vld [vmem:[#allocation14 + $0x2e8] ss:$16 sps:$4 sm:$0xff]  }
 0xb18   :  { %7441 = vmatprep.subr.bf16.mxu1 %v10751_v60  ;;  %7482 = vmatprep.subr.bf16.mxu0 %v10754_v57  ;;  %v10793_v57 = vld [vmem:[#allocation14 + $0xcc] ss:$16 sps:$4 sm:$0xff]  }
 0xb1b   :  { %7442 = vmatpush2.bf16.msra.mxu1 %v10749_v48  ;;  %7483 = vmatpush2.bf16.msra.mxu0 %v10752_v61  ;;  %v10796_v48 = vld [vmem:[#allocation14 + $0x2cc] ss:$16 sps:$4 sm:$0xff]   ;;  %v10791_v61 = vld [vmem:[#allocation14 + $0xc8] ss:$16 sps:$4 sm:$0xff]  }
 0xb1c   :  { %7443 = vmatprep.subr.bf16.mxu1 %v10757_v32  ;;  %7484 = vmatprep.subr.bf16.mxu0 %v10760_v25  ;;  %v10794_v32 = vld [vmem:[#allocation14 + $0x2c8] ss:$16 sps:$4 sm:$0xff]   ;;  %v10799_v25 = vld [vmem:[#allocation14 + $0xac] ss:$16 sps:$4 sm:$0xff]  }
 0xb1f   :  { %7444 = vmatpush2.bf16.msra.mxu1 %v10755_v1  ;;  %7485 = vmatpush2.bf16.msra.mxu0 %v10758_v28  ;;  %v10802_v1 = vld [vmem:[#allocation14 + $0x2ac] ss:$16 sps:$4 sm:$0xff]   ;;  %v10797_v28 = vld [vmem:[#allocation14 + $0xa8] ss:$16 sps:$4 sm:$0xff]  }
 0xb20   :  { %7445 = vmatprep.subr.bf16.mxu1 %v10763_v20  ;;  %7486 = vmatprep.subr.bf16.mxu0 %v10766_v0  ;;  %v10800_v20 = vld [vmem:[#allocation14 + $0x2a8] ss:$16 sps:$4 sm:$0xff]   ;;  %v10805_v0 = vld [vmem:[#allocation14 + $0x8c] ss:$16 sps:$4 sm:$0xff]  }
 0xb23   :  { %7446 = vmatpush2.bf16.msra.mxu1 %v10761_v58  ;;  %7487 = vmatpush2.bf16.msra.mxu0 %v10764_v9  ;;  %v10808_v58 = vld [vmem:[#allocation14 + $0x28c] ss:$16 sps:$4 sm:$0xff]   ;;  %v10803_v9 = vld [vmem:[#allocation14 + $0x88] ss:$16 sps:$4 sm:$0xff]  }
 0xb24   :  { %7447 = vmatprep.subr.bf16.mxu1 %v10769_v26  ;;  %7488 = vmatprep.subr.bf16.mxu0 %v10772_v38  ;;  %v10806_v26 = vld [vmem:[#allocation14 + $0x288] ss:$16 sps:$4 sm:$0xff]   ;;  %v10811_v38 = vld [vmem:[#allocation14 + $0x6c] ss:$16 sps:$4 sm:$0xff]  }
 0xb27   :  { %7448 = vmatpush2.bf16.msra.mxu1 %v10767_v43  ;;  %7489 = vmatpush2.bf16.msra.mxu0 %v10770_v45  ;;  %v10814_v43 = vld [vmem:[#allocation14 + $0x26c] ss:$16 sps:$4 sm:$0xff]   ;;  %v10809_v45 = vld [vmem:[#allocation14 + $0x68] ss:$16 sps:$4 sm:$0xff]  }
 0xb28   :  { %7449 = vmatprep.subr.bf16.mxu1 %v10775_v6  ;;  %7490 = vmatprep.subr.bf16.mxu0 %v10778_v27  ;;  %v10812_v6 = vld [vmem:[#allocation14 + $0x268] ss:$16 sps:$4 sm:$0xff]   ;;  %v10817_v27 = vld [vmem:[#allocation14 + $0x4c] ss:$16 sps:$4 sm:$0xff]  }
 0xb2b   :  { %7450 = vmatpush2.bf16.msra.mxu1 %v10773_v44  ;;  %7491 = vmatpush2.bf16.msra.mxu0 %v10776_v4  ;;  %v10820_v44 = vld [vmem:[#allocation14 + $0x24c] ss:$16 sps:$4 sm:$0xff]   ;;  %v10815_v4 = vld [vmem:[#allocation14 + $0x48] ss:$16 sps:$4 sm:$0xff]  }
 0xb2c   :  { %7451 = vmatprep.subr.bf16.mxu1 %v10781_v22  ;;  %7492 = vmatprep.subr.bf16.mxu0 %v10784_v24  ;;  %v10818_v22 = vld [vmem:[#allocation14 + $0x248] ss:$16 sps:$4 sm:$0xff]   ;;  %v10823_v24 = vld [vmem:[#allocation14 + $0x2c] ss:$16 sps:$4 sm:$0xff]  }
 0xb2f   :  { %7452 = vmatpush2.bf16.msra.mxu1 %v10779_v10  ;;  %7493 = vmatpush2.bf16.msra.mxu0 %v10782_v30  ;;  %v10826_v10 = vld [vmem:[#allocation14 + $0x22c] ss:$16 sps:$4 sm:$0xff]   ;;  %v10821_v30 = vld [vmem:[#allocation14 + $0x28] ss:$16 sps:$4 sm:$0xff]  }
 0xb30   :  { %7503 = vmatprep.subr.bf16.mxu1 %v10787_v37  ;;  %7544 = vmatprep.subr.bf16.mxu0 %v10790_v52  ;;  %v10824_v37 = vld [vmem:[#allocation14 + $0x228] ss:$16 sps:$4 sm:$0xff]   ;;  %v10829_v52 = vld [vmem:[#allocation14 + $0xc] ss:$16 sps:$4 sm:$0xff]  }
 0xbb1   :  { %v6412_v54 = vpop.f32.mrf.mxu1  ;;  %v6489_v2 = vpop.f32.mrf.mxu0 }
 0xbb2   :  { %v6500_v49 = vmul.f32 %v6412_v54, %v13186_v36  ;;  %v6502_v16 = vmul.f32 %v6489_v2, %v13202_v3  ;;  %v10832_v54 = vld [vmem:[#allocation14 + $0x20c] ss:$16 sps:$4 sm:$0xff]   ;;  %v10827_v2 = vld [vmem:[#allocation14 + $0x8] ss:$16 sps:$4 sm:$0xff]  }
 0xbb3   :  { %v6414_v46 = vpop.f32.mrf.mxu1  ;;  %v6491_v12 = vpop.f32.mrf.mxu0 }
 0xbb4   :  { %v6501_v59 = vmul.f32 %v6414_v46, %v13184_v11  ;;  %v6503_v51 = vmul.f32 %v6491_v12, %v13199_v56  ;;  %v10785_v11 = vld [vmem:[#allocation14 + $0xe8] ss:$16 sps:$4 sm:$0xff]   ;;  %v10835_v12 = vld [vmem:[#allocation14 + $0x1ec] ss:$16 sps:$4 sm:$0xff]  }
 0xbb5   :  { %v6418_v47 = vpop.f32.mrf.mxu1  ;;  %v6495_v31 = vpop.f32.mrf.mxu0  ;;  %v10830_v46 = vld [vmem:[#allocation14 + $0x208] ss:$16 sps:$4 sm:$0xff]  }
 0xbb6   :  { %v6504_v41 = vadd.f32 %v6500_v49, %v6418_v47  ;;  %v6506_v17 = vadd.f32 %v6502_v16, %v6495_v31  ;;  %v10838_v49 = vld [vmem:[#allocation14 + $0x3ec] ss:$16 sps:$4 sm:$0xff]   ;;  %v10833_v16 = vld [vmem:[#allocation14 + $0x1e8] ss:$16 sps:$4 sm:$0xff]  }
 0xbb7   :  { %v6420_v33 = vpop.f32.mrf.mxu1  ;;  %v6497_v34 = vpop.f32.mrf.mxu0  ;;  %v10836_v47 = vld [vmem:[#allocation14 + $0x3e8] ss:$16 sps:$4 sm:$0xff]   ;;  %v10844_v31 = vld [vmem:[#allocation14 + $0x3cc] ss:$16 sps:$4 sm:$0xff]  }
 0xbb8   :  { %v6513_v23 = vmul.f32 %v6512_v15, %v6504_v41  ;;  %vm6508_vm15 = vcmp.ge.f32.partialorder %v6504_v41, 0.0  ;;  %v6515_v63 = vmul.f32 %v6512_v15, %v6506_v17  ;;  %v6505_v35 = vadd.f32 %v6501_v59, %v6420_v33  ;;  %v10847_v59 = vld [vmem:[#allocation14 + $0x1ac] ss:$16 sps:$4 sm:$0xff]   ;;  %v10845_v33 = vld [vmem:[#allocation14 + $0x1a8] ss:$16 sps:$4 sm:$0xff]  }
 0xbb9   :  { %v6507_v18 = vadd.f32 %v6503_v51, %v6497_v34  ;;  %vm6510_vm7 = vcmp.ge.f32.partialorder %v6506_v17, 0.0  ;;  %v10850_v51 = vld [vmem:[#allocation14 + $0x3ac] ss:$16 sps:$4 sm:$0xff]   ;;  %v10848_v34 = vld [vmem:[#allocation14 + $0x3a8] ss:$16 sps:$4 sm:$0xff]  }
 0xbba   :  { %vm6509_vm9 = vcmp.ge.f32.partialorder %v6505_v35, 0.0  ;;  %v6514_v36 = vmul.f32 %v6512_v15, %v6505_v35  ;;  %v6517_v3 = vsel %vm6508_vm15, %v6504_v41, %v6513_v23  ;;  %v6519_v14 = vsel %vm6510_vm7, %v6506_v17, %v6515_v63  ;;  %v10839_v41 = vld [vmem:[#allocation14 + $0x1c8] ss:$16 sps:$4 sm:$0xff]   ;;  %v10853_v23 = vld [vmem:[#allocation14 + $0x18c] ss:$16 sps:$4 sm:$0xff]  }
 0xbbb   :  { %vm6511_vm1 = vcmp.ge.f32.partialorder %v6507_v18, 0.0  ;;  %v6516_v8 = vmul.f32 %v6512_v15, %v6507_v18  ;;  %v13220_v53 = vpack.c.bf16 %v6517_v3, %v6517_v3  ;;  %v13222_v60 = vpack.c.bf16 %v6519_v14, %v6519_v14  ;;  %v10841_v15 = vld [vmem:[#allocation14 + $0x1cc] ss:$16 sps:$4 sm:$0xff]   ;;  %v10842_v17 = vld [vmem:[#allocation14 + $0x3c8] ss:$16 sps:$4 sm:$0xff]  }
 0xbbc   :  { %v6518_v5 = vsel %vm6509_vm9, %v6505_v35, %v6514_v36  ;;  %v10856_v63 = vld [vmem:[#allocation14 + $0x38c] ss:$16 sps:$4 sm:$0xff]   ;;  %v10851_v35 = vld [vmem:[#allocation14 + $0x188] ss:$16 sps:$4 sm:$0xff]  }
 0xbbd   :  { %v6650_v19 = vpack.c.bf16 %v6518_v5, %v6518_v5  ;;  %v6520_v42 = vsel %vm6511_vm1, %v6507_v18, %v6516_v8  ;;  %v10854_v18 = vld [vmem:[#allocation14 + $0x388] ss:$16 sps:$4 sm:$0xff]   ;;  %v10859_v36 = vld [vmem:[#allocation14 + $0x16c] ss:$16 sps:$4 sm:$0xff]  }
 0xbbe   :  { %v6652_v56 = vpack.c.bf16 %v6520_v42, %v6520_v42  ;;  %v10862_v3 = vld [vmem:[#allocation14 + $0x36c] ss:$16 sps:$4 sm:$0xff]   ;;  %v10857_v8 = vld [vmem:[#allocation14 + $0x168] ss:$16 sps:$4 sm:$0xff]  }
 0xbbf   :  { %7453 = vmatprep.mubr.bf16.mxu1 %v6650_v19  ;;  %v10860_v14 = vld [vmem:[#allocation14 + $0x368] ss:$16 sps:$4 sm:$0xff]   ;;  %v10865_v5 = vld [vmem:[#allocation14 + $0x14c] ss:$16 sps:$4 sm:$0xff]  }
 0xbc0   :  { %7494 = vmatprep.mubr.bf16.mxu0 %v6652_v56  ;;  %7454 = vmatmul.mubr.bf16.vlgmr.msra.gmra.mxu1 %v13220_v53  ;;  %v10863_v42 = vld [vmem:[#allocation14 + $0x148] ss:$16 sps:$4 sm:$0xff]  }
 0xbc1   :  { %7495 = vmatmul.mubr.bf16.vlgmr.msra.gmra.mxu0 %v13222_v60  ;;  %7504 = vmatpush1.bf16.msra.mxu1 %v10785_v11  ;;  %v10866_v11 = vld [vmem:[#allocation14 + $0x348] ss:$16 sps:$4 sm:$0xff]  }
 0xbc2   :  { %7545 = vmatpush1.bf16.msra.mxu0 %v10788_v62  ;;  %7535 = vmatprep.mubr.bf16.mxu1 %v6650_v19  ;;  %v10868_v19 = vld [vmem:[#allocation14 + $0x34c] ss:$16 sps:$4 sm:$0xff]  }
 0xbc3   :  { %7576 = vmatprep.mubr.bf16.mxu0 %v6652_v56  ;;  %7505 = vmatprep.subr.bf16.mxu1 %v10793_v57  ;;  %v10871_v56 = vld [vmem:[#allocation14 + $0x12c] ss:$16 sps:$4 sm:$0xff]   ;;  %v10869_v57 = vld [vmem:[#allocation14 + $0x128] ss:$16 sps:$4 sm:$0xff]  }
 0xbc4   :  { %7546 = vmatprep.subr.bf16.mxu0 %v10796_v48  ;;  %v10874_v62 = vld [vmem:[#allocation14 + $0x32c] ss:$16 sps:$4 sm:$0xff]   ;;  %v10872_v48 = vld [vmem:[#allocation14 + $0x328] ss:$16 sps:$4 sm:$0xff]  }
 0xbc5   :  { %7506 = vmatpush1.bf16.msra.mxu1 %v10791_v61  ;;  %v10877_v61 = vld [vmem:[#allocation14 + $0x10c] ss:$16 sps:$4 sm:$0xff]  }
 0xbc6   :  { %7547 = vmatpush1.bf16.msra.mxu0 %v10794_v32  ;;  %7507 = vmatprep.subr.bf16.mxu1 %v10799_v25  ;;  %v10880_v32 = vld [vmem:[#allocation14 + $0x30c] ss:$16 sps:$4 sm:$0xff]   ;;  %v10875_v25 = vld [vmem:[#allocation14 + $0x108] ss:$16 sps:$4 sm:$0xff]  }
 0xbc7   :  { %7548 = vmatprep.subr.bf16.mxu0 %v10802_v1  ;;  %v10878_v1 = vld [vmem:[#allocation14 + $0x308] ss:$16 sps:$4 sm:$0xff]  }
 0xbc9   :  { %7508 = vmatpush1.bf16.msra.mxu1 %v10797_v28  ;;  %v10883_v28 = vld [vmem:[#allocation12 + $0xe4] ss:$16 sps:$4 sm:$0xff]  }
 0xbca   :  { %7549 = vmatpush1.bf16.msra.mxu0 %v10800_v20  ;;  %7509 = vmatprep.subr.bf16.mxu1 %v10805_v0  ;;  %v10886_v20 = vld [vmem:[#allocation12 + $0x2e4] ss:$16 sps:$4 sm:$0xff]   ;;  %v10881_v0 = vld [vmem:[#allocation12 + $0xe0] ss:$16 sps:$4 sm:$0xff]  }
 0xbcb   :  { %7550 = vmatprep.subr.bf16.mxu0 %v10808_v58  ;;  %v10884_v58 = vld [vmem:[#allocation12 + $0x2e0] ss:$16 sps:$4 sm:$0xff]  }
 0xbcd   :  { %7510 = vmatpush1.bf16.msra.mxu1 %v10803_v9  ;;  %v10889_v9 = vld [vmem:[#allocation12 + $0xc4] ss:$16 sps:$4 sm:$0xff]  }
 0xbce   :  { %7551 = vmatpush1.bf16.msra.mxu0 %v10806_v26  ;;  %7511 = vmatprep.subr.bf16.mxu1 %v10811_v38  ;;  %v10892_v26 = vld [vmem:[#allocation12 + $0x2c4] ss:$16 sps:$4 sm:$0xff]   ;;  %v10887_v38 = vld [vmem:[#allocation12 + $0xc0] ss:$16 sps:$4 sm:$0xff]  }
 0xbcf   :  { %7552 = vmatprep.subr.bf16.mxu0 %v10814_v43  ;;  %v10890_v43 = vld [vmem:[#allocation12 + $0x2c0] ss:$16 sps:$4 sm:$0xff]  }
 0xbd1   :  { %7512 = vmatpush1.bf16.msra.mxu1 %v10809_v45  ;;  %v10895_v45 = vld [vmem:[#allocation12 + $0xa4] ss:$16 sps:$4 sm:$0xff]  }
 0xbd2   :  { %7553 = vmatpush1.bf16.msra.mxu0 %v10812_v6  ;;  %7513 = vmatprep.subr.bf16.mxu1 %v10817_v27  ;;  %v10898_v6 = vld [vmem:[#allocation12 + $0x2a4] ss:$16 sps:$4 sm:$0xff]   ;;  %v10893_v27 = vld [vmem:[#allocation12 + $0xa0] ss:$16 sps:$4 sm:$0xff]  }
 0xbd3   :  { %7554 = vmatprep.subr.bf16.mxu0 %v10820_v44  ;;  %v10901_v44 = vld [vmem:[#allocation12 + $0x84] ss:$16 sps:$4 sm:$0xff]  }
 0xbd5   :  { %7514 = vmatpush1.bf16.msra.mxu1 %v10815_v4  ;;  %v10899_v4 = vld [vmem:[#allocation12 + $0x80] ss:$16 sps:$4 sm:$0xff]  }
 0xbd6   :  { %7555 = vmatpush1.bf16.msra.mxu0 %v10818_v22  ;;  %7515 = vmatprep.subr.bf16.mxu1 %v10823_v24  ;;  %v10902_v22 = vld [vmem:[#allocation12 + $0x280] ss:$16 sps:$4 sm:$0xff]   ;;  %v10907_v24 = vld [vmem:[#allocation12 + $0x64] ss:$16 sps:$4 sm:$0xff]  }
 0xbd7   :  { %7556 = vmatprep.subr.bf16.mxu0 %v10826_v10  ;;  %v10910_v10 = vld [vmem:[#allocation12 + $0x264] ss:$16 sps:$4 sm:$0xff]  }
 0xbd9   :  { %7516 = vmatpush1.bf16.msra.mxu1 %v10821_v30  ;;  %v10905_v30 = vld [vmem:[#allocation12 + $0x60] ss:$16 sps:$4 sm:$0xff]  }
 0xbda   :  { %7557 = vmatpush1.bf16.msra.mxu0 %v10824_v37  ;;  %7517 = vmatprep.subr.bf16.mxu1 %v10829_v52  ;;  %v10908_v37 = vld [vmem:[#allocation12 + $0x260] ss:$16 sps:$4 sm:$0xff]   ;;  %v10913_v52 = vld [vmem:[#allocation12 + $0x44] ss:$16 sps:$4 sm:$0xff]  }
 0xbdb   :  { %7558 = vmatprep.subr.bf16.mxu0 %v10832_v54  ;;  %v10916_v54 = vld [vmem:[#allocation12 + $0x244] ss:$16 sps:$4 sm:$0xff]  }
 0xbdd   :  { %7518 = vmatpush1.bf16.msra.mxu1 %v10827_v2  ;;  %v10911_v2 = vld [vmem:[#allocation12 + $0x40] ss:$16 sps:$4 sm:$0xff]  }
 0xbde   :  { %7559 = vmatpush1.bf16.msra.mxu0 %v10830_v46  ;;  %7519 = vmatprep.subr.bf16.mxu1 %v10835_v12  ;;  %v10914_v46 = vld [vmem:[#allocation12 + $0x240] ss:$16 sps:$4 sm:$0xff]   ;;  %v10919_v12 = vld [vmem:[#allocation12 + $0x24] ss:$16 sps:$4 sm:$0xff]  }
 0xbdf   :  { %7560 = vmatprep.subr.bf16.mxu0 %v10838_v49  ;;  %v10922_v49 = vld [vmem:[#allocation12 + $0x224] ss:$16 sps:$4 sm:$0xff]  }
 0xbe1   :  { %7520 = vmatpush2.bf16.msra.mxu1 %v10833_v16  ;;  %v10917_v16 = vld [vmem:[#allocation12 + $0x20] ss:$16 sps:$4 sm:$0xff]  }
 0xbe2   :  { %7561 = vmatpush2.bf16.msra.mxu0 %v10836_v47  ;;  %7521 = vmatprep.subr.bf16.mxu1 %v10841_v15  ;;  %v10920_v47 = vld [vmem:[#allocation12 + $0x220] ss:$16 sps:$4 sm:$0xff]   ;;  %v10925_v15 = vld [vmem:[#allocation12 + $0x4] ss:$16 sps:$4 sm:$0xff]  }
 0xbe3   :  { %7562 = vmatprep.subr.bf16.mxu0 %v10844_v31  ;;  %v10928_v31 = vld [vmem:[#allocation12 + $0x204] ss:$16 sps:$4 sm:$0xff]  }
 0xbe5   :  { %7522 = vmatpush2.bf16.msra.mxu1 %v10839_v41  ;;  %v10923_v41 = vld [vmem:[#allocation12] ss:$16 sps:$4 sm:$0xff]  }
 0xbe6   :  { %7563 = vmatpush2.bf16.msra.mxu0 %v10842_v17  ;;  %7523 = vmatprep.subr.bf16.mxu1 %v10847_v59  ;;  %v10926_v17 = vld [vmem:[#allocation12 + $0x200] ss:$16 sps:$4 sm:$0xff]   ;;  %v10931_v59 = vld [vmem:[#allocation12 + $0x1e4] ss:$16 sps:$4 sm:$0xff]  }
 0xbe7   :  { %7564 = vmatprep.subr.bf16.mxu0 %v10850_v51  ;;  %v10934_v51 = vld [vmem:[#allocation12 + $0x3e4] ss:$16 sps:$4 sm:$0xff]  }
 0xbe9   :  { %7524 = vmatpush2.bf16.msra.mxu1 %v10845_v33  ;;  %v10929_v33 = vld [vmem:[#allocation12 + $0x1e0] ss:$16 sps:$4 sm:$0xff]  }
 0xbea   :  { %7565 = vmatpush2.bf16.msra.mxu0 %v10848_v34  ;;  %7525 = vmatprep.subr.bf16.mxu1 %v10853_v23  ;;  %v10932_v34 = vld [vmem:[#allocation12 + $0x3e0] ss:$16 sps:$4 sm:$0xff]   ;;  %v10937_v23 = vld [vmem:[#allocation12 + $0x1c4] ss:$16 sps:$4 sm:$0xff]  }
 0xbeb   :  { %7566 = vmatprep.subr.bf16.mxu0 %v10856_v63  ;;  %v10940_v63 = vld [vmem:[#allocation12 + $0x3c4] ss:$16 sps:$4 sm:$0xff]  }
 0xbed   :  { %7526 = vmatpush2.bf16.msra.mxu1 %v10851_v35  ;;  %v10935_v35 = vld [vmem:[#allocation12 + $0x1c0] ss:$16 sps:$4 sm:$0xff]  }
 0xbee   :  { %7567 = vmatpush2.bf16.msra.mxu0 %v10854_v18  ;;  %7527 = vmatprep.subr.bf16.mxu1 %v10859_v36  ;;  %v10938_v18 = vld [vmem:[#allocation12 + $0x3c0] ss:$16 sps:$4 sm:$0xff]   ;;  %v10943_v36 = vld [vmem:[#allocation12 + $0x1a4] ss:$16 sps:$4 sm:$0xff]  }
 0xbef   :  { %7568 = vmatprep.subr.bf16.mxu0 %v10862_v3  ;;  %v10946_v3 = vld [vmem:[#allocation12 + $0x3a4] ss:$16 sps:$4 sm:$0xff]  }
 0xbf1   :  { %7528 = vmatpush2.bf16.msra.mxu1 %v10857_v8  ;;  %v10941_v8 = vld [vmem:[#allocation12 + $0x1a0] ss:$16 sps:$4 sm:$0xff]  }
 0xbf2   :  { %7569 = vmatpush2.bf16.msra.mxu0 %v10860_v14  ;;  %7529 = vmatprep.subr.bf16.mxu1 %v10865_v5  ;;  %v10944_v14 = vld [vmem:[#allocation12 + $0x3a0] ss:$16 sps:$4 sm:$0xff]   ;;  %v10949_v5 = vld [vmem:[#allocation12 + $0x184] ss:$16 sps:$4 sm:$0xff]  }
 0xbf3   :  { %7570 = vmatprep.subr.bf16.mxu0 %v10868_v19  ;;  %v10952_v19 = vld [vmem:[#allocation12 + $0x384] ss:$16 sps:$4 sm:$0xff]  }
 0xbf5   :  { %7530 = vmatpush2.bf16.msra.mxu1 %v10863_v42  ;;  %v10947_v42 = vld [vmem:[#allocation12 + $0x180] ss:$16 sps:$4 sm:$0xff]  }
 0xbf6   :  { %7571 = vmatpush2.bf16.msra.mxu0 %v10866_v11  ;;  %7531 = vmatprep.subr.bf16.mxu1 %v10871_v56  ;;  %v10950_v11 = vld [vmem:[#allocation12 + $0x380] ss:$16 sps:$4 sm:$0xff]   ;;  %v10955_v56 = vld [vmem:[#allocation12 + $0x164] ss:$16 sps:$4 sm:$0xff]  }
 0xbf7   :  { %7572 = vmatprep.subr.bf16.mxu0 %v10874_v62  ;;  %v10958_v62 = vld [vmem:[#allocation12 + $0x364] ss:$16 sps:$4 sm:$0xff]  }
 0xbf9   :  { %7532 = vmatpush2.bf16.msra.mxu1 %v10869_v57  ;;  %v10953_v57 = vld [vmem:[#allocation12 + $0x160] ss:$16 sps:$4 sm:$0xff]  }
 0xbfa   :  { %7573 = vmatpush2.bf16.msra.mxu0 %v10872_v48  ;;  %7533 = vmatprep.subr.bf16.mxu1 %v10877_v61  ;;  %v10956_v48 = vld [vmem:[#allocation12 + $0x360] ss:$16 sps:$4 sm:$0xff]   ;;  %v10961_v61 = vld [vmem:[#allocation12 + $0x144] ss:$16 sps:$4 sm:$0xff]  }
 0xbfb   :  { %7574 = vmatprep.subr.bf16.mxu0 %v10880_v32  ;;  %v10964_v32 = vld [vmem:[#allocation12 + $0x344] ss:$16 sps:$4 sm:$0xff]  }
 0xbfd   :  { %7534 = vmatpush2.bf16.msra.mxu1 %v10875_v25  ;;  %v10959_v25 = vld [vmem:[#allocation12 + $0x140] ss:$16 sps:$4 sm:$0xff]  }
 0xbfe   :  { %7575 = vmatpush2.bf16.msra.mxu0 %v10878_v1  ;;  %8225 = vmatprep.subr.bf16.mxu1 %v10883_v28  ;;  %v10962_v1 = vld [vmem:[#allocation12 + $0x340] ss:$16 sps:$4 sm:$0xff]   ;;  %v10967_v28 = vld [vmem:[#allocation12 + $0x124] ss:$16 sps:$4 sm:$0xff]  }
 0xbff   :  { %8266 = vmatprep.subr.bf16.mxu0 %v10886_v20  ;;  %v10970_v20 = vld [vmem:[#allocation12 + $0x324] ss:$16 sps:$4 sm:$0xff]  }
 0xc00   :  { %7536 = vmatmul.mubr.bf16.vlgmr.msra.gmra.mxu1 %v13220_v53  ;;  %v10896_v53 = vld [vmem:[#allocation12 + $0x2a0] ss:$16 sps:$4 sm:$0xff]  }
 0xc01   :  { %7577 = vmatmul.mubr.bf16.vlgmr.msra.gmra.mxu0 %v13222_v60  ;;  %8226 = vmatpush1.bf16.msra.mxu1 %v10881_v0  ;;  %v10904_v60 = vld [vmem:[#allocation12 + $0x284] ss:$16 sps:$4 sm:$0xff]   ;;  %v10965_v0 = vld [vmem:[#allocation12 + $0x120] ss:$16 sps:$4 sm:$0xff]  }
 0xc02   :  { %8257 = vmatprep.mubr.bf16.mxu1 %v12333_v55  ;;  %8267 = vmatpush1.bf16.msra.mxu0 %v10884_v58  ;;  %v10968_v58 = vld [vmem:[#allocation12 + $0x320] ss:$16 sps:$4 sm:$0xff]  }
 0xc03   :  { %8298 = vmatprep.mubr.bf16.mxu0 %v12338_v13  ;;  %8227 = vmatprep.subr.bf16.mxu1 %v10889_v9  ;;  %v10973_v9 = vld [vmem:[#allocation12 + $0x104] ss:$16 sps:$4 sm:$0xff]  }
 0xc04   :  { %8268 = vmatprep.subr.bf16.mxu0 %v10892_v26  ;;  %v10976_v26 = vld [vmem:[#allocation12 + $0x304] ss:$16 sps:$4 sm:$0xff]  }
 0xc05   :  { %8228 = vmatpush1.bf16.msra.mxu1 %v10887_v38  ;;  %v10971_v38 = vld [vmem:[#allocation12 + $0x100] ss:$16 sps:$4 sm:$0xff]  }
 0xc06   :  { %8269 = vmatpush1.bf16.msra.mxu0 %v10890_v43  ;;  %8229 = vmatprep.subr.bf16.mxu1 %v10895_v45  ;;  %v10974_v43 = vld [vmem:[#allocation12 + $0x300] ss:$16 sps:$4 sm:$0xff]   ;;  %v10979_v45 = vld [vmem:[#allocation12 + $0xec] ss:$16 sps:$4 sm:$0xff]  }
 0xc07   :  { %8270 = vmatprep.subr.bf16.mxu0 %v10898_v6  ;;  %v10982_v6 = vld [vmem:[#allocation12 + $0x2ec] ss:$16 sps:$4 sm:$0xff]  }
 0xc09   :  { %8230 = vmatpush1.bf16.msra.mxu1 %v10893_v27  ;;  %v10977_v27 = vld [vmem:[#allocation12 + $0xe8] ss:$16 sps:$4 sm:$0xff]  }
 0xc0a   :  { %8271 = vmatpush1.bf16.msra.mxu0 %v10896_v53  ;;  %8231 = vmatprep.subr.bf16.mxu1 %v10901_v44  ;;  %v10980_v53 = vld [vmem:[#allocation12 + $0x2e8] ss:$16 sps:$4 sm:$0xff]   ;;  %v10985_v44 = vld [vmem:[#allocation12 + $0xcc] ss:$16 sps:$4 sm:$0xff]  }
 0xc0b   :  { %8272 = vmatprep.subr.bf16.mxu0 %v10904_v60  ;;  %v10988_v60 = vld [vmem:[#allocation12 + $0x2cc] ss:$16 sps:$4 sm:$0xff]  }
 0xc0d   :  { %8232 = vmatpush1.bf16.msra.mxu1 %v10899_v4  ;;  %v10983_v4 = vld [vmem:[#allocation12 + $0xc8] ss:$16 sps:$4 sm:$0xff]  }
 0xc0e   :  { %8273 = vmatpush1.bf16.msra.mxu0 %v10902_v22  ;;  %8233 = vmatprep.subr.bf16.mxu1 %v10907_v24  ;;  %v10986_v22 = vld [vmem:[#allocation12 + $0x2c8] ss:$16 sps:$4 sm:$0xff]   ;;  %v10991_v24 = vld [vmem:[#allocation12 + $0xac] ss:$16 sps:$4 sm:$0xff]  }
 0xc0f   :  { %8274 = vmatprep.subr.bf16.mxu0 %v10910_v10  ;;  %v10994_v10 = vld [vmem:[#allocation12 + $0x2ac] ss:$16 sps:$4 sm:$0xff]  }
 0xc11   :  { %8234 = vmatpush1.bf16.msra.mxu1 %v10905_v30  ;;  %v10989_v30 = vld [vmem:[#allocation12 + $0xa8] ss:$16 sps:$4 sm:$0xff]  }
 0xc12   :  { %8275 = vmatpush1.bf16.msra.mxu0 %v10908_v37  ;;  %8235 = vmatprep.subr.bf16.mxu1 %v10913_v52  ;;  %v10992_v37 = vld [vmem:[#allocation12 + $0x2a8] ss:$16 sps:$4 sm:$0xff]   ;;  %v10997_v52 = vld [vmem:[#allocation12 + $0x8c] ss:$16 sps:$4 sm:$0xff]  }
 0xc13   :  { %8276 = vmatprep.subr.bf16.mxu0 %v10916_v54  ;;  %v11000_v54 = vld [vmem:[#allocation12 + $0x28c] ss:$16 sps:$4 sm:$0xff]  }
 0xc15   :  { %8236 = vmatpush1.bf16.msra.mxu1 %v10911_v2  ;;  %v10995_v2 = vld [vmem:[#allocation12 + $0x88] ss:$16 sps:$4 sm:$0xff]  }
 0xc16   :  { %8277 = vmatpush1.bf16.msra.mxu0 %v10914_v46  ;;  %8237 = vmatprep.subr.bf16.mxu1 %v10919_v12  ;;  %v11003_v46 = vld [vmem:[#allocation12 + $0x6c] ss:$16 sps:$4 sm:$0xff]  }
 0xc17   :  { %8278 = vmatprep.subr.bf16.mxu0 %v10922_v49  ;;  %v11006_v12 = vld [vmem:[#allocation12 + $0x26c] ss:$16 sps:$4 sm:$0xff]   ;;  %v11004_v49 = vld [vmem:[#allocation12 + $0x268] ss:$16 sps:$4 sm:$0xff]  }
 0xc19   :  { %8238 = vmatpush1.bf16.msra.mxu1 %v10917_v16  ;;  %v11009_v16 = vld [vmem:[#allocation12 + $0x4c] ss:$16 sps:$4 sm:$0xff]  }
 0xc1a   :  { %8279 = vmatpush1.bf16.msra.mxu0 %v10920_v47  ;;  %8239 = vmatprep.subr.bf16.mxu1 %v10925_v15  ;;  %v11012_v47 = vld [vmem:[#allocation12 + $0x24c] ss:$16 sps:$4 sm:$0xff]   ;;  %v11007_v15 = vld [vmem:[#allocation12 + $0x48] ss:$16 sps:$4 sm:$0xff]  }
 0xc1b   :  { %8280 = vmatprep.subr.bf16.mxu0 %v10928_v31  ;;  %v11010_v31 = vld [vmem:[#allocation12 + $0x248] ss:$16 sps:$4 sm:$0xff]  }
 0xc1d   :  { %8240 = vmatpush1.bf16.msra.mxu1 %v10923_v41  ;;  %v11015_v41 = vld [vmem:[#allocation12 + $0x2c] ss:$16 sps:$4 sm:$0xff]  }
 0xc1e   :  { %8281 = vmatpush1.bf16.msra.mxu0 %v10926_v17  ;;  %8241 = vmatprep.subr.bf16.mxu1 %v10931_v59  ;;  %v11018_v17 = vld [vmem:[#allocation12 + $0x22c] ss:$16 sps:$4 sm:$0xff]   ;;  %v11013_v59 = vld [vmem:[#allocation12 + $0x28] ss:$16 sps:$4 sm:$0xff]  }
 0xc1f   :  { %8282 = vmatprep.subr.bf16.mxu0 %v10934_v51  ;;  %v11016_v51 = vld [vmem:[#allocation12 + $0x228] ss:$16 sps:$4 sm:$0xff]  }
 0xc21   :  { %8242 = vmatpush2.bf16.msra.mxu1 %v10929_v33  ;;  %v11021_v33 = vld [vmem:[#allocation12 + $0xc] ss:$16 sps:$4 sm:$0xff]  }
 0xc22   :  { %8283 = vmatpush2.bf16.msra.mxu0 %v10932_v34  ;;  %8243 = vmatprep.subr.bf16.mxu1 %v10937_v23  ;;  %v11024_v34 = vld [vmem:[#allocation12 + $0x20c] ss:$16 sps:$4 sm:$0xff]   ;;  %v11019_v23 = vld [vmem:[#allocation12 + $0x8] ss:$16 sps:$4 sm:$0xff]  }
 0xc23   :  { %8284 = vmatprep.subr.bf16.mxu0 %v10940_v63  ;;  %v11022_v63 = vld [vmem:[#allocation12 + $0x208] ss:$16 sps:$4 sm:$0xff]  }
 0xc25   :  { %8244 = vmatpush2.bf16.msra.mxu1 %v10935_v35  ;;  %v11027_v35 = vld [vmem:[#allocation12 + $0x1ec] ss:$16 sps:$4 sm:$0xff]  }
 0xc26   :  { %8285 = vmatpush2.bf16.msra.mxu0 %v10938_v18  ;;  %8245 = vmatprep.subr.bf16.mxu1 %v10943_v36  ;;  %v11030_v18 = vld [vmem:[#allocation12 + $0x3ec] ss:$16 sps:$4 sm:$0xff]   ;;  %v11025_v36 = vld [vmem:[#allocation12 + $0x1e8] ss:$16 sps:$4 sm:$0xff]  }
 0xc27   :  { %8286 = vmatprep.subr.bf16.mxu0 %v10946_v3  ;;  %v11028_v3 = vld [vmem:[#allocation12 + $0x3e8] ss:$16 sps:$4 sm:$0xff]  }
 0xc29   :  { %8246 = vmatpush2.bf16.msra.mxu1 %v10941_v8  ;;  %v11033_v8 = vld [vmem:[#allocation12 + $0x1cc] ss:$16 sps:$4 sm:$0xff]  }
 0xc2a   :  { %8287 = vmatpush2.bf16.msra.mxu0 %v10944_v14  ;;  %8247 = vmatprep.subr.bf16.mxu1 %v10949_v5  ;;  %v11036_v14 = vld [vmem:[#allocation12 + $0x3cc] ss:$16 sps:$4 sm:$0xff]   ;;  %v11031_v5 = vld [vmem:[#allocation12 + $0x1c8] ss:$16 sps:$4 sm:$0xff]  }
 0xc2b   :  { %8288 = vmatprep.subr.bf16.mxu0 %v10952_v19  ;;  %v11034_v19 = vld [vmem:[#allocation12 + $0x3c8] ss:$16 sps:$4 sm:$0xff]  }
 0xc2d   :  { %8248 = vmatpush2.bf16.msra.mxu1 %v10947_v42  ;;  %v11039_v42 = vld [vmem:[#allocation12 + $0x1ac] ss:$16 sps:$4 sm:$0xff]  }
 0xc2e   :  { %8289 = vmatpush2.bf16.msra.mxu0 %v10950_v11  ;;  %8249 = vmatprep.subr.bf16.mxu1 %v10955_v56  ;;  %v11042_v11 = vld [vmem:[#allocation12 + $0x3ac] ss:$16 sps:$4 sm:$0xff]   ;;  %v11037_v56 = vld [vmem:[#allocation12 + $0x1a8] ss:$16 sps:$4 sm:$0xff]  }
 0xc2f   :  { %8290 = vmatprep.subr.bf16.mxu0 %v10958_v62  ;;  %v11040_v62 = vld [vmem:[#allocation12 + $0x3a8] ss:$16 sps:$4 sm:$0xff]  }
 0xc31   :  { %8250 = vmatpush2.bf16.msra.mxu1 %v10953_v57  ;;  %v11045_v57 = vld [vmem:[#allocation12 + $0x18c] ss:$16 sps:$4 sm:$0xff]  }
 0xc32   :  { %8291 = vmatpush2.bf16.msra.mxu0 %v10956_v48  ;;  %8251 = vmatprep.subr.bf16.mxu1 %v10961_v61  ;;  %v11048_v48 = vld [vmem:[#allocation12 + $0x38c] ss:$16 sps:$4 sm:$0xff]   ;;  %v11043_v61 = vld [vmem:[#allocation12 + $0x188] ss:$16 sps:$4 sm:$0xff]  }
 0xc33   :  { %8292 = vmatprep.subr.bf16.mxu0 %v10964_v32  ;;  %v11046_v32 = vld [vmem:[#allocation12 + $0x388] ss:$16 sps:$4 sm:$0xff]  }
 0xc35   :  { %8252 = vmatpush2.bf16.msra.mxu1 %v10959_v25  ;;  %v11051_v25 = vld [vmem:[#allocation12 + $0x16c] ss:$16 sps:$4 sm:$0xff]  }
 0xc36   :  { %8293 = vmatpush2.bf16.msra.mxu0 %v10962_v1  ;;  %8253 = vmatprep.subr.bf16.mxu1 %v10967_v28  ;;  %v11054_v1 = vld [vmem:[#allocation12 + $0x36c] ss:$16 sps:$4 sm:$0xff]   ;;  %v11049_v28 = vld [vmem:[#allocation12 + $0x168] ss:$16 sps:$4 sm:$0xff]  }
 0xc37   :  { %8294 = vmatprep.subr.bf16.mxu0 %v10970_v20  ;;  %v11052_v20 = vld [vmem:[#allocation12 + $0x368] ss:$16 sps:$4 sm:$0xff]  }
 0xc39   :  { %8254 = vmatpush2.bf16.msra.mxu1 %v10965_v0  ;;  %v11057_v0 = vld [vmem:[#allocation12 + $0x14c] ss:$16 sps:$4 sm:$0xff]  }
 0xc3a   :  { %8295 = vmatpush2.bf16.msra.mxu0 %v10968_v58  ;;  %8255 = vmatprep.subr.bf16.mxu1 %v10973_v9  ;;  %v11060_v58 = vld [vmem:[#allocation12 + $0x34c] ss:$16 sps:$4 sm:$0xff]   ;;  %v11055_v9 = vld [vmem:[#allocation12 + $0x148] ss:$16 sps:$4 sm:$0xff]  }
 0xc3b   :  { %8296 = vmatprep.subr.bf16.mxu0 %v10976_v26  ;;  %v11058_v26 = vld [vmem:[#allocation12 + $0x348] ss:$16 sps:$4 sm:$0xff]  }
 0xc3d   :  { %8256 = vmatpush2.bf16.msra.mxu1 %v10971_v38  ;;  %v11063_v38 = vld [vmem:[#allocation12 + $0x12c] ss:$16 sps:$4 sm:$0xff]  }
 0xc3e   :  { %8297 = vmatpush2.bf16.msra.mxu0 %v10974_v43  ;;  %8307 = vmatprep.subr.bf16.mxu1 %v10979_v45  ;;  %v11066_v43 = vld [vmem:[#allocation12 + $0x32c] ss:$16 sps:$4 sm:$0xff]   ;;  %v11061_v45 = vld [vmem:[#allocation12 + $0x128] ss:$16 sps:$4 sm:$0xff]  }
 0xc3f   :  { %8348 = vmatprep.subr.bf16.mxu0 %v10982_v6  ;;  %v11064_v6 = vld [vmem:[#allocation12 + $0x328] ss:$16 sps:$4 sm:$0xff]  }
 0xc40   :  { %8258 = vmatmul.mubr.bf16.vlgmr.msra.gmra.mxu1 %v12336_v50 }
 0xc41   :  { %8299 = vmatmul.mubr.bf16.vlgmr.msra.gmra.mxu0 %v12342_v21  ;;  %8308 = vmatpush1.bf16.msra.mxu1 %v10977_v27  ;;  %v11069_v27 = vld [vmem:[#allocation12 + $0x10c] ss:$16 sps:$4 sm:$0xff]  }
 0xc42   :  { %8339 = vmatprep.mubr.bf16.mxu1 %v12333_v55  ;;  %8349 = vmatpush1.bf16.msra.mxu0 %v10980_v53  ;;  %v10998_v55 = vld [vmem:[#allocation12 + $0x288] ss:$16 sps:$4 sm:$0xff]   ;;  %v11072_v53 = vld [vmem:[#allocation12 + $0x30c] ss:$16 sps:$4 sm:$0xff]  }
 0xc43   :  { %8380 = vmatprep.mubr.bf16.mxu0 %v12338_v13  ;;  %8309 = vmatprep.subr.bf16.mxu1 %v10985_v44  ;;  %v11001_v13 = vld [vmem:[#allocation12 + $0x68] ss:$16 sps:$4 sm:$0xff]  }
 0xc44   :  { %8350 = vmatprep.subr.bf16.mxu0 %v10988_v60  ;;  %v11067_v44 = vld [vmem:[#allocation12 + $0x108] ss:$16 sps:$4 sm:$0xff]  }
 0xc45   :  { %8310 = vmatpush1.bf16.msra.mxu1 %v10983_v4  ;;  %v11070_v60 = vld [vmem:[#allocation12 + $0x308] ss:$16 sps:$4 sm:$0xff]  }
 0xc46   :  { %8351 = vmatpush1.bf16.msra.mxu0 %v10986_v22  ;;  %8311 = vmatprep.subr.bf16.mxu1 %v10991_v24 }
 0xc47   :  { %8352 = vmatprep.subr.bf16.mxu0 %v10994_v10 }
 0xc49   :  { %8312 = vmatpush1.bf16.msra.mxu1 %v10989_v30 }
 0xc4a   :  { %8353 = vmatpush1.bf16.msra.mxu0 %v10992_v37  ;;  %8313 = vmatprep.subr.bf16.mxu1 %v10997_v52 }
 0xc4b   :  { %8354 = vmatprep.subr.bf16.mxu0 %v11000_v54 }
 0xc4d   :  { %8314 = vmatpush1.bf16.msra.mxu1 %v10995_v2 }
 0xc4e   :  { %8355 = vmatpush1.bf16.msra.mxu0 %v10998_v55  ;;  %8315 = vmatprep.subr.bf16.mxu1 %v11003_v46 }
 0xc4f   :  { %8356 = vmatprep.subr.bf16.mxu0 %v11006_v12 }
 0xc51   :  { %8316 = vmatpush1.bf16.msra.mxu1 %v11001_v13 }
 0xc52   :  { %8357 = vmatpush1.bf16.msra.mxu0 %v11004_v49  ;;  %8317 = vmatprep.subr.bf16.mxu1 %v11009_v16 }
 0xc53   :  { %8358 = vmatprep.subr.bf16.mxu0 %v11012_v47 }
 0xc55   :  { %8318 = vmatpush1.bf16.msra.mxu1 %v11007_v15 }
 0xc56   :  { %8359 = vmatpush1.bf16.msra.mxu0 %v11010_v31  ;;  %8319 = vmatprep.subr.bf16.mxu1 %v11015_v41 }
 0xc57   :  { %8360 = vmatprep.subr.bf16.mxu0 %v11018_v17 }
 0xc59   :  { %8320 = vmatpush1.bf16.msra.mxu1 %v11013_v59 }
 0xc5a   :  { %8361 = vmatpush1.bf16.msra.mxu0 %v11016_v51  ;;  %8321 = vmatprep.subr.bf16.mxu1 %v11021_v33 }
 0xc5b   :  { %8362 = vmatprep.subr.bf16.mxu0 %v11024_v34 }
 0xc5d   :  { %8322 = vmatpush1.bf16.msra.mxu1 %v11019_v23 }
 0xc5e   :  { %8363 = vmatpush1.bf16.msra.mxu0 %v11022_v63  ;;  %8323 = vmatprep.subr.bf16.mxu1 %v11027_v35 }
 0xc5f   :  { %8364 = vmatprep.subr.bf16.mxu0 %v11030_v18 }
 0xc61   :  { %8324 = vmatpush2.bf16.msra.mxu1 %v11025_v36 }
 0xc62   :  { %8365 = vmatpush2.bf16.msra.mxu0 %v11028_v3  ;;  %8325 = vmatprep.subr.bf16.mxu1 %v11033_v8 }
 0xc63   :  { %8366 = vmatprep.subr.bf16.mxu0 %v11036_v14 }
 0xc65   :  { %8326 = vmatpush2.bf16.msra.mxu1 %v11031_v5 }
 0xc66   :  { %8367 = vmatpush2.bf16.msra.mxu0 %v11034_v19  ;;  %8327 = vmatprep.subr.bf16.mxu1 %v11039_v42 }
 0xc67   :  { %8368 = vmatprep.subr.bf16.mxu0 %v11042_v11 }
 0xc69   :  { %8328 = vmatpush2.bf16.msra.mxu1 %v11037_v56 }
 0xc6a   :  { %8369 = vmatpush2.bf16.msra.mxu0 %v11040_v62  ;;  %8329 = vmatprep.subr.bf16.mxu1 %v11045_v57 }
 0xc6b   :  { %8370 = vmatprep.subr.bf16.mxu0 %v11048_v48 }
 0xc6d   :  { %8330 = vmatpush2.bf16.msra.mxu1 %v11043_v61 }
 0xc6e   :  { %8371 = vmatpush2.bf16.msra.mxu0 %v11046_v32  ;;  %8331 = vmatprep.subr.bf16.mxu1 %v11051_v25 }
 0xc6f   :  { %8372 = vmatprep.subr.bf16.mxu0 %v11054_v1 }
 0xc71   :  { %8332 = vmatpush2.bf16.msra.mxu1 %v11049_v28 }
 0xc72   :  { %8373 = vmatpush2.bf16.msra.mxu0 %v11052_v20  ;;  %8333 = vmatprep.subr.bf16.mxu1 %v11057_v0 }
 0xc73   :  { %8374 = vmatprep.subr.bf16.mxu0 %v11060_v58 }
 0xc75   :  { %8334 = vmatpush2.bf16.msra.mxu1 %v11055_v9 }
 0xc76   :  { %8375 = vmatpush2.bf16.msra.mxu0 %v11058_v26  ;;  %8335 = vmatprep.subr.bf16.mxu1 %v11063_v38 }
 0xc77   :  { %8376 = vmatprep.subr.bf16.mxu0 %v11066_v43 }
 0xc79   :  { %8336 = vmatpush2.bf16.msra.mxu1 %v11061_v45 }
 0xc7a   :  { %8377 = vmatpush2.bf16.msra.mxu0 %v11064_v6  ;;  %8337 = vmatprep.subr.bf16.mxu1 %v11069_v27 }
 0xc7b   :  { %8378 = vmatprep.subr.bf16.mxu0 %v11072_v53 }
 0xc7d   :  { %8338 = vmatpush2.bf16.msra.mxu1 %v11067_v44 }
 0xc7e   :  { %8379 = vmatpush2.bf16.msra.mxu0 %v11070_v60 }
 0xc80   :  { %8340 = vmatmul.mubr.bf16.vlgmr.msra.gmra.mxu1 %v12336_v50  ;;  %v7455_v4 = vpop.f32.mrf.mxu1 }
 0xc81   :  { %8381 = vmatmul.mubr.bf16.vlgmr.msra.gmra.mxu0 %v12342_v21  ;;  %v7496_v22 = vpop.f32.mrf.mxu0  ;;  %v8389_v21 = vld [vmem:[%s13268_s13] sm:$0xf] }
 0xc82   :  { %v7497_v24 = vadd.f32 %v7496_v22, %v7455_v4  ;;  %v7457_v10 = vpop.f32.mrf.mxu1  ;;  %v8394_v33 = vrot.slane %v8389_v21, %v12135_v39  ;;  %v8398_v18 = vrot.slane %v8389_v21, %v12138_v7  ;;  %v8402_v28 = vrot.slane %v8389_v21, %v13798_v40 }
 0xc83   :  { %v7498_v30 = vpop.f32.mrf.mxu0  ;;  %v8406_v26 = vrot.slane %v8389_v21, %v13797_v29 }
 0xc84   :  { %v7499_v37 = vadd.f32 %v7498_v30, %v7457_v10  ;;  %v7459_v52 = vpop.f32.mrf.mxu1 }
 0xc85   :  { %v7500_v54 = vpop.f32.mrf.mxu0 }
 0xc86   :  { %v7460_v2 = vpop.f32.mrf.mxu1 }
 0xc87   :  { %v7501_v55 = vpop.f32.mrf.mxu0 }
 0xcc0   :  { %v7537_v46 = vpop.f32.mrf.mxu1 }
 0xcc1   :  { %v7578_v12 = vpop.f32.mrf.mxu0 }
 0xcc2   :  { %v7579_v13 = vadd.f32 %v7578_v12, %v7537_v46  ;;  %v7539_v49 = vpop.f32.mrf.mxu1 }
 0xcc3   :  { %v7580_v16 = vpop.f32.mrf.mxu0 }
 0xcc4   :  { %v7581_v47 = vadd.f32 %v7580_v16, %v7539_v49  ;;  %v7541_v15 = vpop.f32.mrf.mxu1 }
 0xcc5   :  { %v7582_v50 = vpop.f32.mrf.mxu0 }
 0xcc6   :  { %v7542_v31 = vpop.f32.mrf.mxu1 }
 0xcc7   :  { %v7583_v41 = vpop.f32.mrf.mxu0 }
 0xd00   :  { %v8259_v17 = vpop.f32.mrf.mxu1 }
 0xd01   :  { %v8260_v59 = vadd.f32 %v8259_v17, %v7497_v24  ;;  %v8300_v51 = vpop.f32.mrf.mxu0 }
 0xd02   :  { %v8261_v34 = vpop.f32.mrf.mxu1 }
 0xd03   :  { %v8301_v23 = vadd.f32 %v8300_v51, %v8260_v59  ;;  %v8262_v63 = vadd.f32 %v8261_v34, %v7499_v37  ;;  %v8302_v35 = vpop.f32.mrf.mxu0 }
 0xd04   :  { %v8263_v36 = vpop.f32.mrf.mxu1 }
 0xd05   :  { %v8411_v3 = vadd.f32 %v8394_v33, %v8301_v23  ;;  %v8303_v8 = vadd.f32 %v8302_v35, %v8262_v63  ;;  %v8304_v14 = vpop.f32.mrf.mxu0 }
 0xd06   :  { %v8264_v5 = vpop.f32.mrf.mxu1 }
 0xd07   :  { %v9539_v19 = vmul.f32 -1.442695, %v8411_v3  ;;  %v8412_v42 = vadd.f32 %v8398_v18, %v8303_v8  ;;  %v8305_v11 = vpop.f32.mrf.mxu0 }
 0xd09   :  { %11081 = vpow2.f32 %v9539_v19  ;;  %v9540_v56 = vmul.f32 -1.442695, %v8412_v42 }
 0xd0b   :  { %11083 = vpow2.f32 %v9540_v56 }
 0xd16   :  { %v11082_v62 = vpop.eup %11081 }
 0xd17   :  { %v8427_v57 = vadd.f32 1.0, %v11082_v62 }
 0xd18   :  { %v11084_v39 = vpop.eup %11083 }
 0xd19   :  { %11085 = vrcp.f32 %v8427_v57  ;;  %v8428_v48 = vadd.f32 1.0, %v11084_v39 }
 0xd1b   :  { %11087 = vrcp.f32 %v8428_v48 }
 0xd26   :  { %v11086_v61 = vpop.eup %11085 }
 0xd27   :  { %8439 = vst [vmem:[%s13269_s14] sm:$0xff] %v11086_v61 }
 0xd28   :  { %v11088_v7 = vpop.eup %11087 }
 0xd29   :  { %8440 = vst [vmem:[%s13269_s14 + $0x8] sm:$0xff] %v11088_v7 }
 0xd40   :  { %v8341_v32 = vpop.f32.mrf.mxu1 }
 0xd41   :  { %v8342_v25 = vadd.f32 %v8341_v32, %v7579_v13  ;;  %v8382_v1 = vpop.f32.mrf.mxu0 }
 0xd42   :  { %v8343_v20 = vpop.f32.mrf.mxu1 }
 0xd43   :  { %v8383_v0 = vadd.f32 %v8382_v1, %v8342_v25  ;;  %v8344_v58 = vadd.f32 %v8343_v20, %v7581_v47  ;;  %v8384_v9 = vpop.f32.mrf.mxu0 }
 0xd44   :  { %v8345_v38 = vpop.f32.mrf.mxu1 }
 0xd45   :  { %v8413_v43 = vadd.f32 %v8402_v28, %v8383_v0  ;;  %v8385_v45 = vadd.f32 %v8384_v9, %v8344_v58  ;;  %v8386_v6 = vpop.f32.mrf.mxu0 }
 0xd46   :  { %v8346_v27 = vpop.f32.mrf.mxu1 }
 0xd47   :  { %v9541_v53 = vmul.f32 -1.442695, %v8413_v43  ;;  %v8414_v44 = vadd.f32 %v8406_v26, %v8385_v45  ;;  %v8387_v60 = vpop.f32.mrf.mxu0 }
 0xd49   :  { %11089 = vpow2.f32 %v9541_v53  ;;  %v9542_v4 = vmul.f32 -1.442695, %v8414_v44 }
 0xd4b   :  { %11091 = vpow2.f32 %v9542_v4 }
 0xd56   :  { %v11090_v22 = vpop.eup %11089 }
 0xd57   :  { %v8429_v24 = vadd.f32 1.0, %v11090_v22 }
 0xd58   :  { %v11092_v40 = vpop.eup %11091 }
 0xd59   :  { %11093 = vrcp.f32 %v8429_v24  ;;  %v8430_v10 = vadd.f32 1.0, %v11092_v40 }
 0xd5b   :  { %11095 = vrcp.f32 %v8430_v10 }
 0xd66   :  { %v11094_v30 = vpop.eup %11093 }
 0xd67   :  { %8441 = vst [vmem:[%s13269_s14 + $0x10] sm:$0xff] %v11094_v30 }
 0xd68   :  { %v11096_v29 = vpop.eup %11095 }
 0xd69   :  { %8442 = vst [vmem:[%s13269_s14 + $0x18] sm:$0xff] %v11096_v29 }
 0xd6a   :  { %8447 = vsyncpa [#allocation3], 1 }
 0xd6b   :  { %8448 = vsyncpa [#allocation7], 1 }
 0xd6c   :  { %8449 = vsyncpa [#allocation10], 1 }
 0xd6d   :  { %8450 = vsyncpa [#allocation13], 1 }
 0xd6e   :  { %8451 = vsyncpa [#allocation4], 1 }

</bundles_post_ra>
